<compile_context>
chip_gen: v7x
topology: tpu7x:2x2x1
jax: 0.10.0
libtpu: 0.0.40
codegen_flags: <defaults>
</compile_context>

<pallas_src>
import functools
import math

import jax
import jax.numpy as jnp
import numpy as np
from jax.experimental import pallas as pl
from jax.experimental.pallas import tpu as pltpu


def _round_up(x, m):
    return ((x + m - 1) // m) * m


# ----------------------------- fused Pallas kernel ----------------------------

def agent_kernel(x_ref, ws_ref, bs_ref, wr1_ref, br1_ref, wr2_ref, br2_ref,
                 wh_ref, bh_ref, hm_ref, blv_ref, blp_ref, out_ref,
                 *, num_layers, tbq):
    """One batch tile (TB = 4*tbq boards) of the full Agent forward, 4x lane-packed.

    Packed row r = cell*tbq + j carries boards (g*tbq + j, g=0..3) in lane groups.

    x_ref   : (RT, 12)          packed boards, RT = 9*tbq, lanes = 3*g + channel
    ws/bs   : (12, 4C)/(1, 4C)  stem 1x1 conv (+ folded BN), block-diag lane-packed
    wr*/br* : (L,4C,4C)/(L,1,4C) residual tower (+ folded BN), block-diag lane-packed
    wh/bh   : (4C, 12)/(1, 12)  combined [value|policy0|policy1] head convs (+ folded BN)
    hm      : (27, 10)          row 3*s+c maps ReLU'd head activation (cell s, col c)
                                to [value | 9 logits]  (Linear(9,1)/Linear(18,9) folded)
    blv/blp : (1,1)/(1,9)       head linear biases
    out_ref : (TB, 128)         lane-dense output: col 0 = value, cols 1..9 = probs
    """
    # Stem: 1x1 conv(3->C) + folded BN + ReLU   ((RT,12) @ (12,4C)).
    h = jnp.dot(x_ref[...], ws_ref[...], preferred_element_type=jnp.float32) + bs_ref[...]
    h = jnp.maximum(h, 0.0)

    # Residual tower: [conv+BN+ReLU, conv+BN] + skip, ReLU.  Weights are block-diagonal
    # (4C x 4C), so every matmul is fully lane-dense.
    for l in range(num_layers):
        y = jnp.dot(h, wr1_ref[l], preferred_element_type=jnp.float32) + br1_ref[l]
        y = jnp.maximum(y, 0.0)
        y = jnp.dot(y, wr2_ref[l], preferred_element_type=jnp.float32) + br2_ref[l]
        h = jnp.maximum(y + h, 0.0)

    # Both head 1x1 convs (+ folded BN) in one matmul, then the post-flatten ReLU.
    hv = jnp.dot(h, wh_ref[...], preferred_element_type=jnp.float32) + bh_ref[...]
    hv = jnp.maximum(hv, 0.0)                        # (RT, 12): [v, p0, p1] x 4 groups

    hm = hm_ref[...]                                 # (27, 10)
    blv = blv_ref[...]                               # (1, 1)
    blp = blp_ref[...]                               # (1, 9)

    out_ref[...] = jnp.zeros(out_ref.shape, out_ref.dtype)

    # Per-board reductions over the 9 cells: static contiguous sublane slices,
    # accumulated with VPU FMAs (no data-dependent MXU pushes, no O(TB^2) constants).
    for g in range(4):
        acc = jnp.zeros((tbq, 10), jnp.float32)
        for s in range(9):
            blk = hv[s * tbq:(s + 1) * tbq, 3 * g:3 * g + 3]          # (tbq, 3)
            for c in range(3):
                acc = acc + blk[:, c:c + 1] * hm[3 * s + c:3 * s + c + 1, :]
        value_g = jnp.tanh(acc[:, 0:1] + blv)                          # (tbq, 1)
        logits_g = acc[:, 1:10] + blp                                  # (tbq, 9)
        # softmax == Categorical(logits).probs  (exact division so probs sum to 1)
        m = jnp.max(logits_g, axis=-1, keepdims=True)
        e = jnp.exp(logits_g - m)
        probs_g = e / jnp.sum(e, axis=-1, keepdims=True)
        out_ref[g * tbq:(g + 1) * tbq, 0:1] = value_g
        out_ref[g * tbq:(g + 1) * tbq, 1:10] = probs_g


# ------------------------------- wrapper --------------------------------------

@functools.partial(jax.jit, static_argnames=("channels", "res_layers"))
def agent_forward(x_nchw, params, *, channels, res_layers):
    B = x_nchw.shape[0]
    C, L = channels, res_layers
    W = 4 * C                                      # packed lane width (128 for C=32)

    # --- batch tiling -----------------------------------------------------------
    # TB = boards per grid step.  Head slices need TB % 4 == 0 (we round to 8);
    # multi-step grids additionally need (9*TB/4) % 8 == 0  =>  TB % 32 == 0.
    TB_MAX = 512
    TB = min(_round_up(B, 8), TB_MAX)
    if B <= TB_MAX and TB >= 64:
        # Give the "parallel" batch axis >= 2 steps so v7x's two TensorCores both work.
        TB = _round_up((TB + 1) // 2, 32)
    Bp = _round_up(B, TB)
    NT, TBq = Bp // TB, TB // 4
    RT = 9 * TBq                                   # packed rows per tile
    grid = (NT,)

    # --- input packing: NCHW -> per-tile cell-major, 4 boards per packed row ----
    x_cells = jnp.transpose(x_nchw, (0, 2, 3, 1)).reshape(B, 9, 3)
    if Bp != B:
        x_cells = jnp.pad(x_cells, ((0, Bp - B), (0, 0), (0, 0)))
    x_packed = (x_cells.reshape(NT, 4, TBq, 9, 3)
                .transpose(0, 3, 2, 1, 4)
                .reshape(NT * RT, 12))

    # --- lane-packed (block-diagonal) weights, built once at trace time ---------
    eye4 = jnp.eye(4, dtype=jnp.float32)

    def pack_w(w):            # (a, b) -> (4a, 4b) = kron(I4, w)
        a, b = w.shape
        return jnp.einsum("gh,ij->gihj", eye4, w).reshape(4 * a, 4 * b)

    def pack_w_stack(w):      # (L, a, b) -> (L, 4a, 4b)
        l, a, b = w.shape
        return jnp.einsum("gh,lij->lgihj", eye4, w).reshape(l, 4 * a, 4 * b)

    ws_p = pack_w(params["w_stem"])                 # (12, 4C)
    bs_p = jnp.tile(params["b_stem"], (1, 4))       # (1, 4C)
    wr1_p = pack_w_stack(params["wr1"])             # (L, 4C, 4C)
    br1_p = jnp.tile(params["br1"], (1, 1, 4))      # (L, 1, 4C)
    wr2_p = pack_w_stack(params["wr2"])
    br2_p = jnp.tile(params["br2"], (1, 1, 4))
    w_heads = jnp.concatenate([params["w_vconv"], params["w_pconv"]], axis=1)   # (C, 3)
    b_heads = jnp.concatenate([params["b_vconv"], params["b_pconv"]], axis=1)   # (1, 3)
    wh_p = pack_w(w_heads)                          # (4C, 12)
    bh_p = jnp.tile(b_heads, (1, 4))                # (1, 12)

    # Head map: fold Linear(9,1) / Linear(18,9) (with the channel-major PyTorch
    # flatten) into a tiny per-cell constant. Row 3*s+c -> [value | 9 logits].
    hm = jnp.zeros((27, 10), jnp.float32)
    hm = hm.at[0::3, 0].set(params["w_lv"].reshape(9))
    hm = hm.at[1::3, 1:10].set(params["w_lp"][0:9, :])
    hm = hm.at[2::3, 1:10].set(params["w_lp"][9:18, :])

    def const(shape):
        n = len(shape)
        return pl.BlockSpec(shape, lambda i, _n=n: (0,) * _n)

    out = pl.pallas_call(
        functools.partial(agent_kernel, num_layers=L, tbq=TBq),
        grid=grid,
        in_specs=[
            pl.BlockSpec((RT, 12), lambda i: (i, 0)),   # packed boards, tiled over batch
            const((12, W)), const((1, W)),
            const((L, W, W)), const((L, 1, W)),
            const((L, W, W)), const((L, 1, W)),
            const((W, 12)), const((1, 12)),
            const((27, 10)), const((1, 1)), const((1, 9)),
        ],
        out_specs=pl.BlockSpec((TB, 128), lambda i: (i, 0)),
        out_shape=jax.ShapeDtypeStruct((Bp, 128), jnp.float32),
        compiler_params=pltpu.CompilerParams(
            dimension_semantics=("parallel",),
            vmem_limit_bytes=32 * 1024 * 1024),
    )(x_packed, ws_p, bs_p, wr1_p, br1_p, wr2_p, br2_p, wh_p, bh_p, hm,
      params["b_lv"], params["b_lp"])

    value = out[:B, 0:1]
    probs = out[:B, 1:10]
    return value, probs


# ------------------------- deterministic parameters ---------------------------

def fold_conv_bn(key, cin, cout, eps=1e-5):
    """1x1 Conv2d(cin,cout) + eval-mode BatchNorm2d(cout), folded into (W, b)."""
    k = jax.random.split(key, 6)
    w = jax.random.normal(k[0], (cout, cin), jnp.float32) / math.sqrt(cin)
    b = 0.1 * jax.random.normal(k[1], (cout,), jnp.float32)
    gamma = 1.0 + 0.1 * jax.random.normal(k[2], (cout,), jnp.float32)
    beta = 0.1 * jax.random.normal(k[3], (cout,), jnp.float32)
    rmean = 0.1 * jax.random.normal(k[4], (cout,), jnp.float32)
    rvar = 1.0 + 0.1 * jax.random.uniform(k[5], (cout,), jnp.float32)
    scale = gamma / jnp.sqrt(rvar + eps)
    wf = (w * scale[:, None]).T               # (cin, cout)  channels-last matmul form
    bf = scale * (b - rmean) + beta           # (cout,)
    return wf, bf.reshape(1, cout)


def init_params(key, channels, res_layers):
    C, L = channels, res_layers
    keys = jax.random.split(key, 4 + 2 * L)
    w_stem, b_stem = fold_conv_bn(keys[0], 3, C)
    wr1, br1, wr2, br2 = [], [], [], []
    for l in range(L):
        a, ba = fold_conv_bn(keys[4 + 2 * l], C, C)
        c, bc = fold_conv_bn(keys[5 + 2 * l], C, C)
        wr1.append(a); br1.append(ba); wr2.append(c); br2.append(bc)
    w_vconv, b_vconv = fold_conv_bn(keys[1], C, 1)
    w_pconv, b_pconv = fold_conv_bn(keys[2], C, 2)
    klin = jax.random.split(keys[3], 4)
    w_lv = jax.random.normal(klin[0], (1, 9), jnp.float32) / 3.0                  # Linear(9,1).weight
    b_lv = 0.1 * jax.random.normal(klin[1], (1,), jnp.float32)
    w_lp = jax.random.normal(klin[2], (9, 18), jnp.float32) / math.sqrt(18.0)     # Linear(18,9).weight
    b_lp = 0.1 * jax.random.normal(klin[3], (9,), jnp.float32)
    return {
        "w_stem": w_stem, "b_stem": b_stem,
        "wr1": jnp.stack(wr1), "br1": jnp.stack(br1),
        "wr2": jnp.stack(wr2), "br2": jnp.stack(br2),
        "w_vconv": w_vconv, "b_vconv": b_vconv,
        "w_pconv": w_pconv, "b_pconv": b_pconv,
        "w_lv": w_lv.T, "b_lv": b_lv.reshape(1, 1),       # (9,1), (1,1)
        "w_lp": w_lp.T, "b_lp": b_lp.reshape(1, 9),       # (18,9) [c*9+s, o], (1,9)
    }


# ---------------------------- pure-JAX reference -------------------------------

def reference_forward(x_nchw, params, *, channels, res_layers):
    dot = functools.partial(jnp.dot, precision=jax.lax.Precision.HIGHEST)
    B = x_nchw.shape[0]
    X = jnp.transpose(x_nchw, (0, 2, 3, 1)).reshape(B * 9, 3)
    h = jnp.maximum(dot(X, params["w_stem"]) + params["b_stem"], 0.0)
    for l in range(res_layers):
        y = jnp.maximum(dot(h, params["wr1"][l]) + params["br1"][l], 0.0)
        y = dot(y, params["wr2"][l]) + params["br2"][l]
        h = jnp.maximum(y + h, 0.0)
    v = (dot(h, params["w_vconv"]) + params["b_vconv"]).reshape(B, 9)
    p = (dot(h, params["w_pconv"]) + params["b_pconv"]).reshape(B, 9, 2)
    p = jnp.transpose(p, (0, 2, 1)).reshape(B, 18)
    value = jnp.tanh(dot(jnp.maximum(v, 0.0), params["w_lv"]) + params["b_lv"])
    logits = dot(jnp.maximum(p, 0.0), params["w_lp"]) + params["b_lp"]
    return value, jax.nn.softmax(logits, axis=-1)


# ----------------------------------- main --------------------------------------

if __name__ == "__main__":
    B, CH, L = 2, 32, 3          # batch, channels, res_layers
    key = jax.random.PRNGKey(0)
    kp, kx = jax.random.split(key)
    params = init_params(kp, CH, L)
    x = jax.random.normal(kx, (B, 3, 3, 3), jnp.float32)   # NCHW: 3 board planes, 3x3 board

    value, probs = agent_forward(x, params, channels=CH, res_layers=L)
    jax.block_until_ready((value, probs))

    ref_v, ref_p = reference_forward(x, params, channels=CH, res_layers=L)
    assert value.shape == (B, 1) and probs.shape == (B, 9)
    assert np.allclose(np.asarray(value), np.asarray(ref_v), atol=5e-4), "value mismatch"
    assert np.allclose(np.asarray(probs), np.asarray(ref_p), atol=2e-3), "probs mismatch"
    assert np.allclose(np.asarray(probs).sum(-1), 1.0, atol=1e-3)

    print("KERNEL_OK")
</pallas_src>

<mosaic_0001>
module attributes {stable_mosaic.version = 11 : i64} {
  func.func @agent_kernel(%arg0: i32, %arg1: memref<18x12xf32, #tpu.memory_space<vmem>>, %arg2: memref<12x128xf32, #tpu.memory_space<vmem>>, %arg3: memref<1x128xf32, #tpu.memory_space<vmem>>, %arg4: memref<3x128x128xf32, #tpu.memory_space<vmem>>, %arg5: memref<3x1x128xf32, #tpu.memory_space<vmem>>, %arg6: memref<3x128x128xf32, #tpu.memory_space<vmem>>, %arg7: memref<3x1x128xf32, #tpu.memory_space<vmem>>, %arg8: memref<128x12xf32, #tpu.memory_space<vmem>>, %arg9: memref<1x12xf32, #tpu.memory_space<vmem>>, %arg10: memref<27x10xf32, #tpu.memory_space<vmem>>, %arg11: memref<1x1xf32, #tpu.memory_space<vmem>>, %arg12: memref<1x9xf32, #tpu.memory_space<vmem>>, %arg13: memref<8x128xf32, #tpu.memory_space<vmem>>) attributes {dimension_semantics = [#tpu.dimension_semantics<parallel>], iteration_bounds = array<i64: 1>, scalar_prefetch = 0 : i64, scratch_operands = 0 : i64, tpu.core_type = #tpu.core_type<tc>, window_params = [{transform_indices = @transform_0, window_bounds = array<i64: 18, 12>}, {pipeline_mode = #tpu.pipeline_mode<synchronous>, transform_indices = @transform_1, window_bounds = array<i64: 12, 128>}, {pipeline_mode = #tpu.pipeline_mode<synchronous>, transform_indices = @transform_2, window_bounds = array<i64: 1, 128>}, {pipeline_mode = #tpu.pipeline_mode<synchronous>, transform_indices = @transform_3, window_bounds = array<i64: 3, 128, 128>}, {pipeline_mode = #tpu.pipeline_mode<synchronous>, transform_indices = @transform_4, window_bounds = array<i64: 3, 1, 128>}, {pipeline_mode = #tpu.pipeline_mode<synchronous>, transform_indices = @transform_5, window_bounds = array<i64: 3, 128, 128>}, {pipeline_mode = #tpu.pipeline_mode<synchronous>, transform_indices = @transform_6, window_bounds = array<i64: 3, 1, 128>}, {pipeline_mode = #tpu.pipeline_mode<synchronous>, transform_indices = @transform_7, window_bounds = array<i64: 128, 12>}, {pipeline_mode = #tpu.pipeline_mode<synchronous>, transform_indices = @transform_8, window_bounds = array<i64: 1, 12>}, {pipeline_mode = #tpu.pipeline_mode<synchronous>, transform_indices = @transform_9, window_bounds = array<i64: 27, 10>}, {pipeline_mode = #tpu.pipeline_mode<synchronous>, transform_indices = @transform_10, window_bounds = array<i64: 1, 1>}, {pipeline_mode = #tpu.pipeline_mode<synchronous>, transform_indices = @transform_11, window_bounds = array<i64: 1, 9>}, {transform_indices = @transform_12, window_bounds = array<i64: 8, 128>}]} {
    %c0 = arith.constant 0 : index
    %c0_0 = arith.constant 0 : index
    %0 = vector.load %arg1[%c0, %c0_0] : memref<18x12xf32, #tpu.memory_space<vmem>>, vector<18x12xf32>
    %c0_1 = arith.constant 0 : index
    %c0_2 = arith.constant 0 : index
    %1 = vector.load %arg2[%c0_1, %c0_2] : memref<12x128xf32, #tpu.memory_space<vmem>>, vector<12x128xf32>
    %cst = arith.constant dense<0.000000e+00> : vector<18x128xf32>
    %2 = tpu.matmul %0, %1, %cst {dimension_numbers = #tpu.dot_dimension_numbers<[1], [0], [0], [1], [0, 0, 1, 1], [], []>} : vector<18x12xf32>, vector<12x128xf32>, vector<18x128xf32> -> vector<18x128xf32>
    %c0_3 = arith.constant 0 : index
    %c0_4 = arith.constant 0 : index
    %3 = vector.load %arg3[%c0_3, %c0_4] : memref<1x128xf32, #tpu.memory_space<vmem>>, vector<1x128xf32>
    %4 = vector.broadcast %3 : vector<1x128xf32> to vector<18x128xf32>
    %5 = arith.addf %2, %4 : vector<18x128xf32>
    %cst_5 = arith.constant 0.000000e+00 : f32
    %6 = vector.broadcast %cst_5 : f32 to vector<18x128xf32>
    %7 = arith.maximumf %5, %6 : vector<18x128xf32>
    %c0_6 = arith.constant 0 : index
    %c0_7 = arith.constant 0 : index
    %c0_8 = arith.constant 0 : index
    %8 = vector.load %arg4[%c0_6, %c0_7, %c0_8] : memref<3x128x128xf32, #tpu.memory_space<vmem>>, vector<1x128x128xf32>
    %9 = vector.shape_cast %8 : vector<1x128x128xf32> to vector<128x128xf32>
    %cst_9 = arith.constant dense<0.000000e+00> : vector<18x128xf32>
    %10 = tpu.matmul %7, %9, %cst_9 {dimension_numbers = #tpu.dot_dimension_numbers<[1], [0], [0], [1], [0, 0, 1, 1], [], []>} : vector<18x128xf32>, vector<128x128xf32>, vector<18x128xf32> -> vector<18x128xf32>
    %c0_10 = arith.constant 0 : index
    %c0_11 = arith.constant 0 : index
    %c0_12 = arith.constant 0 : index
    %11 = vector.load %arg5[%c0_10, %c0_11, %c0_12] : memref<3x1x128xf32, #tpu.memory_space<vmem>>, vector<1x1x128xf32>
    %12 = vector.shape_cast %11 : vector<1x1x128xf32> to vector<1x128xf32>
    %13 = vector.broadcast %12 : vector<1x128xf32> to vector<18x128xf32>
    %14 = arith.addf %10, %13 : vector<18x128xf32>
    %cst_13 = arith.constant 0.000000e+00 : f32
    %15 = vector.broadcast %cst_13 : f32 to vector<18x128xf32>
    %16 = arith.maximumf %14, %15 : vector<18x128xf32>
    %c0_14 = arith.constant 0 : index
    %c0_15 = arith.constant 0 : index
    %c0_16 = arith.constant 0 : index
    %17 = vector.load %arg6[%c0_14, %c0_15, %c0_16] : memref<3x128x128xf32, #tpu.memory_space<vmem>>, vector<1x128x128xf32>
    %18 = vector.shape_cast %17 : vector<1x128x128xf32> to vector<128x128xf32>
    %cst_17 = arith.constant dense<0.000000e+00> : vector<18x128xf32>
    %19 = tpu.matmul %16, %18, %cst_17 {dimension_numbers = #tpu.dot_dimension_numbers<[1], [0], [0], [1], [0, 0, 1, 1], [], []>} : vector<18x128xf32>, vector<128x128xf32>, vector<18x128xf32> -> vector<18x128xf32>
    %c0_18 = arith.constant 0 : index
    %c0_19 = arith.constant 0 : index
    %c0_20 = arith.constant 0 : index
    %20 = vector.load %arg7[%c0_18, %c0_19, %c0_20] : memref<3x1x128xf32, #tpu.memory_space<vmem>>, vector<1x1x128xf32>
    %21 = vector.shape_cast %20 : vector<1x1x128xf32> to vector<1x128xf32>
    %22 = vector.broadcast %21 : vector<1x128xf32> to vector<18x128xf32>
    %23 = arith.addf %19, %22 : vector<18x128xf32>
    %24 = arith.addf %23, %7 : vector<18x128xf32>
    %cst_21 = arith.constant 0.000000e+00 : f32
    %25 = vector.broadcast %cst_21 : f32 to vector<18x128xf32>
    %26 = arith.maximumf %24, %25 : vector<18x128xf32>
    %c1 = arith.constant 1 : index
    %c0_22 = arith.constant 0 : index
    %c0_23 = arith.constant 0 : index
    %27 = vector.load %arg4[%c1, %c0_22, %c0_23] : memref<3x128x128xf32, #tpu.memory_space<vmem>>, vector<1x128x128xf32>
    %28 = vector.shape_cast %27 : vector<1x128x128xf32> to vector<128x128xf32>
    %cst_24 = arith.constant dense<0.000000e+00> : vector<18x128xf32>
    %29 = tpu.matmul %26, %28, %cst_24 {dimension_numbers = #tpu.dot_dimension_numbers<[1], [0], [0], [1], [0, 0, 1, 1], [], []>} : vector<18x128xf32>, vector<128x128xf32>, vector<18x128xf32> -> vector<18x128xf32>
    %c1_25 = arith.constant 1 : index
    %c0_26 = arith.constant 0 : index
    %c0_27 = arith.constant 0 : index
    %30 = vector.load %arg5[%c1_25, %c0_26, %c0_27] : memref<3x1x128xf32, #tpu.memory_space<vmem>>, vector<1x1x128xf32>
    %31 = vector.shape_cast %30 : vector<1x1x128xf32> to vector<1x128xf32>
    %32 = vector.broadcast %31 : vector<1x128xf32> to vector<18x128xf32>
    %33 = arith.addf %29, %32 : vector<18x128xf32>
    %cst_28 = arith.constant 0.000000e+00 : f32
    %34 = vector.broadcast %cst_28 : f32 to vector<18x128xf32>
    %35 = arith.maximumf %33, %34 : vector<18x128xf32>
    %c1_29 = arith.constant 1 : index
    %c0_30 = arith.constant 0 : index
    %c0_31 = arith.constant 0 : index
    %36 = vector.load %arg6[%c1_29, %c0_30, %c0_31] : memref<3x128x128xf32, #tpu.memory_space<vmem>>, vector<1x128x128xf32>
    %37 = vector.shape_cast %36 : vector<1x128x128xf32> to vector<128x128xf32>
    %cst_32 = arith.constant dense<0.000000e+00> : vector<18x128xf32>
    %38 = tpu.matmul %35, %37, %cst_32 {dimension_numbers = #tpu.dot_dimension_numbers<[1], [0], [0], [1], [0, 0, 1, 1], [], []>} : vector<18x128xf32>, vector<128x128xf32>, vector<18x128xf32> -> vector<18x128xf32>
    %c1_33 = arith.constant 1 : index
    %c0_34 = arith.constant 0 : index
    %c0_35 = arith.constant 0 : index
    %39 = vector.load %arg7[%c1_33, %c0_34, %c0_35] : memref<3x1x128xf32, #tpu.memory_space<vmem>>, vector<1x1x128xf32>
    %40 = vector.shape_cast %39 : vector<1x1x128xf32> to vector<1x128xf32>
    %41 = vector.broadcast %40 : vector<1x128xf32> to vector<18x128xf32>
    %42 = arith.addf %38, %41 : vector<18x128xf32>
    %43 = arith.addf %42, %26 : vector<18x128xf32>
    %cst_36 = arith.constant 0.000000e+00 : f32
    %44 = vector.broadcast %cst_36 : f32 to vector<18x128xf32>
    %45 = arith.maximumf %43, %44 : vector<18x128xf32>
    %c2 = arith.constant 2 : index
    %c0_37 = arith.constant 0 : index
    %c0_38 = arith.constant 0 : index
    %46 = vector.load %arg4[%c2, %c0_37, %c0_38] : memref<3x128x128xf32, #tpu.memory_space<vmem>>, vector<1x128x128xf32>
    %47 = vector.shape_cast %46 : vector<1x128x128xf32> to vector<128x128xf32>
    %cst_39 = arith.constant dense<0.000000e+00> : vector<18x128xf32>
    %48 = tpu.matmul %45, %47, %cst_39 {dimension_numbers = #tpu.dot_dimension_numbers<[1], [0], [0], [1], [0, 0, 1, 1], [], []>} : vector<18x128xf32>, vector<128x128xf32>, vector<18x128xf32> -> vector<18x128xf32>
    %c2_40 = arith.constant 2 : index
    %c0_41 = arith.constant 0 : index
    %c0_42 = arith.constant 0 : index
    %49 = vector.load %arg5[%c2_40, %c0_41, %c0_42] : memref<3x1x128xf32, #tpu.memory_space<vmem>>, vector<1x1x128xf32>
    %50 = vector.shape_cast %49 : vector<1x1x128xf32> to vector<1x128xf32>
    %51 = vector.broadcast %50 : vector<1x128xf32> to vector<18x128xf32>
    %52 = arith.addf %48, %51 : vector<18x128xf32>
    %cst_43 = arith.constant 0.000000e+00 : f32
    %53 = vector.broadcast %cst_43 : f32 to vector<18x128xf32>
    %54 = arith.maximumf %52, %53 : vector<18x128xf32>
    %c2_44 = arith.constant 2 : index
    %c0_45 = arith.constant 0 : index
    %c0_46 = arith.constant 0 : index
    %55 = vector.load %arg6[%c2_44, %c0_45, %c0_46] : memref<3x128x128xf32, #tpu.memory_space<vmem>>, vector<1x128x128xf32>
    %56 = vector.shape_cast %55 : vector<1x128x128xf32> to vector<128x128xf32>
    %cst_47 = arith.constant dense<0.000000e+00> : vector<18x128xf32>
    %57 = tpu.matmul %54, %56, %cst_47 {dimension_numbers = #tpu.dot_dimension_numbers<[1], [0], [0], [1], [0, 0, 1, 1], [], []>} : vector<18x128xf32>, vector<128x128xf32>, vector<18x128xf32> -> vector<18x128xf32>
    %c2_48 = arith.constant 2 : index
    %c0_49 = arith.constant 0 : index
    %c0_50 = arith.constant 0 : index
    %58 = vector.load %arg7[%c2_48, %c0_49, %c0_50] : memref<3x1x128xf32, #tpu.memory_space<vmem>>, vector<1x1x128xf32>
    %59 = vector.shape_cast %58 : vector<1x1x128xf32> to vector<1x128xf32>
    %60 = vector.broadcast %59 : vector<1x128xf32> to vector<18x128xf32>
    %61 = arith.addf %57, %60 : vector<18x128xf32>
    %62 = arith.addf %61, %45 : vector<18x128xf32>
    %cst_51 = arith.constant 0.000000e+00 : f32
    %63 = vector.broadcast %cst_51 : f32 to vector<18x128xf32>
    %64 = arith.maximumf %62, %63 : vector<18x128xf32>
    %c0_52 = arith.constant 0 : index
    %c0_53 = arith.constant 0 : index
    %65 = vector.load %arg8[%c0_52, %c0_53] : memref<128x12xf32, #tpu.memory_space<vmem>>, vector<128x12xf32>
    %cst_54 = arith.constant dense<0.000000e+00> : vector<18x12xf32>
    %66 = tpu.matmul %64, %65, %cst_54 {dimension_numbers = #tpu.dot_dimension_numbers<[1], [0], [0], [1], [0, 0, 1, 1], [], []>} : vector<18x128xf32>, vector<128x12xf32>, vector<18x12xf32> -> vector<18x12xf32>
    %c0_55 = arith.constant 0 : index
    %c0_56 = arith.constant 0 : index
    %67 = vector.load %arg9[%c0_55, %c0_56] : memref<1x12xf32, #tpu.memory_space<vmem>>, vector<1x12xf32>
    %68 = vector.broadcast %67 : vector<1x12xf32> to vector<18x12xf32>
    %69 = arith.addf %66, %68 : vector<18x12xf32>
    %cst_57 = arith.constant 0.000000e+00 : f32
    %70 = vector.broadcast %cst_57 : f32 to vector<18x12xf32>
    %71 = arith.maximumf %69, %70 : vector<18x12xf32>
    %c0_58 = arith.constant 0 : index
    %c0_59 = arith.constant 0 : index
    %72 = vector.load %arg10[%c0_58, %c0_59] : memref<27x10xf32, #tpu.memory_space<vmem>>, vector<27x10xf32>
    %c0_60 = arith.constant 0 : index
    %c0_61 = arith.constant 0 : index
    %73 = vector.load %arg11[%c0_60, %c0_61] : memref<1x1xf32, #tpu.memory_space<vmem>>, vector<1x1xf32>
    %c0_62 = arith.constant 0 : index
    %c0_63 = arith.constant 0 : index
    %74 = vector.load %arg12[%c0_62, %c0_63] : memref<1x9xf32, #tpu.memory_space<vmem>>, vector<1x9xf32>
    %cst_64 = arith.constant 0.000000e+00 : f32
    %75 = vector.broadcast %cst_64 : f32 to vector<8x128xf32>
    %c0_65 = arith.constant 0 : index
    %c0_66 = arith.constant 0 : index
    %76 = vector.load %arg13[%c0_65, %c0_66] : memref<8x128xf32, #tpu.memory_space<vmem>>, vector<8x128xf32>
    tpu.vector_store %arg13[%c0_65, %c0_66], %75 {strides = array<i32>} : memref<8x128xf32, #tpu.memory_space<vmem>>, vector<8x128xf32>,
    %cst_67 = arith.constant 0.000000e+00 : f32
    %77 = vector.broadcast %cst_67 : f32 to vector<2x10xf32>
    %78 = vector.extract_strided_slice %71 {offsets = [0, 0], sizes = [2, 3], strides = [1, 1]} : vector<18x12xf32> to vector<2x3xf32>
    %79 = vector.extract_strided_slice %78 {offsets = [0, 0], sizes = [2, 1], strides = [1, 1]} : vector<2x3xf32> to vector<2x1xf32>
    %80 = vector.extract_strided_slice %72 {offsets = [0, 0], sizes = [1, 10], strides = [1, 1]} : vector<27x10xf32> to vector<1x10xf32>
    %81 = vector.broadcast %79 : vector<2x1xf32> to vector<2x10xf32>
    %82 = vector.broadcast %80 : vector<1x10xf32> to vector<2x10xf32>
    %83 = arith.mulf %81, %82 : vector<2x10xf32>
    %84 = arith.addf %77, %83 : vector<2x10xf32>
    %85 = vector.extract_strided_slice %78 {offsets = [0, 1], sizes = [2, 1], strides = [1, 1]} : vector<2x3xf32> to vector<2x1xf32>
    %86 = vector.extract_strided_slice %72 {offsets = [1, 0], sizes = [1, 10], strides = [1, 1]} : vector<27x10xf32> to vector<1x10xf32>
    %87 = vector.broadcast %85 : vector<2x1xf32> to vector<2x10xf32>
    %88 = vector.broadcast %86 : vector<1x10xf32> to vector<2x10xf32>
    %89 = arith.mulf %87, %88 : vector<2x10xf32>
    %90 = arith.addf %84, %89 : vector<2x10xf32>
    %91 = vector.extract_strided_slice %78 {offsets = [0, 2], sizes = [2, 1], strides = [1, 1]} : vector<2x3xf32> to vector<2x1xf32>
    %92 = vector.extract_strided_slice %72 {offsets = [2, 0], sizes = [1, 10], strides = [1, 1]} : vector<27x10xf32> to vector<1x10xf32>
    %93 = vector.broadcast %91 : vector<2x1xf32> to vector<2x10xf32>
    %94 = vector.broadcast %92 : vector<1x10xf32> to vector<2x10xf32>
    %95 = arith.mulf %93, %94 : vector<2x10xf32>
    %96 = arith.addf %90, %95 : vector<2x10xf32>
    %97 = vector.extract_strided_slice %71 {offsets = [2, 0], sizes = [2, 3], strides = [1, 1]} : vector<18x12xf32> to vector<2x3xf32>
    %98 = vector.extract_strided_slice %97 {offsets = [0, 0], sizes = [2, 1], strides = [1, 1]} : vector<2x3xf32> to vector<2x1xf32>
    %99 = vector.extract_strided_slice %72 {offsets = [3, 0], sizes = [1, 10], strides = [1, 1]} : vector<27x10xf32> to vector<1x10xf32>
    %100 = vector.broadcast %98 : vector<2x1xf32> to vector<2x10xf32>
    %101 = vector.broadcast %99 : vector<1x10xf32> to vector<2x10xf32>
    %102 = arith.mulf %100, %101 : vector<2x10xf32>
    %103 = arith.addf %96, %102 : vector<2x10xf32>
    %104 = vector.extract_strided_slice %97 {offsets = [0, 1], sizes = [2, 1], strides = [1, 1]} : vector<2x3xf32> to vector<2x1xf32>
    %105 = vector.extract_strided_slice %72 {offsets = [4, 0], sizes = [1, 10], strides = [1, 1]} : vector<27x10xf32> to vector<1x10xf32>
    %106 = vector.broadcast %104 : vector<2x1xf32> to vector<2x10xf32>
    %107 = vector.broadcast %105 : vector<1x10xf32> to vector<2x10xf32>
    %108 = arith.mulf %106, %107 : vector<2x10xf32>
    %109 = arith.addf %103, %108 : vector<2x10xf32>
    %110 = vector.extract_strided_slice %97 {offsets = [0, 2], sizes = [2, 1], strides = [1, 1]} : vector<2x3xf32> to vector<2x1xf32>
    %111 = vector.extract_strided_slice %72 {offsets = [5, 0], sizes = [1, 10], strides = [1, 1]} : vector<27x10xf32> to vector<1x10xf32>
    %112 = vector.broadcast %110 : vector<2x1xf32> to vector<2x10xf32>
    %113 = vector.broadcast %111 : vector<1x10xf32> to vector<2x10xf32>
    %114 = arith.mulf %112, %113 : vector<2x10xf32>
    %115 = arith.addf %109, %114 : vector<2x10xf32>
    %116 = vector.extract_strided_slice %71 {offsets = [4, 0], sizes = [2, 3], strides = [1, 1]} : vector<18x12xf32> to vector<2x3xf32>
    %117 = vector.extract_strided_slice %116 {offsets = [0, 0], sizes = [2, 1], strides = [1, 1]} : vector<2x3xf32> to vector<2x1xf32>
    %118 = vector.extract_strided_slice %72 {offsets = [6, 0], sizes = [1, 10], strides = [1, 1]} : vector<27x10xf32> to vector<1x10xf32>
    %119 = vector.broadcast %117 : vector<2x1xf32> to vector<2x10xf32>
    %120 = vector.broadcast %118 : vector<1x10xf32> to vector<2x10xf32>
    %121 = arith.mulf %119, %120 : vector<2x10xf32>
    %122 = arith.addf %115, %121 : vector<2x10xf32>
    %123 = vector.extract_strided_slice %116 {offsets = [0, 1], sizes = [2, 1], strides = [1, 1]} : vector<2x3xf32> to vector<2x1xf32>
    %124 = vector.extract_strided_slice %72 {offsets = [7, 0], sizes = [1, 10], strides = [1, 1]} : vector<27x10xf32> to vector<1x10xf32>
    %125 = vector.broadcast %123 : vector<2x1xf32> to vector<2x10xf32>
    %126 = vector.broadcast %124 : vector<1x10xf32> to vector<2x10xf32>
    %127 = arith.mulf %125, %126 : vector<2x10xf32>
    %128 = arith.addf %122, %127 : vector<2x10xf32>
    %129 = vector.extract_strided_slice %116 {offsets = [0, 2], sizes = [2, 1], strides = [1, 1]} : vector<2x3xf32> to vector<2x1xf32>
    %130 = vector.extract_strided_slice %72 {offsets = [8, 0], sizes = [1, 10], strides = [1, 1]} : vector<27x10xf32> to vector<1x10xf32>
    %131 = vector.broadcast %129 : vector<2x1xf32> to vector<2x10xf32>
    %132 = vector.broadcast %130 : vector<1x10xf32> to vector<2x10xf32>
    %133 = arith.mulf %131, %132 : vector<2x10xf32>
    %134 = arith.addf %128, %133 : vector<2x10xf32>
    %135 = vector.extract_strided_slice %71 {offsets = [6, 0], sizes = [2, 3], strides = [1, 1]} : vector<18x12xf32> to vector<2x3xf32>
    %136 = vector.extract_strided_slice %135 {offsets = [0, 0], sizes = [2, 1], strides = [1, 1]} : vector<2x3xf32> to vector<2x1xf32>
    %137 = vector.extract_strided_slice %72 {offsets = [9, 0], sizes = [1, 10], strides = [1, 1]} : vector<27x10xf32> to vector<1x10xf32>
    %138 = vector.broadcast %136 : vector<2x1xf32> to vector<2x10xf32>
    %139 = vector.broadcast %137 : vector<1x10xf32> to vector<2x10xf32>
    %140 = arith.mulf %138, %139 : vector<2x10xf32>
    %141 = arith.addf %134, %140 : vector<2x10xf32>
    %142 = vector.extract_strided_slice %135 {offsets = [0, 1], sizes = [2, 1], strides = [1, 1]} : vector<2x3xf32> to vector<2x1xf32>
    %143 = vector.extract_strided_slice %72 {offsets = [10, 0], sizes = [1, 10], strides = [1, 1]} : vector<27x10xf32> to vector<1x10xf32>
    %144 = vector.broadcast %142 : vector<2x1xf32> to vector<2x10xf32>
    %145 = vector.broadcast %143 : vector<1x10xf32> to vector<2x10xf32>
    %146 = arith.mulf %144, %145 : vector<2x10xf32>
    %147 = arith.addf %141, %146 : vector<2x10xf32>
    %148 = vector.extract_strided_slice %135 {offsets = [0, 2], sizes = [2, 1], strides = [1, 1]} : vector<2x3xf32> to vector<2x1xf32>
    %149 = vector.extract_strided_slice %72 {offsets = [11, 0], sizes = [1, 10], strides = [1, 1]} : vector<27x10xf32> to vector<1x10xf32>
    %150 = vector.broadcast %148 : vector<2x1xf32> to vector<2x10xf32>
    %151 = vector.broadcast %149 : vector<1x10xf32> to vector<2x10xf32>
    %152 = arith.mulf %150, %151 : vector<2x10xf32>
    %153 = arith.addf %147, %152 : vector<2x10xf32>
    %154 = vector.extract_strided_slice %71 {offsets = [8, 0], sizes = [2, 3], strides = [1, 1]} : vector<18x12xf32> to vector<2x3xf32>
    %155 = vector.extract_strided_slice %154 {offsets = [0, 0], sizes = [2, 1], strides = [1, 1]} : vector<2x3xf32> to vector<2x1xf32>
    %156 = vector.extract_strided_slice %72 {offsets = [12, 0], sizes = [1, 10], strides = [1, 1]} : vector<27x10xf32> to vector<1x10xf32>
    %157 = vector.broadcast %155 : vector<2x1xf32> to vector<2x10xf32>
    %158 = vector.broadcast %156 : vector<1x10xf32> to vector<2x10xf32>
    %159 = arith.mulf %157, %158 : vector<2x10xf32>
    %160 = arith.addf %153, %159 : vector<2x10xf32>
    %161 = vector.extract_strided_slice %154 {offsets = [0, 1], sizes = [2, 1], strides = [1, 1]} : vector<2x3xf32> to vector<2x1xf32>
    %162 = vector.extract_strided_slice %72 {offsets = [13, 0], sizes = [1, 10], strides = [1, 1]} : vector<27x10xf32> to vector<1x10xf32>
    %163 = vector.broadcast %161 : vector<2x1xf32> to vector<2x10xf32>
    %164 = vector.broadcast %162 : vector<1x10xf32> to vector<2x10xf32>
    %165 = arith.mulf %163, %164 : vector<2x10xf32>
    %166 = arith.addf %160, %165 : vector<2x10xf32>
    %167 = vector.extract_strided_slice %154 {offsets = [0, 2], sizes = [2, 1], strides = [1, 1]} : vector<2x3xf32> to vector<2x1xf32>
    %168 = vector.extract_strided_slice %72 {offsets = [14, 0], sizes = [1, 10], strides = [1, 1]} : vector<27x10xf32> to vector<1x10xf32>
    %169 = vector.broadcast %167 : vector<2x1xf32> to vector<2x10xf32>
    %170 = vector.broadcast %168 : vector<1x10xf32> to vector<2x10xf32>
    %171 = arith.mulf %169, %170 : vector<2x10xf32>
    %172 = arith.addf %166, %171 : vector<2x10xf32>
    %173 = vector.extract_strided_slice %71 {offsets = [10, 0], sizes = [2, 3], strides = [1, 1]} : vector<18x12xf32> to vector<2x3xf32>
    %174 = vector.extract_strided_slice %173 {offsets = [0, 0], sizes = [2, 1], strides = [1, 1]} : vector<2x3xf32> to vector<2x1xf32>
    %175 = vector.extract_strided_slice %72 {offsets = [15, 0], sizes = [1, 10], strides = [1, 1]} : vector<27x10xf32> to vector<1x10xf32>
    %176 = vector.broadcast %174 : vector<2x1xf32> to vector<2x10xf32>
    %177 = vector.broadcast %175 : vector<1x10xf32> to vector<2x10xf32>
    %178 = arith.mulf %176, %177 : vector<2x10xf32>
    %179 = arith.addf %172, %178 : vector<2x10xf32>
    %180 = vector.extract_strided_slice %173 {offsets = [0, 1], sizes = [2, 1], strides = [1, 1]} : vector<2x3xf32> to vector<2x1xf32>
    %181 = vector.extract_strided_slice %72 {offsets = [16, 0], sizes = [1, 10], strides = [1, 1]} : vector<27x10xf32> to vector<1x10xf32>
    %182 = vector.broadcast %180 : vector<2x1xf32> to vector<2x10xf32>
    %183 = vector.broadcast %181 : vector<1x10xf32> to vector<2x10xf32>
    %184 = arith.mulf %182, %183 : vector<2x10xf32>
    %185 = arith.addf %179, %184 : vector<2x10xf32>
    %186 = vector.extract_strided_slice %173 {offsets = [0, 2], sizes = [2, 1], strides = [1, 1]} : vector<2x3xf32> to vector<2x1xf32>
    %187 = vector.extract_strided_slice %72 {offsets = [17, 0], sizes = [1, 10], strides = [1, 1]} : vector<27x10xf32> to vector<1x10xf32>
    %188 = vector.broadcast %186 : vector<2x1xf32> to vector<2x10xf32>
    %189 = vector.broadcast %187 : vector<1x10xf32> to vector<2x10xf32>
    %190 = arith.mulf %188, %189 : vector<2x10xf32>
    %191 = arith.addf %185, %190 : vector<2x10xf32>
    %192 = vector.extract_strided_slice %71 {offsets = [12, 0], sizes = [2, 3], strides = [1, 1]} : vector<18x12xf32> to vector<2x3xf32>
    %193 = vector.extract_strided_slice %192 {offsets = [0, 0], sizes = [2, 1], strides = [1, 1]} : vector<2x3xf32> to vector<2x1xf32>
    %194 = vector.extract_strided_slice %72 {offsets = [18, 0], sizes = [1, 10], strides = [1, 1]} : vector<27x10xf32> to vector<1x10xf32>
    %195 = vector.broadcast %193 : vector<2x1xf32> to vector<2x10xf32>
    %196 = vector.broadcast %194 : vector<1x10xf32> to vector<2x10xf32>
    %197 = arith.mulf %195, %196 : vector<2x10xf32>
    %198 = arith.addf %191, %197 : vector<2x10xf32>
    %199 = vector.extract_strided_slice %192 {offsets = [0, 1], sizes = [2, 1], strides = [1, 1]} : vector<2x3xf32> to vector<2x1xf32>
    %200 = vector.extract_strided_slice %72 {offsets = [19, 0], sizes = [1, 10], strides = [1, 1]} : vector<27x10xf32> to vector<1x10xf32>
    %201 = vector.broadcast %199 : vector<2x1xf32> to vector<2x10xf32>
    %202 = vector.broadcast %200 : vector<1x10xf32> to vector<2x10xf32>
    %203 = arith.mulf %201, %202 : vector<2x10xf32>
    %204 = arith.addf %198, %203 : vector<2x10xf32>
    %205 = vector.extract_strided_slice %192 {offsets = [0, 2], sizes = [2, 1], strides = [1, 1]} : vector<2x3xf32> to vector<2x1xf32>
    %206 = vector.extract_strided_slice %72 {offsets = [20, 0], sizes = [1, 10], strides = [1, 1]} : vector<27x10xf32> to vector<1x10xf32>
    %207 = vector.broadcast %205 : vector<2x1xf32> to vector<2x10xf32>
    %208 = vector.broadcast %206 : vector<1x10xf32> to vector<2x10xf32>
    %209 = arith.mulf %207, %208 : vector<2x10xf32>
    %210 = arith.addf %204, %209 : vector<2x10xf32>
    %211 = vector.extract_strided_slice %71 {offsets = [14, 0], sizes = [2, 3], strides = [1, 1]} : vector<18x12xf32> to vector<2x3xf32>
    %212 = vector.extract_strided_slice %211 {offsets = [0, 0], sizes = [2, 1], strides = [1, 1]} : vector<2x3xf32> to vector<2x1xf32>
    %213 = vector.extract_strided_slice %72 {offsets = [21, 0], sizes = [1, 10], strides = [1, 1]} : vector<27x10xf32> to vector<1x10xf32>
    %214 = vector.broadcast %212 : vector<2x1xf32> to vector<2x10xf32>
    %215 = vector.broadcast %213 : vector<1x10xf32> to vector<2x10xf32>
    %216 = arith.mulf %214, %215 : vector<2x10xf32>
    %217 = arith.addf %210, %216 : vector<2x10xf32>
    %218 = vector.extract_strided_slice %211 {offsets = [0, 1], sizes = [2, 1], strides = [1, 1]} : vector<2x3xf32> to vector<2x1xf32>
    %219 = vector.extract_strided_slice %72 {offsets = [22, 0], sizes = [1, 10], strides = [1, 1]} : vector<27x10xf32> to vector<1x10xf32>
    %220 = vector.broadcast %218 : vector<2x1xf32> to vector<2x10xf32>
    %221 = vector.broadcast %219 : vector<1x10xf32> to vector<2x10xf32>
    %222 = arith.mulf %220, %221 : vector<2x10xf32>
    %223 = arith.addf %217, %222 : vector<2x10xf32>
    %224 = vector.extract_strided_slice %211 {offsets = [0, 2], sizes = [2, 1], strides = [1, 1]} : vector<2x3xf32> to vector<2x1xf32>
    %225 = vector.extract_strided_slice %72 {offsets = [23, 0], sizes = [1, 10], strides = [1, 1]} : vector<27x10xf32> to vector<1x10xf32>
    %226 = vector.broadcast %224 : vector<2x1xf32> to vector<2x10xf32>
    %227 = vector.broadcast %225 : vector<1x10xf32> to vector<2x10xf32>
    %228 = arith.mulf %226, %227 : vector<2x10xf32>
    %229 = arith.addf %223, %228 : vector<2x10xf32>
    %230 = vector.extract_strided_slice %71 {offsets = [16, 0], sizes = [2, 3], strides = [1, 1]} : vector<18x12xf32> to vector<2x3xf32>
    %231 = vector.extract_strided_slice %230 {offsets = [0, 0], sizes = [2, 1], strides = [1, 1]} : vector<2x3xf32> to vector<2x1xf32>
    %232 = vector.extract_strided_slice %72 {offsets = [24, 0], sizes = [1, 10], strides = [1, 1]} : vector<27x10xf32> to vector<1x10xf32>
    %233 = vector.broadcast %231 : vector<2x1xf32> to vector<2x10xf32>
    %234 = vector.broadcast %232 : vector<1x10xf32> to vector<2x10xf32>
    %235 = arith.mulf %233, %234 : vector<2x10xf32>
    %236 = arith.addf %229, %235 : vector<2x10xf32>
    %237 = vector.extract_strided_slice %230 {offsets = [0, 1], sizes = [2, 1], strides = [1, 1]} : vector<2x3xf32> to vector<2x1xf32>
    %238 = vector.extract_strided_slice %72 {offsets = [25, 0], sizes = [1, 10], strides = [1, 1]} : vector<27x10xf32> to vector<1x10xf32>
    %239 = vector.broadcast %237 : vector<2x1xf32> to vector<2x10xf32>
    %240 = vector.broadcast %238 : vector<1x10xf32> to vector<2x10xf32>
    %241 = arith.mulf %239, %240 : vector<2x10xf32>
    %242 = arith.addf %236, %241 : vector<2x10xf32>
    %243 = vector.extract_strided_slice %230 {offsets = [0, 2], sizes = [2, 1], strides = [1, 1]} : vector<2x3xf32> to vector<2x1xf32>
    %244 = vector.extract_strided_slice %72 {offsets = [26, 0], sizes = [1, 10], strides = [1, 1]} : vector<27x10xf32> to vector<1x10xf32>
    %245 = vector.broadcast %243 : vector<2x1xf32> to vector<2x10xf32>
    %246 = vector.broadcast %244 : vector<1x10xf32> to vector<2x10xf32>
    %247 = arith.mulf %245, %246 : vector<2x10xf32>
    %248 = arith.addf %242, %247 : vector<2x10xf32>
    %249 = vector.extract_strided_slice %248 {offsets = [0, 0], sizes = [2, 1], strides = [1, 1]} : vector<2x10xf32> to vector<2x1xf32>
    %250 = vector.broadcast %73 : vector<1x1xf32> to vector<2x1xf32>
    %251 = arith.addf %249, %250 : vector<2x1xf32>
    %252 = math.tanh %251 : vector<2x1xf32>
    %253 = vector.extract_strided_slice %248 {offsets = [0, 1], sizes = [2, 9], strides = [1, 1]} : vector<2x10xf32> to vector<2x9xf32>
    %254 = vector.broadcast %74 : vector<1x9xf32> to vector<2x9xf32>
    %255 = arith.addf %253, %254 : vector<2x9xf32>
    %cst_68 = arith.constant dense<0xFF800000> : vector<2xf32>
    %256 = vector.multi_reduction <maximumf>, %255, %cst_68 [1] : vector<2x9xf32> to vector<2xf32>
    %257 = vector.shape_cast %256 : vector<2xf32> to vector<2x1xf32>
    %258 = vector.broadcast %257 : vector<2x1xf32> to vector<2x9xf32>
    %259 = arith.subf %255, %258 : vector<2x9xf32>
    %260 = math.exp %259 : vector<2x9xf32>
    %cst_69 = arith.constant dense<0.000000e+00> : vector<2xf32>
    %261 = vector.multi_reduction <add>, %260, %cst_69 [1] : vector<2x9xf32> to vector<2xf32>
    %262 = vector.shape_cast %261 : vector<2xf32> to vector<2x1xf32>
    %263 = vector.broadcast %262 : vector<2x1xf32> to vector<2x9xf32>
    %264 = arith.divf %260, %263 : vector<2x9xf32>
    %c0_70 = arith.constant 0 : index
    %c0_71 = arith.constant 0 : index
    %265 = vector.load %arg13[%c0_70, %c0_71] : memref<8x128xf32, #tpu.memory_space<vmem>>, vector<2x1xf32>
    tpu.vector_store %arg13[%c0_70, %c0_71], %252 {strides = array<i32>} : memref<8x128xf32, #tpu.memory_space<vmem>>, vector<2x1xf32>,
    %c0_72 = arith.constant 0 : index
    %c1_73 = arith.constant 1 : index
    %266 = vector.load %arg13[%c0_72, %c1_73] : memref<8x128xf32, #tpu.memory_space<vmem>>, vector<2x9xf32>
    tpu.vector_store %arg13[%c0_72, %c1_73], %264 {strides = array<i32>} : memref<8x128xf32, #tpu.memory_space<vmem>>, vector<2x9xf32>,
    %cst_74 = arith.constant 0.000000e+00 : f32
    %267 = vector.broadcast %cst_74 : f32 to vector<2x10xf32>
    %268 = vector.extract_strided_slice %71 {offsets = [0, 3], sizes = [2, 3], strides = [1, 1]} : vector<18x12xf32> to vector<2x3xf32>
    %269 = vector.extract_strided_slice %268 {offsets = [0, 0], sizes = [2, 1], strides = [1, 1]} : vector<2x3xf32> to vector<2x1xf32>
    %270 = vector.extract_strided_slice %72 {offsets = [0, 0], sizes = [1, 10], strides = [1, 1]} : vector<27x10xf32> to vector<1x10xf32>
    %271 = vector.broadcast %269 : vector<2x1xf32> to vector<2x10xf32>
    %272 = vector.broadcast %270 : vector<1x10xf32> to vector<2x10xf32>
    %273 = arith.mulf %271, %272 : vector<2x10xf32>
    %274 = arith.addf %267, %273 : vector<2x10xf32>
    %275 = vector.extract_strided_slice %268 {offsets = [0, 1], sizes = [2, 1], strides = [1, 1]} : vector<2x3xf32> to vector<2x1xf32>
    %276 = vector.extract_strided_slice %72 {offsets = [1, 0], sizes = [1, 10], strides = [1, 1]} : vector<27x10xf32> to vector<1x10xf32>
    %277 = vector.broadcast %275 : vector<2x1xf32> to vector<2x10xf32>
    %278 = vector.broadcast %276 : vector<1x10xf32> to vector<2x10xf32>
    %279 = arith.mulf %277, %278 : vector<2x10xf32>
    %280 = arith.addf %274, %279 : vector<2x10xf32>
    %281 = vector.extract_strided_slice %268 {offsets = [0, 2], sizes = [2, 1], strides = [1, 1]} : vector<2x3xf32> to vector<2x1xf32>
    %282 = vector.extract_strided_slice %72 {offsets = [2, 0], sizes = [1, 10], strides = [1, 1]} : vector<27x10xf32> to vector<1x10xf32>
    %283 = vector.broadcast %281 : vector<2x1xf32> to vector<2x10xf32>
    %284 = vector.broadcast %282 : vector<1x10xf32> to vector<2x10xf32>
    %285 = arith.mulf %283, %284 : vector<2x10xf32>
    %286 = arith.addf %280, %285 : vector<2x10xf32>
    %287 = vector.extract_strided_slice %71 {offsets = [2, 3], sizes = [2, 3], strides = [1, 1]} : vector<18x12xf32> to vector<2x3xf32>
    %288 = vector.extract_strided_slice %287 {offsets = [0, 0], sizes = [2, 1], strides = [1, 1]} : vector<2x3xf32> to vector<2x1xf32>
    %289 = vector.extract_strided_slice %72 {offsets = [3, 0], sizes = [1, 10], strides = [1, 1]} : vector<27x10xf32> to vector<1x10xf32>
    %290 = vector.broadcast %288 : vector<2x1xf32> to vector<2x10xf32>
    %291 = vector.broadcast %289 : vector<1x10xf32> to vector<2x10xf32>
    %292 = arith.mulf %290, %291 : vector<2x10xf32>
    %293 = arith.addf %286, %292 : vector<2x10xf32>
    %294 = vector.extract_strided_slice %287 {offsets = [0, 1], sizes = [2, 1], strides = [1, 1]} : vector<2x3xf32> to vector<2x1xf32>
    %295 = vector.extract_strided_slice %72 {offsets = [4, 0], sizes = [1, 10], strides = [1, 1]} : vector<27x10xf32> to vector<1x10xf32>
    %296 = vector.broadcast %294 : vector<2x1xf32> to vector<2x10xf32>
    %297 = vector.broadcast %295 : vector<1x10xf32> to vector<2x10xf32>
    %298 = arith.mulf %296, %297 : vector<2x10xf32>
    %299 = arith.addf %293, %298 : vector<2x10xf32>
    %300 = vector.extract_strided_slice %287 {offsets = [0, 2], sizes = [2, 1], strides = [1, 1]} : vector<2x3xf32> to vector<2x1xf32>
    %301 = vector.extract_strided_slice %72 {offsets = [5, 0], sizes = [1, 10], strides = [1, 1]} : vector<27x10xf32> to vector<1x10xf32>
    %302 = vector.broadcast %300 : vector<2x1xf32> to vector<2x10xf32>
    %303 = vector.broadcast %301 : vector<1x10xf32> to vector<2x10xf32>
    %304 = arith.mulf %302, %303 : vector<2x10xf32>
    %305 = arith.addf %299, %304 : vector<2x10xf32>
    %306 = vector.extract_strided_slice %71 {offsets = [4, 3], sizes = [2, 3], strides = [1, 1]} : vector<18x12xf32> to vector<2x3xf32>
    %307 = vector.extract_strided_slice %306 {offsets = [0, 0], sizes = [2, 1], strides = [1, 1]} : vector<2x3xf32> to vector<2x1xf32>
    %308 = vector.extract_strided_slice %72 {offsets = [6, 0], sizes = [1, 10], strides = [1, 1]} : vector<27x10xf32> to vector<1x10xf32>
    %309 = vector.broadcast %307 : vector<2x1xf32> to vector<2x10xf32>
    %310 = vector.broadcast %308 : vector<1x10xf32> to vector<2x10xf32>
    %311 = arith.mulf %309, %310 : vector<2x10xf32>
    %312 = arith.addf %305, %311 : vector<2x10xf32>
    %313 = vector.extract_strided_slice %306 {offsets = [0, 1], sizes = [2, 1], strides = [1, 1]} : vector<2x3xf32> to vector<2x1xf32>
    %314 = vector.extract_strided_slice %72 {offsets = [7, 0], sizes = [1, 10], strides = [1, 1]} : vector<27x10xf32> to vector<1x10xf32>
    %315 = vector.broadcast %313 : vector<2x1xf32> to vector<2x10xf32>
    %316 = vector.broadcast %314 : vector<1x10xf32> to vector<2x10xf32>
    %317 = arith.mulf %315, %316 : vector<2x10xf32>
    %318 = arith.addf %312, %317 : vector<2x10xf32>
    %319 = vector.extract_strided_slice %306 {offsets = [0, 2], sizes = [2, 1], strides = [1, 1]} : vector<2x3xf32> to vector<2x1xf32>
    %320 = vector.extract_strided_slice %72 {offsets = [8, 0], sizes = [1, 10], strides = [1, 1]} : vector<27x10xf32> to vector<1x10xf32>
    %321 = vector.broadcast %319 : vector<2x1xf32> to vector<2x10xf32>
    %322 = vector.broadcast %320 : vector<1x10xf32> to vector<2x10xf32>
    %323 = arith.mulf %321, %322 : vector<2x10xf32>
    %324 = arith.addf %318, %323 : vector<2x10xf32>
    %325 = vector.extract_strided_slice %71 {offsets = [6, 3], sizes = [2, 3], strides = [1, 1]} : vector<18x12xf32> to vector<2x3xf32>
    %326 = vector.extract_strided_slice %325 {offsets = [0, 0], sizes = [2, 1], strides = [1, 1]} : vector<2x3xf32> to vector<2x1xf32>
    %327 = vector.extract_strided_slice %72 {offsets = [9, 0], sizes = [1, 10], strides = [1, 1]} : vector<27x10xf32> to vector<1x10xf32>
    %328 = vector.broadcast %326 : vector<2x1xf32> to vector<2x10xf32>
    %329 = vector.broadcast %327 : vector<1x10xf32> to vector<2x10xf32>
    %330 = arith.mulf %328, %329 : vector<2x10xf32>
    %331 = arith.addf %324, %330 : vector<2x10xf32>
    %332 = vector.extract_strided_slice %325 {offsets = [0, 1], sizes = [2, 1], strides = [1, 1]} : vector<2x3xf32> to vector<2x1xf32>
    %333 = vector.extract_strided_slice %72 {offsets = [10, 0], sizes = [1, 10], strides = [1, 1]} : vector<27x10xf32> to vector<1x10xf32>
    %334 = vector.broadcast %332 : vector<2x1xf32> to vector<2x10xf32>
    %335 = vector.broadcast %333 : vector<1x10xf32> to vector<2x10xf32>
    %336 = arith.mulf %334, %335 : vector<2x10xf32>
    %337 = arith.addf %331, %336 : vector<2x10xf32>
    %338 = vector.extract_strided_slice %325 {offsets = [0, 2], sizes = [2, 1], strides = [1, 1]} : vector<2x3xf32> to vector<2x1xf32>
    %339 = vector.extract_strided_slice %72 {offsets = [11, 0], sizes = [1, 10], strides = [1, 1]} : vector<27x10xf32> to vector<1x10xf32>
    %340 = vector.broadcast %338 : vector<2x1xf32> to vector<2x10xf32>
    %341 = vector.broadcast %339 : vector<1x10xf32> to vector<2x10xf32>
    %342 = arith.mulf %340, %341 : vector<2x10xf32>
    %343 = arith.addf %337, %342 : vector<2x10xf32>
    %344 = vector.extract_strided_slice %71 {offsets = [8, 3], sizes = [2, 3], strides = [1, 1]} : vector<18x12xf32> to vector<2x3xf32>
    %345 = vector.extract_strided_slice %344 {offsets = [0, 0], sizes = [2, 1], strides = [1, 1]} : vector<2x3xf32> to vector<2x1xf32>
    %346 = vector.extract_strided_slice %72 {offsets = [12, 0], sizes = [1, 10], strides = [1, 1]} : vector<27x10xf32> to vector<1x10xf32>
    %347 = vector.broadcast %345 : vector<2x1xf32> to vector<2x10xf32>
    %348 = vector.broadcast %346 : vector<1x10xf32> to vector<2x10xf32>
    %349 = arith.mulf %347, %348 : vector<2x10xf32>
    %350 = arith.addf %343, %349 : vector<2x10xf32>
    %351 = vector.extract_strided_slice %344 {offsets = [0, 1], sizes = [2, 1], strides = [1, 1]} : vector<2x3xf32> to vector<2x1xf32>
    %352 = vector.extract_strided_slice %72 {offsets = [13, 0], sizes = [1, 10], strides = [1, 1]} : vector<27x10xf32> to vector<1x10xf32>
    %353 = vector.broadcast %351 : vector<2x1xf32> to vector<2x10xf32>
    %354 = vector.broadcast %352 : vector<1x10xf32> to vector<2x10xf32>
    %355 = arith.mulf %353, %354 : vector<2x10xf32>
    %356 = arith.addf %350, %355 : vector<2x10xf32>
    %357 = vector.extract_strided_slice %344 {offsets = [0, 2], sizes = [2, 1], strides = [1, 1]} : vector<2x3xf32> to vector<2x1xf32>
    %358 = vector.extract_strided_slice %72 {offsets = [14, 0], sizes = [1, 10], strides = [1, 1]} : vector<27x10xf32> to vector<1x10xf32>
    %359 = vector.broadcast %357 : vector<2x1xf32> to vector<2x10xf32>
    %360 = vector.broadcast %358 : vector<1x10xf32> to vector<2x10xf32>
    %361 = arith.mulf %359, %360 : vector<2x10xf32>
    %362 = arith.addf %356, %361 : vector<2x10xf32>
    %363 = vector.extract_strided_slice %71 {offsets = [10, 3], sizes = [2, 3], strides = [1, 1]} : vector<18x12xf32> to vector<2x3xf32>
    %364 = vector.extract_strided_slice %363 {offsets = [0, 0], sizes = [2, 1], strides = [1, 1]} : vector<2x3xf32> to vector<2x1xf32>
    %365 = vector.extract_strided_slice %72 {offsets = [15, 0], sizes = [1, 10], strides = [1, 1]} : vector<27x10xf32> to vector<1x10xf32>
    %366 = vector.broadcast %364 : vector<2x1xf32> to vector<2x10xf32>
    %367 = vector.broadcast %365 : vector<1x10xf32> to vector<2x10xf32>
    %368 = arith.mulf %366, %367 : vector<2x10xf32>
    %369 = arith.addf %362, %368 : vector<2x10xf32>
    %370 = vector.extract_strided_slice %363 {offsets = [0, 1], sizes = [2, 1], strides = [1, 1]} : vector<2x3xf32> to vector<2x1xf32>
    %371 = vector.extract_strided_slice %72 {offsets = [16, 0], sizes = [1, 10], strides = [1, 1]} : vector<27x10xf32> to vector<1x10xf32>
    %372 = vector.broadcast %370 : vector<2x1xf32> to vector<2x10xf32>
    %373 = vector.broadcast %371 : vector<1x10xf32> to vector<2x10xf32>
    %374 = arith.mulf %372, %373 : vector<2x10xf32>
    %375 = arith.addf %369, %374 : vector<2x10xf32>
    %376 = vector.extract_strided_slice %363 {offsets = [0, 2], sizes = [2, 1], strides = [1, 1]} : vector<2x3xf32> to vector<2x1xf32>
    %377 = vector.extract_strided_slice %72 {offsets = [17, 0], sizes = [1, 10], strides = [1, 1]} : vector<27x10xf32> to vector<1x10xf32>
    %378 = vector.broadcast %376 : vector<2x1xf32> to vector<2x10xf32>
    %379 = vector.broadcast %377 : vector<1x10xf32> to vector<2x10xf32>
    %380 = arith.mulf %378, %379 : vector<2x10xf32>
    %381 = arith.addf %375, %380 : vector<2x10xf32>
    %382 = vector.extract_strided_slice %71 {offsets = [12, 3], sizes = [2, 3], strides = [1, 1]} : vector<18x12xf32> to vector<2x3xf32>
    %383 = vector.extract_strided_slice %382 {offsets = [0, 0], sizes = [2, 1], strides = [1, 1]} : vector<2x3xf32> to vector<2x1xf32>
    %384 = vector.extract_strided_slice %72 {offsets = [18, 0], sizes = [1, 10], strides = [1, 1]} : vector<27x10xf32> to vector<1x10xf32>
    %385 = vector.broadcast %383 : vector<2x1xf32> to vector<2x10xf32>
    %386 = vector.broadcast %384 : vector<1x10xf32> to vector<2x10xf32>
    %387 = arith.mulf %385, %386 : vector<2x10xf32>
    %388 = arith.addf %381, %387 : vector<2x10xf32>
    %389 = vector.extract_strided_slice %382 {offsets = [0, 1], sizes = [2, 1], strides = [1, 1]} : vector<2x3xf32> to vector<2x1xf32>
    %390 = vector.extract_strided_slice %72 {offsets = [19, 0], sizes = [1, 10], strides = [1, 1]} : vector<27x10xf32> to vector<1x10xf32>
    %391 = vector.broadcast %389 : vector<2x1xf32> to vector<2x10xf32>
    %392 = vector.broadcast %390 : vector<1x10xf32> to vector<2x10xf32>
    %393 = arith.mulf %391, %392 : vector<2x10xf32>
    %394 = arith.addf %388, %393 : vector<2x10xf32>
    %395 = vector.extract_strided_slice %382 {offsets = [0, 2], sizes = [2, 1], strides = [1, 1]} : vector<2x3xf32> to vector<2x1xf32>
    %396 = vector.extract_strided_slice %72 {offsets = [20, 0], sizes = [1, 10], strides = [1, 1]} : vector<27x10xf32> to vector<1x10xf32>
    %397 = vector.broadcast %395 : vector<2x1xf32> to vector<2x10xf32>
    %398 = vector.broadcast %396 : vector<1x10xf32> to vector<2x10xf32>
    %399 = arith.mulf %397, %398 : vector<2x10xf32>
    %400 = arith.addf %394, %399 : vector<2x10xf32>
    %401 = vector.extract_strided_slice %71 {offsets = [14, 3], sizes = [2, 3], strides = [1, 1]} : vector<18x12xf32> to vector<2x3xf32>
    %402 = vector.extract_strided_slice %401 {offsets = [0, 0], sizes = [2, 1], strides = [1, 1]} : vector<2x3xf32> to vector<2x1xf32>
    %403 = vector.extract_strided_slice %72 {offsets = [21, 0], sizes = [1, 10], strides = [1, 1]} : vector<27x10xf32> to vector<1x10xf32>
    %404 = vector.broadcast %402 : vector<2x1xf32> to vector<2x10xf32>
    %405 = vector.broadcast %403 : vector<1x10xf32> to vector<2x10xf32>
    %406 = arith.mulf %404, %405 : vector<2x10xf32>
    %407 = arith.addf %400, %406 : vector<2x10xf32>
    %408 = vector.extract_strided_slice %401 {offsets = [0, 1], sizes = [2, 1], strides = [1, 1]} : vector<2x3xf32> to vector<2x1xf32>
    %409 = vector.extract_strided_slice %72 {offsets = [22, 0], sizes = [1, 10], strides = [1, 1]} : vector<27x10xf32> to vector<1x10xf32>
    %410 = vector.broadcast %408 : vector<2x1xf32> to vector<2x10xf32>
    %411 = vector.broadcast %409 : vector<1x10xf32> to vector<2x10xf32>
    %412 = arith.mulf %410, %411 : vector<2x10xf32>
    %413 = arith.addf %407, %412 : vector<2x10xf32>
    %414 = vector.extract_strided_slice %401 {offsets = [0, 2], sizes = [2, 1], strides = [1, 1]} : vector<2x3xf32> to vector<2x1xf32>
    %415 = vector.extract_strided_slice %72 {offsets = [23, 0], sizes = [1, 10], strides = [1, 1]} : vector<27x10xf32> to vector<1x10xf32>
    %416 = vector.broadcast %414 : vector<2x1xf32> to vector<2x10xf32>
    %417 = vector.broadcast %415 : vector<1x10xf32> to vector<2x10xf32>
    %418 = arith.mulf %416, %417 : vector<2x10xf32>
    %419 = arith.addf %413, %418 : vector<2x10xf32>
    %420 = vector.extract_strided_slice %71 {offsets = [16, 3], sizes = [2, 3], strides = [1, 1]} : vector<18x12xf32> to vector<2x3xf32>
    %421 = vector.extract_strided_slice %420 {offsets = [0, 0], sizes = [2, 1], strides = [1, 1]} : vector<2x3xf32> to vector<2x1xf32>
    %422 = vector.extract_strided_slice %72 {offsets = [24, 0], sizes = [1, 10], strides = [1, 1]} : vector<27x10xf32> to vector<1x10xf32>
    %423 = vector.broadcast %421 : vector<2x1xf32> to vector<2x10xf32>
    %424 = vector.broadcast %422 : vector<1x10xf32> to vector<2x10xf32>
    %425 = arith.mulf %423, %424 : vector<2x10xf32>
    %426 = arith.addf %419, %425 : vector<2x10xf32>
    %427 = vector.extract_strided_slice %420 {offsets = [0, 1], sizes = [2, 1], strides = [1, 1]} : vector<2x3xf32> to vector<2x1xf32>
    %428 = vector.extract_strided_slice %72 {offsets = [25, 0], sizes = [1, 10], strides = [1, 1]} : vector<27x10xf32> to vector<1x10xf32>
    %429 = vector.broadcast %427 : vector<2x1xf32> to vector<2x10xf32>
    %430 = vector.broadcast %428 : vector<1x10xf32> to vector<2x10xf32>
    %431 = arith.mulf %429, %430 : vector<2x10xf32>
    %432 = arith.addf %426, %431 : vector<2x10xf32>
    %433 = vector.extract_strided_slice %420 {offsets = [0, 2], sizes = [2, 1], strides = [1, 1]} : vector<2x3xf32> to vector<2x1xf32>
    %434 = vector.extract_strided_slice %72 {offsets = [26, 0], sizes = [1, 10], strides = [1, 1]} : vector<27x10xf32> to vector<1x10xf32>
    %435 = vector.broadcast %433 : vector<2x1xf32> to vector<2x10xf32>
    %436 = vector.broadcast %434 : vector<1x10xf32> to vector<2x10xf32>
    %437 = arith.mulf %435, %436 : vector<2x10xf32>
    %438 = arith.addf %432, %437 : vector<2x10xf32>
    %439 = vector.extract_strided_slice %438 {offsets = [0, 0], sizes = [2, 1], strides = [1, 1]} : vector<2x10xf32> to vector<2x1xf32>
    %440 = vector.broadcast %73 : vector<1x1xf32> to vector<2x1xf32>
    %441 = arith.addf %439, %440 : vector<2x1xf32>
    %442 = math.tanh %441 : vector<2x1xf32>
    %443 = vector.extract_strided_slice %438 {offsets = [0, 1], sizes = [2, 9], strides = [1, 1]} : vector<2x10xf32> to vector<2x9xf32>
    %444 = vector.broadcast %74 : vector<1x9xf32> to vector<2x9xf32>
    %445 = arith.addf %443, %444 : vector<2x9xf32>
    %cst_75 = arith.constant dense<0xFF800000> : vector<2xf32>
    %446 = vector.multi_reduction <maximumf>, %445, %cst_75 [1] : vector<2x9xf32> to vector<2xf32>
    %447 = vector.shape_cast %446 : vector<2xf32> to vector<2x1xf32>
    %448 = vector.broadcast %447 : vector<2x1xf32> to vector<2x9xf32>
    %449 = arith.subf %445, %448 : vector<2x9xf32>
    %450 = math.exp %449 : vector<2x9xf32>
    %cst_76 = arith.constant dense<0.000000e+00> : vector<2xf32>
    %451 = vector.multi_reduction <add>, %450, %cst_76 [1] : vector<2x9xf32> to vector<2xf32>
    %452 = vector.shape_cast %451 : vector<2xf32> to vector<2x1xf32>
    %453 = vector.broadcast %452 : vector<2x1xf32> to vector<2x9xf32>
    %454 = arith.divf %450, %453 : vector<2x9xf32>
    %c2_77 = arith.constant 2 : index
    %c0_78 = arith.constant 0 : index
    %455 = vector.load %arg13[%c2_77, %c0_78] : memref<8x128xf32, #tpu.memory_space<vmem>>, vector<2x1xf32>
    tpu.vector_store %arg13[%c2_77, %c0_78], %442 {strides = array<i32>} : memref<8x128xf32, #tpu.memory_space<vmem>>, vector<2x1xf32>,
    %c2_79 = arith.constant 2 : index
    %c1_80 = arith.constant 1 : index
    %456 = vector.load %arg13[%c2_79, %c1_80] : memref<8x128xf32, #tpu.memory_space<vmem>>, vector<2x9xf32>
    tpu.vector_store %arg13[%c2_79, %c1_80], %454 {strides = array<i32>} : memref<8x128xf32, #tpu.memory_space<vmem>>, vector<2x9xf32>,
    %cst_81 = arith.constant 0.000000e+00 : f32
    %457 = vector.broadcast %cst_81 : f32 to vector<2x10xf32>
    %458 = vector.extract_strided_slice %71 {offsets = [0, 6], sizes = [2, 3], strides = [1, 1]} : vector<18x12xf32> to vector<2x3xf32>
    %459 = vector.extract_strided_slice %458 {offsets = [0, 0], sizes = [2, 1], strides = [1, 1]} : vector<2x3xf32> to vector<2x1xf32>
    %460 = vector.extract_strided_slice %72 {offsets = [0, 0], sizes = [1, 10], strides = [1, 1]} : vector<27x10xf32> to vector<1x10xf32>
    %461 = vector.broadcast %459 : vector<2x1xf32> to vector<2x10xf32>
    %462 = vector.broadcast %460 : vector<1x10xf32> to vector<2x10xf32>
    %463 = arith.mulf %461, %462 : vector<2x10xf32>
    %464 = arith.addf %457, %463 : vector<2x10xf32>
    %465 = vector.extract_strided_slice %458 {offsets = [0, 1], sizes = [2, 1], strides = [1, 1]} : vector<2x3xf32> to vector<2x1xf32>
    %466 = vector.extract_strided_slice %72 {offsets = [1, 0], sizes = [1, 10], strides = [1, 1]} : vector<27x10xf32> to vector<1x10xf32>
    %467 = vector.broadcast %465 : vector<2x1xf32> to vector<2x10xf32>
    %468 = vector.broadcast %466 : vector<1x10xf32> to vector<2x10xf32>
    %469 = arith.mulf %467, %468 : vector<2x10xf32>
    %470 = arith.addf %464, %469 : vector<2x10xf32>
    %471 = vector.extract_strided_slice %458 {offsets = [0, 2], sizes = [2, 1], strides = [1, 1]} : vector<2x3xf32> to vector<2x1xf32>
    %472 = vector.extract_strided_slice %72 {offsets = [2, 0], sizes = [1, 10], strides = [1, 1]} : vector<27x10xf32> to vector<1x10xf32>
    %473 = vector.broadcast %471 : vector<2x1xf32> to vector<2x10xf32>
    %474 = vector.broadcast %472 : vector<1x10xf32> to vector<2x10xf32>
    %475 = arith.mulf %473, %474 : vector<2x10xf32>
    %476 = arith.addf %470, %475 : vector<2x10xf32>
    %477 = vector.extract_strided_slice %71 {offsets = [2, 6], sizes = [2, 3], strides = [1, 1]} : vector<18x12xf32> to vector<2x3xf32>
    %478 = vector.extract_strided_slice %477 {offsets = [0, 0], sizes = [2, 1], strides = [1, 1]} : vector<2x3xf32> to vector<2x1xf32>
    %479 = vector.extract_strided_slice %72 {offsets = [3, 0], sizes = [1, 10], strides = [1, 1]} : vector<27x10xf32> to vector<1x10xf32>
    %480 = vector.broadcast %478 : vector<2x1xf32> to vector<2x10xf32>
    %481 = vector.broadcast %479 : vector<1x10xf32> to vector<2x10xf32>
    %482 = arith.mulf %480, %481 : vector<2x10xf32>
    %483 = arith.addf %476, %482 : vector<2x10xf32>
    %484 = vector.extract_strided_slice %477 {offsets = [0, 1], sizes = [2, 1], strides = [1, 1]} : vector<2x3xf32> to vector<2x1xf32>
    %485 = vector.extract_strided_slice %72 {offsets = [4, 0], sizes = [1, 10], strides = [1, 1]} : vector<27x10xf32> to vector<1x10xf32>
    %486 = vector.broadcast %484 : vector<2x1xf32> to vector<2x10xf32>
    %487 = vector.broadcast %485 : vector<1x10xf32> to vector<2x10xf32>
    %488 = arith.mulf %486, %487 : vector<2x10xf32>
    %489 = arith.addf %483, %488 : vector<2x10xf32>
    %490 = vector.extract_strided_slice %477 {offsets = [0, 2], sizes = [2, 1], strides = [1, 1]} : vector<2x3xf32> to vector<2x1xf32>
    %491 = vector.extract_strided_slice %72 {offsets = [5, 0], sizes = [1, 10], strides = [1, 1]} : vector<27x10xf32> to vector<1x10xf32>
    %492 = vector.broadcast %490 : vector<2x1xf32> to vector<2x10xf32>
    %493 = vector.broadcast %491 : vector<1x10xf32> to vector<2x10xf32>
    %494 = arith.mulf %492, %493 : vector<2x10xf32>
    %495 = arith.addf %489, %494 : vector<2x10xf32>
    %496 = vector.extract_strided_slice %71 {offsets = [4, 6], sizes = [2, 3], strides = [1, 1]} : vector<18x12xf32> to vector<2x3xf32>
    %497 = vector.extract_strided_slice %496 {offsets = [0, 0], sizes = [2, 1], strides = [1, 1]} : vector<2x3xf32> to vector<2x1xf32>
    %498 = vector.extract_strided_slice %72 {offsets = [6, 0], sizes = [1, 10], strides = [1, 1]} : vector<27x10xf32> to vector<1x10xf32>
    %499 = vector.broadcast %497 : vector<2x1xf32> to vector<2x10xf32>
    %500 = vector.broadcast %498 : vector<1x10xf32> to vector<2x10xf32>
    %501 = arith.mulf %499, %500 : vector<2x10xf32>
    %502 = arith.addf %495, %501 : vector<2x10xf32>
    %503 = vector.extract_strided_slice %496 {offsets = [0, 1], sizes = [2, 1], strides = [1, 1]} : vector<2x3xf32> to vector<2x1xf32>
    %504 = vector.extract_strided_slice %72 {offsets = [7, 0], sizes = [1, 10], strides = [1, 1]} : vector<27x10xf32> to vector<1x10xf32>
    %505 = vector.broadcast %503 : vector<2x1xf32> to vector<2x10xf32>
    %506 = vector.broadcast %504 : vector<1x10xf32> to vector<2x10xf32>
    %507 = arith.mulf %505, %506 : vector<2x10xf32>
    %508 = arith.addf %502, %507 : vector<2x10xf32>
    %509 = vector.extract_strided_slice %496 {offsets = [0, 2], sizes = [2, 1], strides = [1, 1]} : vector<2x3xf32> to vector<2x1xf32>
    %510 = vector.extract_strided_slice %72 {offsets = [8, 0], sizes = [1, 10], strides = [1, 1]} : vector<27x10xf32> to vector<1x10xf32>
    %511 = vector.broadcast %509 : vector<2x1xf32> to vector<2x10xf32>
    %512 = vector.broadcast %510 : vector<1x10xf32> to vector<2x10xf32>
    %513 = arith.mulf %511, %512 : vector<2x10xf32>
    %514 = arith.addf %508, %513 : vector<2x10xf32>
    %515 = vector.extract_strided_slice %71 {offsets = [6, 6], sizes = [2, 3], strides = [1, 1]} : vector<18x12xf32> to vector<2x3xf32>
    %516 = vector.extract_strided_slice %515 {offsets = [0, 0], sizes = [2, 1], strides = [1, 1]} : vector<2x3xf32> to vector<2x1xf32>
    %517 = vector.extract_strided_slice %72 {offsets = [9, 0], sizes = [1, 10], strides = [1, 1]} : vector<27x10xf32> to vector<1x10xf32>
    %518 = vector.broadcast %516 : vector<2x1xf32> to vector<2x10xf32>
    %519 = vector.broadcast %517 : vector<1x10xf32> to vector<2x10xf32>
    %520 = arith.mulf %518, %519 : vector<2x10xf32>
    %521 = arith.addf %514, %520 : vector<2x10xf32>
    %522 = vector.extract_strided_slice %515 {offsets = [0, 1], sizes = [2, 1], strides = [1, 1]} : vector<2x3xf32> to vector<2x1xf32>
    %523 = vector.extract_strided_slice %72 {offsets = [10, 0], sizes = [1, 10], strides = [1, 1]} : vector<27x10xf32> to vector<1x10xf32>
    %524 = vector.broadcast %522 : vector<2x1xf32> to vector<2x10xf32>
    %525 = vector.broadcast %523 : vector<1x10xf32> to vector<2x10xf32>
    %526 = arith.mulf %524, %525 : vector<2x10xf32>
    %527 = arith.addf %521, %526 : vector<2x10xf32>
    %528 = vector.extract_strided_slice %515 {offsets = [0, 2], sizes = [2, 1], strides = [1, 1]} : vector<2x3xf32> to vector<2x1xf32>
    %529 = vector.extract_strided_slice %72 {offsets = [11, 0], sizes = [1, 10], strides = [1, 1]} : vector<27x10xf32> to vector<1x10xf32>
    %530 = vector.broadcast %528 : vector<2x1xf32> to vector<2x10xf32>
    %531 = vector.broadcast %529 : vector<1x10xf32> to vector<2x10xf32>
    %532 = arith.mulf %530, %531 : vector<2x10xf32>
    %533 = arith.addf %527, %532 : vector<2x10xf32>
    %534 = vector.extract_strided_slice %71 {offsets = [8, 6], sizes = [2, 3], strides = [1, 1]} : vector<18x12xf32> to vector<2x3xf32>
    %535 = vector.extract_strided_slice %534 {offsets = [0, 0], sizes = [2, 1], strides = [1, 1]} : vector<2x3xf32> to vector<2x1xf32>
    %536 = vector.extract_strided_slice %72 {offsets = [12, 0], sizes = [1, 10], strides = [1, 1]} : vector<27x10xf32> to vector<1x10xf32>
    %537 = vector.broadcast %535 : vector<2x1xf32> to vector<2x10xf32>
    %538 = vector.broadcast %536 : vector<1x10xf32> to vector<2x10xf32>
    %539 = arith.mulf %537, %538 : vector<2x10xf32>
    %540 = arith.addf %533, %539 : vector<2x10xf32>
    %541 = vector.extract_strided_slice %534 {offsets = [0, 1], sizes = [2, 1], strides = [1, 1]} : vector<2x3xf32> to vector<2x1xf32>
    %542 = vector.extract_strided_slice %72 {offsets = [13, 0], sizes = [1, 10], strides = [1, 1]} : vector<27x10xf32> to vector<1x10xf32>
    %543 = vector.broadcast %541 : vector<2x1xf32> to vector<2x10xf32>
    %544 = vector.broadcast %542 : vector<1x10xf32> to vector<2x10xf32>
    %545 = arith.mulf %543, %544 : vector<2x10xf32>
    %546 = arith.addf %540, %545 : vector<2x10xf32>
    %547 = vector.extract_strided_slice %534 {offsets = [0, 2], sizes = [2, 1], strides = [1, 1]} : vector<2x3xf32> to vector<2x1xf32>
    %548 = vector.extract_strided_slice %72 {offsets = [14, 0], sizes = [1, 10], strides = [1, 1]} : vector<27x10xf32> to vector<1x10xf32>
    %549 = vector.broadcast %547 : vector<2x1xf32> to vector<2x10xf32>
    %550 = vector.broadcast %548 : vector<1x10xf32> to vector<2x10xf32>
    %551 = arith.mulf %549, %550 : vector<2x10xf32>
    %552 = arith.addf %546, %551 : vector<2x10xf32>
    %553 = vector.extract_strided_slice %71 {offsets = [10, 6], sizes = [2, 3], strides = [1, 1]} : vector<18x12xf32> to vector<2x3xf32>
    %554 = vector.extract_strided_slice %553 {offsets = [0, 0], sizes = [2, 1], strides = [1, 1]} : vector<2x3xf32> to vector<2x1xf32>
    %555 = vector.extract_strided_slice %72 {offsets = [15, 0], sizes = [1, 10], strides = [1, 1]} : vector<27x10xf32> to vector<1x10xf32>
    %556 = vector.broadcast %554 : vector<2x1xf32> to vector<2x10xf32>
    %557 = vector.broadcast %555 : vector<1x10xf32> to vector<2x10xf32>
    %558 = arith.mulf %556, %557 : vector<2x10xf32>
    %559 = arith.addf %552, %558 : vector<2x10xf32>
    %560 = vector.extract_strided_slice %553 {offsets = [0, 1], sizes = [2, 1], strides = [1, 1]} : vector<2x3xf32> to vector<2x1xf32>
    %561 = vector.extract_strided_slice %72 {offsets = [16, 0], sizes = [1, 10], strides = [1, 1]} : vector<27x10xf32> to vector<1x10xf32>
    %562 = vector.broadcast %560 : vector<2x1xf32> to vector<2x10xf32>
    %563 = vector.broadcast %561 : vector<1x10xf32> to vector<2x10xf32>
    %564 = arith.mulf %562, %563 : vector<2x10xf32>
    %565 = arith.addf %559, %564 : vector<2x10xf32>
    %566 = vector.extract_strided_slice %553 {offsets = [0, 2], sizes = [2, 1], strides = [1, 1]} : vector<2x3xf32> to vector<2x1xf32>
    %567 = vector.extract_strided_slice %72 {offsets = [17, 0], sizes = [1, 10], strides = [1, 1]} : vector<27x10xf32> to vector<1x10xf32>
    %568 = vector.broadcast %566 : vector<2x1xf32> to vector<2x10xf32>
    %569 = vector.broadcast %567 : vector<1x10xf32> to vector<2x10xf32>
    %570 = arith.mulf %568, %569 : vector<2x10xf32>
    %571 = arith.addf %565, %570 : vector<2x10xf32>
    %572 = vector.extract_strided_slice %71 {offsets = [12, 6], sizes = [2, 3], strides = [1, 1]} : vector<18x12xf32> to vector<2x3xf32>
    %573 = vector.extract_strided_slice %572 {offsets = [0, 0], sizes = [2, 1], strides = [1, 1]} : vector<2x3xf32> to vector<2x1xf32>
    %574 = vector.extract_strided_slice %72 {offsets = [18, 0], sizes = [1, 10], strides = [1, 1]} : vector<27x10xf32> to vector<1x10xf32>
    %575 = vector.broadcast %573 : vector<2x1xf32> to vector<2x10xf32>
    %576 = vector.broadcast %574 : vector<1x10xf32> to vector<2x10xf32>
    %577 = arith.mulf %575, %576 : vector<2x10xf32>
    %578 = arith.addf %571, %577 : vector<2x10xf32>
    %579 = vector.extract_strided_slice %572 {offsets = [0, 1], sizes = [2, 1], strides = [1, 1]} : vector<2x3xf32> to vector<2x1xf32>
    %580 = vector.extract_strided_slice %72 {offsets = [19, 0], sizes = [1, 10], strides = [1, 1]} : vector<27x10xf32> to vector<1x10xf32>
    %581 = vector.broadcast %579 : vector<2x1xf32> to vector<2x10xf32>
    %582 = vector.broadcast %580 : vector<1x10xf32> to vector<2x10xf32>
    %583 = arith.mulf %581, %582 : vector<2x10xf32>
    %584 = arith.addf %578, %583 : vector<2x10xf32>
    %585 = vector.extract_strided_slice %572 {offsets = [0, 2], sizes = [2, 1], strides = [1, 1]} : vector<2x3xf32> to vector<2x1xf32>
    %586 = vector.extract_strided_slice %72 {offsets = [20, 0], sizes = [1, 10], strides = [1, 1]} : vector<27x10xf32> to vector<1x10xf32>
    %587 = vector.broadcast %585 : vector<2x1xf32> to vector<2x10xf32>
    %588 = vector.broadcast %586 : vector<1x10xf32> to vector<2x10xf32>
    %589 = arith.mulf %587, %588 : vector<2x10xf32>
    %590 = arith.addf %584, %589 : vector<2x10xf32>
    %591 = vector.extract_strided_slice %71 {offsets = [14, 6], sizes = [2, 3], strides = [1, 1]} : vector<18x12xf32> to vector<2x3xf32>
    %592 = vector.extract_strided_slice %591 {offsets = [0, 0], sizes = [2, 1], strides = [1, 1]} : vector<2x3xf32> to vector<2x1xf32>
    %593 = vector.extract_strided_slice %72 {offsets = [21, 0], sizes = [1, 10], strides = [1, 1]} : vector<27x10xf32> to vector<1x10xf32>
    %594 = vector.broadcast %592 : vector<2x1xf32> to vector<2x10xf32>
    %595 = vector.broadcast %593 : vector<1x10xf32> to vector<2x10xf32>
    %596 = arith.mulf %594, %595 : vector<2x10xf32>
    %597 = arith.addf %590, %596 : vector<2x10xf32>
    %598 = vector.extract_strided_slice %591 {offsets = [0, 1], sizes = [2, 1], strides = [1, 1]} : vector<2x3xf32> to vector<2x1xf32>
    %599 = vector.extract_strided_slice %72 {offsets = [22, 0], sizes = [1, 10], strides = [1, 1]} : vector<27x10xf32> to vector<1x10xf32>
    %600 = vector.broadcast %598 : vector<2x1xf32> to vector<2x10xf32>
    %601 = vector.broadcast %599 : vector<1x10xf32> to vector<2x10xf32>
    %602 = arith.mulf %600, %601 : vector<2x10xf32>
    %603 = arith.addf %597, %602 : vector<2x10xf32>
    %604 = vector.extract_strided_slice %591 {offsets = [0, 2], sizes = [2, 1], strides = [1, 1]} : vector<2x3xf32> to vector<2x1xf32>
    %605 = vector.extract_strided_slice %72 {offsets = [23, 0], sizes = [1, 10], strides = [1, 1]} : vector<27x10xf32> to vector<1x10xf32>
    %606 = vector.broadcast %604 : vector<2x1xf32> to vector<2x10xf32>
    %607 = vector.broadcast %605 : vector<1x10xf32> to vector<2x10xf32>
    %608 = arith.mulf %606, %607 : vector<2x10xf32>
    %609 = arith.addf %603, %608 : vector<2x10xf32>
    %610 = vector.extract_strided_slice %71 {offsets = [16, 6], sizes = [2, 3], strides = [1, 1]} : vector<18x12xf32> to vector<2x3xf32>
    %611 = vector.extract_strided_slice %610 {offsets = [0, 0], sizes = [2, 1], strides = [1, 1]} : vector<2x3xf32> to vector<2x1xf32>
    %612 = vector.extract_strided_slice %72 {offsets = [24, 0], sizes = [1, 10], strides = [1, 1]} : vector<27x10xf32> to vector<1x10xf32>
    %613 = vector.broadcast %611 : vector<2x1xf32> to vector<2x10xf32>
    %614 = vector.broadcast %612 : vector<1x10xf32> to vector<2x10xf32>
    %615 = arith.mulf %613, %614 : vector<2x10xf32>
    %616 = arith.addf %609, %615 : vector<2x10xf32>
    %617 = vector.extract_strided_slice %610 {offsets = [0, 1], sizes = [2, 1], strides = [1, 1]} : vector<2x3xf32> to vector<2x1xf32>
    %618 = vector.extract_strided_slice %72 {offsets = [25, 0], sizes = [1, 10], strides = [1, 1]} : vector<27x10xf32> to vector<1x10xf32>
    %619 = vector.broadcast %617 : vector<2x1xf32> to vector<2x10xf32>
    %620 = vector.broadcast %618 : vector<1x10xf32> to vector<2x10xf32>
    %621 = arith.mulf %619, %620 : vector<2x10xf32>
    %622 = arith.addf %616, %621 : vector<2x10xf32>
    %623 = vector.extract_strided_slice %610 {offsets = [0, 2], sizes = [2, 1], strides = [1, 1]} : vector<2x3xf32> to vector<2x1xf32>
    %624 = vector.extract_strided_slice %72 {offsets = [26, 0], sizes = [1, 10], strides = [1, 1]} : vector<27x10xf32> to vector<1x10xf32>
    %625 = vector.broadcast %623 : vector<2x1xf32> to vector<2x10xf32>
    %626 = vector.broadcast %624 : vector<1x10xf32> to vector<2x10xf32>
    %627 = arith.mulf %625, %626 : vector<2x10xf32>
    %628 = arith.addf %622, %627 : vector<2x10xf32>
    %629 = vector.extract_strided_slice %628 {offsets = [0, 0], sizes = [2, 1], strides = [1, 1]} : vector<2x10xf32> to vector<2x1xf32>
    %630 = vector.broadcast %73 : vector<1x1xf32> to vector<2x1xf32>
    %631 = arith.addf %629, %630 : vector<2x1xf32>
    %632 = math.tanh %631 : vector<2x1xf32>
    %633 = vector.extract_strided_slice %628 {offsets = [0, 1], sizes = [2, 9], strides = [1, 1]} : vector<2x10xf32> to vector<2x9xf32>
    %634 = vector.broadcast %74 : vector<1x9xf32> to vector<2x9xf32>
    %635 = arith.addf %633, %634 : vector<2x9xf32>
    %cst_82 = arith.constant dense<0xFF800000> : vector<2xf32>
    %636 = vector.multi_reduction <maximumf>, %635, %cst_82 [1] : vector<2x9xf32> to vector<2xf32>
    %637 = vector.shape_cast %636 : vector<2xf32> to vector<2x1xf32>
    %638 = vector.broadcast %637 : vector<2x1xf32> to vector<2x9xf32>
    %639 = arith.subf %635, %638 : vector<2x9xf32>
    %640 = math.exp %639 : vector<2x9xf32>
    %cst_83 = arith.constant dense<0.000000e+00> : vector<2xf32>
    %641 = vector.multi_reduction <add>, %640, %cst_83 [1] : vector<2x9xf32> to vector<2xf32>
    %642 = vector.shape_cast %641 : vector<2xf32> to vector<2x1xf32>
    %643 = vector.broadcast %642 : vector<2x1xf32> to vector<2x9xf32>
    %644 = arith.divf %640, %643 : vector<2x9xf32>
    %c4 = arith.constant 4 : index
    %c0_84 = arith.constant 0 : index
    %645 = vector.load %arg13[%c4, %c0_84] : memref<8x128xf32, #tpu.memory_space<vmem>>, vector<2x1xf32>
    tpu.vector_store %arg13[%c4, %c0_84], %632 {strides = array<i32>} : memref<8x128xf32, #tpu.memory_space<vmem>>, vector<2x1xf32>,
    %c4_85 = arith.constant 4 : index
    %c1_86 = arith.constant 1 : index
    %646 = vector.load %arg13[%c4_85, %c1_86] : memref<8x128xf32, #tpu.memory_space<vmem>>, vector<2x9xf32>
    tpu.vector_store %arg13[%c4_85, %c1_86], %644 {strides = array<i32>} : memref<8x128xf32, #tpu.memory_space<vmem>>, vector<2x9xf32>,
    %cst_87 = arith.constant 0.000000e+00 : f32
    %647 = vector.broadcast %cst_87 : f32 to vector<2x10xf32>
    %648 = vector.extract_strided_slice %71 {offsets = [0, 9], sizes = [2, 3], strides = [1, 1]} : vector<18x12xf32> to vector<2x3xf32>
    %649 = vector.extract_strided_slice %648 {offsets = [0, 0], sizes = [2, 1], strides = [1, 1]} : vector<2x3xf32> to vector<2x1xf32>
    %650 = vector.extract_strided_slice %72 {offsets = [0, 0], sizes = [1, 10], strides = [1, 1]} : vector<27x10xf32> to vector<1x10xf32>
    %651 = vector.broadcast %649 : vector<2x1xf32> to vector<2x10xf32>
    %652 = vector.broadcast %650 : vector<1x10xf32> to vector<2x10xf32>
    %653 = arith.mulf %651, %652 : vector<2x10xf32>
    %654 = arith.addf %647, %653 : vector<2x10xf32>
    %655 = vector.extract_strided_slice %648 {offsets = [0, 1], sizes = [2, 1], strides = [1, 1]} : vector<2x3xf32> to vector<2x1xf32>
    %656 = vector.extract_strided_slice %72 {offsets = [1, 0], sizes = [1, 10], strides = [1, 1]} : vector<27x10xf32> to vector<1x10xf32>
    %657 = vector.broadcast %655 : vector<2x1xf32> to vector<2x10xf32>
    %658 = vector.broadcast %656 : vector<1x10xf32> to vector<2x10xf32>
    %659 = arith.mulf %657, %658 : vector<2x10xf32>
    %660 = arith.addf %654, %659 : vector<2x10xf32>
    %661 = vector.extract_strided_slice %648 {offsets = [0, 2], sizes = [2, 1], strides = [1, 1]} : vector<2x3xf32> to vector<2x1xf32>
    %662 = vector.extract_strided_slice %72 {offsets = [2, 0], sizes = [1, 10], strides = [1, 1]} : vector<27x10xf32> to vector<1x10xf32>
    %663 = vector.broadcast %661 : vector<2x1xf32> to vector<2x10xf32>
    %664 = vector.broadcast %662 : vector<1x10xf32> to vector<2x10xf32>
    %665 = arith.mulf %663, %664 : vector<2x10xf32>
    %666 = arith.addf %660, %665 : vector<2x10xf32>
    %667 = vector.extract_strided_slice %71 {offsets = [2, 9], sizes = [2, 3], strides = [1, 1]} : vector<18x12xf32> to vector<2x3xf32>
    %668 = vector.extract_strided_slice %667 {offsets = [0, 0], sizes = [2, 1], strides = [1, 1]} : vector<2x3xf32> to vector<2x1xf32>
    %669 = vector.extract_strided_slice %72 {offsets = [3, 0], sizes = [1, 10], strides = [1, 1]} : vector<27x10xf32> to vector<1x10xf32>
    %670 = vector.broadcast %668 : vector<2x1xf32> to vector<2x10xf32>
    %671 = vector.broadcast %669 : vector<1x10xf32> to vector<2x10xf32>
    %672 = arith.mulf %670, %671 : vector<2x10xf32>
    %673 = arith.addf %666, %672 : vector<2x10xf32>
    %674 = vector.extract_strided_slice %667 {offsets = [0, 1], sizes = [2, 1], strides = [1, 1]} : vector<2x3xf32> to vector<2x1xf32>
    %675 = vector.extract_strided_slice %72 {offsets = [4, 0], sizes = [1, 10], strides = [1, 1]} : vector<27x10xf32> to vector<1x10xf32>
    %676 = vector.broadcast %674 : vector<2x1xf32> to vector<2x10xf32>
    %677 = vector.broadcast %675 : vector<1x10xf32> to vector<2x10xf32>
    %678 = arith.mulf %676, %677 : vector<2x10xf32>
    %679 = arith.addf %673, %678 : vector<2x10xf32>
    %680 = vector.extract_strided_slice %667 {offsets = [0, 2], sizes = [2, 1], strides = [1, 1]} : vector<2x3xf32> to vector<2x1xf32>
    %681 = vector.extract_strided_slice %72 {offsets = [5, 0], sizes = [1, 10], strides = [1, 1]} : vector<27x10xf32> to vector<1x10xf32>
    %682 = vector.broadcast %680 : vector<2x1xf32> to vector<2x10xf32>
    %683 = vector.broadcast %681 : vector<1x10xf32> to vector<2x10xf32>
    %684 = arith.mulf %682, %683 : vector<2x10xf32>
    %685 = arith.addf %679, %684 : vector<2x10xf32>
    %686 = vector.extract_strided_slice %71 {offsets = [4, 9], sizes = [2, 3], strides = [1, 1]} : vector<18x12xf32> to vector<2x3xf32>
    %687 = vector.extract_strided_slice %686 {offsets = [0, 0], sizes = [2, 1], strides = [1, 1]} : vector<2x3xf32> to vector<2x1xf32>
    %688 = vector.extract_strided_slice %72 {offsets = [6, 0], sizes = [1, 10], strides = [1, 1]} : vector<27x10xf32> to vector<1x10xf32>
    %689 = vector.broadcast %687 : vector<2x1xf32> to vector<2x10xf32>
    %690 = vector.broadcast %688 : vector<1x10xf32> to vector<2x10xf32>
    %691 = arith.mulf %689, %690 : vector<2x10xf32>
    %692 = arith.addf %685, %691 : vector<2x10xf32>
    %693 = vector.extract_strided_slice %686 {offsets = [0, 1], sizes = [2, 1], strides = [1, 1]} : vector<2x3xf32> to vector<2x1xf32>
    %694 = vector.extract_strided_slice %72 {offsets = [7, 0], sizes = [1, 10], strides = [1, 1]} : vector<27x10xf32> to vector<1x10xf32>
    %695 = vector.broadcast %693 : vector<2x1xf32> to vector<2x10xf32>
    %696 = vector.broadcast %694 : vector<1x10xf32> to vector<2x10xf32>
    %697 = arith.mulf %695, %696 : vector<2x10xf32>
    %698 = arith.addf %692, %697 : vector<2x10xf32>
    %699 = vector.extract_strided_slice %686 {offsets = [0, 2], sizes = [2, 1], strides = [1, 1]} : vector<2x3xf32> to vector<2x1xf32>
    %700 = vector.extract_strided_slice %72 {offsets = [8, 0], sizes = [1, 10], strides = [1, 1]} : vector<27x10xf32> to vector<1x10xf32>
    %701 = vector.broadcast %699 : vector<2x1xf32> to vector<2x10xf32>
    %702 = vector.broadcast %700 : vector<1x10xf32> to vector<2x10xf32>
    %703 = arith.mulf %701, %702 : vector<2x10xf32>
    %704 = arith.addf %698, %703 : vector<2x10xf32>
    %705 = vector.extract_strided_slice %71 {offsets = [6, 9], sizes = [2, 3], strides = [1, 1]} : vector<18x12xf32> to vector<2x3xf32>
    %706 = vector.extract_strided_slice %705 {offsets = [0, 0], sizes = [2, 1], strides = [1, 1]} : vector<2x3xf32> to vector<2x1xf32>
    %707 = vector.extract_strided_slice %72 {offsets = [9, 0], sizes = [1, 10], strides = [1, 1]} : vector<27x10xf32> to vector<1x10xf32>
    %708 = vector.broadcast %706 : vector<2x1xf32> to vector<2x10xf32>
    %709 = vector.broadcast %707 : vector<1x10xf32> to vector<2x10xf32>
    %710 = arith.mulf %708, %709 : vector<2x10xf32>
    %711 = arith.addf %704, %710 : vector<2x10xf32>
    %712 = vector.extract_strided_slice %705 {offsets = [0, 1], sizes = [2, 1], strides = [1, 1]} : vector<2x3xf32> to vector<2x1xf32>
    %713 = vector.extract_strided_slice %72 {offsets = [10, 0], sizes = [1, 10], strides = [1, 1]} : vector<27x10xf32> to vector<1x10xf32>
    %714 = vector.broadcast %712 : vector<2x1xf32> to vector<2x10xf32>
    %715 = vector.broadcast %713 : vector<1x10xf32> to vector<2x10xf32>
    %716 = arith.mulf %714, %715 : vector<2x10xf32>
    %717 = arith.addf %711, %716 : vector<2x10xf32>
    %718 = vector.extract_strided_slice %705 {offsets = [0, 2], sizes = [2, 1], strides = [1, 1]} : vector<2x3xf32> to vector<2x1xf32>
    %719 = vector.extract_strided_slice %72 {offsets = [11, 0], sizes = [1, 10], strides = [1, 1]} : vector<27x10xf32> to vector<1x10xf32>
    %720 = vector.broadcast %718 : vector<2x1xf32> to vector<2x10xf32>
    %721 = vector.broadcast %719 : vector<1x10xf32> to vector<2x10xf32>
    %722 = arith.mulf %720, %721 : vector<2x10xf32>
    %723 = arith.addf %717, %722 : vector<2x10xf32>
    %724 = vector.extract_strided_slice %71 {offsets = [8, 9], sizes = [2, 3], strides = [1, 1]} : vector<18x12xf32> to vector<2x3xf32>
    %725 = vector.extract_strided_slice %724 {offsets = [0, 0], sizes = [2, 1], strides = [1, 1]} : vector<2x3xf32> to vector<2x1xf32>
    %726 = vector.extract_strided_slice %72 {offsets = [12, 0], sizes = [1, 10], strides = [1, 1]} : vector<27x10xf32> to vector<1x10xf32>
    %727 = vector.broadcast %725 : vector<2x1xf32> to vector<2x10xf32>
    %728 = vector.broadcast %726 : vector<1x10xf32> to vector<2x10xf32>
    %729 = arith.mulf %727, %728 : vector<2x10xf32>
    %730 = arith.addf %723, %729 : vector<2x10xf32>
    %731 = vector.extract_strided_slice %724 {offsets = [0, 1], sizes = [2, 1], strides = [1, 1]} : vector<2x3xf32> to vector<2x1xf32>
    %732 = vector.extract_strided_slice %72 {offsets = [13, 0], sizes = [1, 10], strides = [1, 1]} : vector<27x10xf32> to vector<1x10xf32>
    %733 = vector.broadcast %731 : vector<2x1xf32> to vector<2x10xf32>
    %734 = vector.broadcast %732 : vector<1x10xf32> to vector<2x10xf32>
    %735 = arith.mulf %733, %734 : vector<2x10xf32>
    %736 = arith.addf %730, %735 : vector<2x10xf32>
    %737 = vector.extract_strided_slice %724 {offsets = [0, 2], sizes = [2, 1], strides = [1, 1]} : vector<2x3xf32> to vector<2x1xf32>
    %738 = vector.extract_strided_slice %72 {offsets = [14, 0], sizes = [1, 10], strides = [1, 1]} : vector<27x10xf32> to vector<1x10xf32>
    %739 = vector.broadcast %737 : vector<2x1xf32> to vector<2x10xf32>
    %740 = vector.broadcast %738 : vector<1x10xf32> to vector<2x10xf32>
    %741 = arith.mulf %739, %740 : vector<2x10xf32>
    %742 = arith.addf %736, %741 : vector<2x10xf32>
    %743 = vector.extract_strided_slice %71 {offsets = [10, 9], sizes = [2, 3], strides = [1, 1]} : vector<18x12xf32> to vector<2x3xf32>
    %744 = vector.extract_strided_slice %743 {offsets = [0, 0], sizes = [2, 1], strides = [1, 1]} : vector<2x3xf32> to vector<2x1xf32>
    %745 = vector.extract_strided_slice %72 {offsets = [15, 0], sizes = [1, 10], strides = [1, 1]} : vector<27x10xf32> to vector<1x10xf32>
    %746 = vector.broadcast %744 : vector<2x1xf32> to vector<2x10xf32>
    %747 = vector.broadcast %745 : vector<1x10xf32> to vector<2x10xf32>
    %748 = arith.mulf %746, %747 : vector<2x10xf32>
    %749 = arith.addf %742, %748 : vector<2x10xf32>
    %750 = vector.extract_strided_slice %743 {offsets = [0, 1], sizes = [2, 1], strides = [1, 1]} : vector<2x3xf32> to vector<2x1xf32>
    %751 = vector.extract_strided_slice %72 {offsets = [16, 0], sizes = [1, 10], strides = [1, 1]} : vector<27x10xf32> to vector<1x10xf32>
    %752 = vector.broadcast %750 : vector<2x1xf32> to vector<2x10xf32>
    %753 = vector.broadcast %751 : vector<1x10xf32> to vector<2x10xf32>
    %754 = arith.mulf %752, %753 : vector<2x10xf32>
    %755 = arith.addf %749, %754 : vector<2x10xf32>
    %756 = vector.extract_strided_slice %743 {offsets = [0, 2], sizes = [2, 1], strides = [1, 1]} : vector<2x3xf32> to vector<2x1xf32>
    %757 = vector.extract_strided_slice %72 {offsets = [17, 0], sizes = [1, 10], strides = [1, 1]} : vector<27x10xf32> to vector<1x10xf32>
    %758 = vector.broadcast %756 : vector<2x1xf32> to vector<2x10xf32>
    %759 = vector.broadcast %757 : vector<1x10xf32> to vector<2x10xf32>
    %760 = arith.mulf %758, %759 : vector<2x10xf32>
    %761 = arith.addf %755, %760 : vector<2x10xf32>
    %762 = vector.extract_strided_slice %71 {offsets = [12, 9], sizes = [2, 3], strides = [1, 1]} : vector<18x12xf32> to vector<2x3xf32>
    %763 = vector.extract_strided_slice %762 {offsets = [0, 0], sizes = [2, 1], strides = [1, 1]} : vector<2x3xf32> to vector<2x1xf32>
    %764 = vector.extract_strided_slice %72 {offsets = [18, 0], sizes = [1, 10], strides = [1, 1]} : vector<27x10xf32> to vector<1x10xf32>
    %765 = vector.broadcast %763 : vector<2x1xf32> to vector<2x10xf32>
    %766 = vector.broadcast %764 : vector<1x10xf32> to vector<2x10xf32>
    %767 = arith.mulf %765, %766 : vector<2x10xf32>
    %768 = arith.addf %761, %767 : vector<2x10xf32>
    %769 = vector.extract_strided_slice %762 {offsets = [0, 1], sizes = [2, 1], strides = [1, 1]} : vector<2x3xf32> to vector<2x1xf32>
    %770 = vector.extract_strided_slice %72 {offsets = [19, 0], sizes = [1, 10], strides = [1, 1]} : vector<27x10xf32> to vector<1x10xf32>
    %771 = vector.broadcast %769 : vector<2x1xf32> to vector<2x10xf32>
    %772 = vector.broadcast %770 : vector<1x10xf32> to vector<2x10xf32>
    %773 = arith.mulf %771, %772 : vector<2x10xf32>
    %774 = arith.addf %768, %773 : vector<2x10xf32>
    %775 = vector.extract_strided_slice %762 {offsets = [0, 2], sizes = [2, 1], strides = [1, 1]} : vector<2x3xf32> to vector<2x1xf32>
    %776 = vector.extract_strided_slice %72 {offsets = [20, 0], sizes = [1, 10], strides = [1, 1]} : vector<27x10xf32> to vector<1x10xf32>
    %777 = vector.broadcast %775 : vector<2x1xf32> to vector<2x10xf32>
    %778 = vector.broadcast %776 : vector<1x10xf32> to vector<2x10xf32>
    %779 = arith.mulf %777, %778 : vector<2x10xf32>
    %780 = arith.addf %774, %779 : vector<2x10xf32>
    %781 = vector.extract_strided_slice %71 {offsets = [14, 9], sizes = [2, 3], strides = [1, 1]} : vector<18x12xf32> to vector<2x3xf32>
    %782 = vector.extract_strided_slice %781 {offsets = [0, 0], sizes = [2, 1], strides = [1, 1]} : vector<2x3xf32> to vector<2x1xf32>
    %783 = vector.extract_strided_slice %72 {offsets = [21, 0], sizes = [1, 10], strides = [1, 1]} : vector<27x10xf32> to vector<1x10xf32>
    %784 = vector.broadcast %782 : vector<2x1xf32> to vector<2x10xf32>
    %785 = vector.broadcast %783 : vector<1x10xf32> to vector<2x10xf32>
    %786 = arith.mulf %784, %785 : vector<2x10xf32>
    %787 = arith.addf %780, %786 : vector<2x10xf32>
    %788 = vector.extract_strided_slice %781 {offsets = [0, 1], sizes = [2, 1], strides = [1, 1]} : vector<2x3xf32> to vector<2x1xf32>
    %789 = vector.extract_strided_slice %72 {offsets = [22, 0], sizes = [1, 10], strides = [1, 1]} : vector<27x10xf32> to vector<1x10xf32>
    %790 = vector.broadcast %788 : vector<2x1xf32> to vector<2x10xf32>
    %791 = vector.broadcast %789 : vector<1x10xf32> to vector<2x10xf32>
    %792 = arith.mulf %790, %791 : vector<2x10xf32>
    %793 = arith.addf %787, %792 : vector<2x10xf32>
    %794 = vector.extract_strided_slice %781 {offsets = [0, 2], sizes = [2, 1], strides = [1, 1]} : vector<2x3xf32> to vector<2x1xf32>
    %795 = vector.extract_strided_slice %72 {offsets = [23, 0], sizes = [1, 10], strides = [1, 1]} : vector<27x10xf32> to vector<1x10xf32>
    %796 = vector.broadcast %794 : vector<2x1xf32> to vector<2x10xf32>
    %797 = vector.broadcast %795 : vector<1x10xf32> to vector<2x10xf32>
    %798 = arith.mulf %796, %797 : vector<2x10xf32>
    %799 = arith.addf %793, %798 : vector<2x10xf32>
    %800 = vector.extract_strided_slice %71 {offsets = [16, 9], sizes = [2, 3], strides = [1, 1]} : vector<18x12xf32> to vector<2x3xf32>
    %801 = vector.extract_strided_slice %800 {offsets = [0, 0], sizes = [2, 1], strides = [1, 1]} : vector<2x3xf32> to vector<2x1xf32>
    %802 = vector.extract_strided_slice %72 {offsets = [24, 0], sizes = [1, 10], strides = [1, 1]} : vector<27x10xf32> to vector<1x10xf32>
    %803 = vector.broadcast %801 : vector<2x1xf32> to vector<2x10xf32>
    %804 = vector.broadcast %802 : vector<1x10xf32> to vector<2x10xf32>
    %805 = arith.mulf %803, %804 : vector<2x10xf32>
    %806 = arith.addf %799, %805 : vector<2x10xf32>
    %807 = vector.extract_strided_slice %800 {offsets = [0, 1], sizes = [2, 1], strides = [1, 1]} : vector<2x3xf32> to vector<2x1xf32>
    %808 = vector.extract_strided_slice %72 {offsets = [25, 0], sizes = [1, 10], strides = [1, 1]} : vector<27x10xf32> to vector<1x10xf32>
    %809 = vector.broadcast %807 : vector<2x1xf32> to vector<2x10xf32>
    %810 = vector.broadcast %808 : vector<1x10xf32> to vector<2x10xf32>
    %811 = arith.mulf %809, %810 : vector<2x10xf32>
    %812 = arith.addf %806, %811 : vector<2x10xf32>
    %813 = vector.extract_strided_slice %800 {offsets = [0, 2], sizes = [2, 1], strides = [1, 1]} : vector<2x3xf32> to vector<2x1xf32>
    %814 = vector.extract_strided_slice %72 {offsets = [26, 0], sizes = [1, 10], strides = [1, 1]} : vector<27x10xf32> to vector<1x10xf32>
    %815 = vector.broadcast %813 : vector<2x1xf32> to vector<2x10xf32>
    %816 = vector.broadcast %814 : vector<1x10xf32> to vector<2x10xf32>
    %817 = arith.mulf %815, %816 : vector<2x10xf32>
    %818 = arith.addf %812, %817 : vector<2x10xf32>
    %819 = vector.extract_strided_slice %818 {offsets = [0, 0], sizes = [2, 1], strides = [1, 1]} : vector<2x10xf32> to vector<2x1xf32>
    %820 = vector.broadcast %73 : vector<1x1xf32> to vector<2x1xf32>
    %821 = arith.addf %819, %820 : vector<2x1xf32>
    %822 = math.tanh %821 : vector<2x1xf32>
    %823 = vector.extract_strided_slice %818 {offsets = [0, 1], sizes = [2, 9], strides = [1, 1]} : vector<2x10xf32> to vector<2x9xf32>
    %824 = vector.broadcast %74 : vector<1x9xf32> to vector<2x9xf32>
    %825 = arith.addf %823, %824 : vector<2x9xf32>
    %cst_88 = arith.constant dense<0xFF800000> : vector<2xf32>
    %826 = vector.multi_reduction <maximumf>, %825, %cst_88 [1] : vector<2x9xf32> to vector<2xf32>
    %827 = vector.shape_cast %826 : vector<2xf32> to vector<2x1xf32>
    %828 = vector.broadcast %827 : vector<2x1xf32> to vector<2x9xf32>
    %829 = arith.subf %825, %828 : vector<2x9xf32>
    %830 = math.exp %829 : vector<2x9xf32>
    %cst_89 = arith.constant dense<0.000000e+00> : vector<2xf32>
    %831 = vector.multi_reduction <add>, %830, %cst_89 [1] : vector<2x9xf32> to vector<2xf32>
    %832 = vector.shape_cast %831 : vector<2xf32> to vector<2x1xf32>
    %833 = vector.broadcast %832 : vector<2x1xf32> to vector<2x9xf32>
    %834 = arith.divf %830, %833 : vector<2x9xf32>
    %c6 = arith.constant 6 : index
    %c0_90 = arith.constant 0 : index
    %835 = vector.load %arg13[%c6, %c0_90] : memref<8x128xf32, #tpu.memory_space<vmem>>, vector<2x1xf32>
    tpu.vector_store %arg13[%c6, %c0_90], %822 {strides = array<i32>} : memref<8x128xf32, #tpu.memory_space<vmem>>, vector<2x1xf32>,
    %c6_91 = arith.constant 6 : index
    %c1_92 = arith.constant 1 : index
    %836 = vector.load %arg13[%c6_91, %c1_92] : memref<8x128xf32, #tpu.memory_space<vmem>>, vector<2x9xf32>
    tpu.vector_store %arg13[%c6_91, %c1_92], %834 {strides = array<i32>} : memref<8x128xf32, #tpu.memory_space<vmem>>, vector<2x9xf32>,
    return
  }
  func.func @transform_0(%arg0: i32) -> (i32, i32) {
    %c0_i32 = arith.constant 0 : i32
    %c0_i32_0 = arith.constant 0 : i32
    return %arg0, %c0_i32 : i32, i32
  }
  func.func @transform_1(%arg0: i32) -> (i32, i32) {
    %c0_i32 = arith.constant 0 : i32
    %c0_i32_0 = arith.constant 0 : i32
    %c0_i32_1 = arith.constant 0 : i32
    return %c0_i32, %c0_i32_0 : i32, i32
  }
  func.func @transform_2(%arg0: i32) -> (i32, i32) {
    %c0_i32 = arith.constant 0 : i32
    %c0_i32_0 = arith.constant 0 : i32
    %c0_i32_1 = arith.constant 0 : i32
    return %c0_i32, %c0_i32_0 : i32, i32
  }
  func.func @transform_3(%arg0: i32) -> (i32, i32, i32) {
    %c0_i32 = arith.constant 0 : i32
    %c0_i32_0 = arith.constant 0 : i32
    %c0_i32_1 = arith.constant 0 : i32
    %c0_i32_2 = arith.constant 0 : i32
    return %c0_i32, %c0_i32_0, %c0_i32_1 : i32, i32, i32
  }
  func.func @transform_4(%arg0: i32) -> (i32, i32, i32) {
    %c0_i32 = arith.constant 0 : i32
    %c0_i32_0 = arith.constant 0 : i32
    %c0_i32_1 = arith.constant 0 : i32
    %c0_i32_2 = arith.constant 0 : i32
    return %c0_i32, %c0_i32_0, %c0_i32_1 : i32, i32, i32
  }
  func.func @transform_5(%arg0: i32) -> (i32, i32, i32) {
    %c0_i32 = arith.constant 0 : i32
    %c0_i32_0 = arith.constant 0 : i32
    %c0_i32_1 = arith.constant 0 : i32
    %c0_i32_2 = arith.constant 0 : i32
    return %c0_i32, %c0_i32_0, %c0_i32_1 : i32, i32, i32
  }
  func.func @transform_6(%arg0: i32) -> (i32, i32, i32) {
    %c0_i32 = arith.constant 0 : i32
    %c0_i32_0 = arith.constant 0 : i32
    %c0_i32_1 = arith.constant 0 : i32
    %c0_i32_2 = arith.constant 0 : i32
    return %c0_i32, %c0_i32_0, %c0_i32_1 : i32, i32, i32
  }
  func.func @transform_7(%arg0: i32) -> (i32, i32) {
    %c0_i32 = arith.constant 0 : i32
    %c0_i32_0 = arith.constant 0 : i32
    %c0_i32_1 = arith.constant 0 : i32
    return %c0_i32, %c0_i32_0 : i32, i32
  }
  func.func @transform_8(%arg0: i32) -> (i32, i32) {
    %c0_i32 = arith.constant 0 : i32
    %c0_i32_0 = arith.constant 0 : i32
    %c0_i32_1 = arith.constant 0 : i32
    return %c0_i32, %c0_i32_0 : i32, i32
  }
  func.func @transform_9(%arg0: i32) -> (i32, i32) {
    %c0_i32 = arith.constant 0 : i32
    %c0_i32_0 = arith.constant 0 : i32
    %c0_i32_1 = arith.constant 0 : i32
    return %c0_i32, %c0_i32_0 : i32, i32
  }
  func.func @transform_10(%arg0: i32) -> (i32, i32) {
    %c0_i32 = arith.constant 0 : i32
    %c0_i32_0 = arith.constant 0 : i32
    %c0_i32_1 = arith.constant 0 : i32
    return %c0_i32, %c0_i32_0 : i32, i32
  }
  func.func @transform_11(%arg0: i32) -> (i32, i32) {
    %c0_i32 = arith.constant 0 : i32
    %c0_i32_0 = arith.constant 0 : i32
    %c0_i32_1 = arith.constant 0 : i32
    return %c0_i32, %c0_i32_0 : i32, i32
  }
  func.func @transform_12(%arg0: i32) -> (i32, i32) {
    %c0_i32 = arith.constant 0 : i32
    %c0_i32_0 = arith.constant 0 : i32
    return %arg0, %c0_i32 : i32, i32
  }
}

</mosaic_0001>

<bundles_post_ra>
// kernel: agent_forward.1
= control target key start
LH: loop header
LB: loop body
LE: loop exit
PB: predicated region body
PF: predicated region fallthrough
CT: control target
= control target key end

     0   :  { %vm65_vm0 = vcmask 1043456   ;;  %v2492_v0 = vmov 0.0|0.0   ;;  %vm2493_vm1 = vmmov 1   ;;  %vm2494_vm3 = vmmov 0   ;;  %s2508_s18 = smov 1   ;;  %s3562_s1 = inlined_call_operand.vmem [shape: f32[12,128], index: 1, kind: input, shape index: {}]   ;;  %s3563_s3 = inlined_call_operand.vmem [shape: f32[3,128,128], index: 3, kind: input, shape index: {}]   ;;  %s3564_s0 = inlined_call_operand.vmem [shape: f32[18,12], index: 0, kind: input, shape index: {}]   ;;  %s3565_s5 = inlined_call_operand.vmem [shape: f32[3,128,128], index: 5, kind: input, shape index: {}]   ;;  %s3566_s2 = inlined_call_operand.vmem [shape: f32[1,128], index: 2, kind: input, shape index: {}]   ;;  %s3567_s4 = inlined_call_operand.vmem [shape: f32[3,1,128], index: 4, kind: input, shape index: {}]   ;;  %s3568_s6 = inlined_call_operand.vmem [shape: f32[3,1,128], index: 6, kind: input, shape index: {}]   ;;  %s3569_s7 = inlined_call_operand.vmem [shape: f32[128,12], index: 7, kind: input, shape index: {}]   ;;  %s3570_s8 = inlined_call_operand.vmem [shape: f32[1,12], index: 8, kind: input, shape index: {}]   ;;  %s3571_s10 = inlined_call_operand.<no memory space> [shape: f32[1,1], index: 10, kind: input, shape index: {}]   ;;  %s3572_s11 = inlined_call_operand.vmem [shape: f32[1,9], index: 11, kind: input, shape index: {}]   ;;  %s3573_s12 = inlined_call_operand.vmem [shape: f32[8,128], index: 12, kind: output, shape index: {}]   ;;  %s3574_s9 = inlined_call_operand.vmem [shape: f32[27,10], index: 9, kind: input, shape index: {}]  }
   0x1   :  { %2226 = vmatprep.subr.bf16.mxu0 %v2492_v0  ;;  %v46_v1 = vld [vmem:[%s3562_s1] sm:$0xff]  ;;  %v47_v2 = vld [vmem:[%s3562_s1 + $0x8] sm:$0xf]  ;;  %vm2228_vm2 = vmpackc.low %vm65_vm0, %vm2493_vm1  ;;  %2230 = vmatprep.subr.bf16.mxu1 %v2492_v0  ;;  %v2495_v4 = vmov 0.0   ;;  %vm55_vm4 = vcmask 97280   ;;  %vm1207_vm5 = vcmask 1024  }
   0x2   :  { %v2227_v3 = vpack.c.bf16 %v47_v2, %v46_v1  ;;  %1930 = vmatprep.mubr.msk.f32.mxu0 %vm2494_vm3, %v2495_v4  ;;  %1971 = vmatprep.mubr.msk.f32.mxu1 %vm2494_vm3, %v2495_v4  ;;  %v152_v5 = vld [vmem:[%s3563_s3] sm:$0xff]  ;;  %v153_v6 = vld [vmem:[%s3563_s3 + $0x8] sm:$0xff]  ;;  %v154_v7 = vld [vmem:[%s3563_s3 + $0x10] sm:$0xff]  ;;  %917 = vst [vmem:[%s3573_s12] sm:$0xff] %v2495_v4  ;;  %vm1190_vm6 = vcmask 74760   ;;  %vm1201_vm7 = vcmask 66560  }
   0x3   :  { %v43_v8 = vld [vmem:[%s3564_s0] sm:$0xff]  ;;  %v2231_v9 = vpack.c.bf16 %v153_v6, %v152_v5  ;;  %v155_v10 = vld [vmem:[%s3563_s3 + $0x18] sm:$0xff]  ;;  %v157_v13 = vld [vmem:[%s3563_s3 + $0x28] sm:$0xff] }
   0x4   :  { %2229 = vmatpush3.bf16.msk.msra.mxu0 %vm2228_vm2, %v2227_v3  ;;  %v2234_v11 = vpack.c.bf16 %v155_v10, %v154_v7  ;;  %v156_v12 = vld [vmem:[%s3563_s3 + $0x20] sm:$0xff]  ;;  %v44_v14 = vld [vmem:[%s3564_s0 + $0x8] sm:$0xff]  ;;  %v158_v16 = vld [vmem:[%s3563_s3 + $0x30] sm:$0xff] }
   0x5   :  { %2254 = vmatprep.subr.bf16.mxu0 %v2492_v0  ;;  %2232 = vmatpush3.bf16.msra.mxu1 %v2231_v9  ;;  %v2237_v15 = vpack.c.bf16 %v157_v13, %v156_v12  ;;  %v159_v17 = vld [vmem:[%s3563_s3 + $0x38] sm:$0xff]  ;;  %v45_v18 = vld [vmem:[%s3564_s0 + $0x10] sm:$0x3]  ;;  %v160_v20 = vld [vmem:[%s3563_s3 + $0x40] sm:$0xff]  ;;  %s2509_s0 = smov 127  }
   0x6   :  { %2233 = vmatprep.subr.bf16.mxu1 %v2492_v0  ;;  %v2240_v19 = vpack.c.bf16 %v159_v17, %v158_v16  ;;  %v161_v21 = vld [vmem:[%s3563_s3 + $0x48] sm:$0xff]  ;;  %v162_v23 = vld [vmem:[%s3563_s3 + $0x50] sm:$0xff]  ;;  %v163_v24 = vld [vmem:[%s3563_s3 + $0x58] sm:$0xff] }
   0x7   :  { %1931 = vmatmul.mubr.msk.f32.vlgmr.msra.gmra.mrb[0].mxu0 %vm55_vm4, %v43_v8  ;;  %v2243_v22 = vpack.c.bf16 %v161_v21, %v160_v20  ;;  %v2246_v25 = vpack.c.bf16 %v163_v24, %v162_v23  ;;  %v164_v26 = vld [vmem:[%s3563_s3 + $0x60] sm:$0xff]  ;;  %v165_v27 = vld [vmem:[%s3563_s3 + $0x68] sm:$0xff]  ;;  %v166_v29 = vld [vmem:[%s3563_s3 + $0x70] sm:$0xff] }
   0x8   :  { %1933 = vmatprep.mubr.msk.f32.mxu0 %vm2494_vm3, %v2495_v4  ;;  %v2249_v28 = vpack.c.bf16 %v165_v27, %v164_v26  ;;  %v167_v30 = vld [vmem:[%s3563_s3 + $0x78] sm:$0xff]  ;;  %v258_v32 = vld [vmem:[%s3565_s5] sm:$0xff]  ;;  %v259_v33 = vld [vmem:[%s3565_s5 + $0x8] sm:$0xff] }
   0x9   :  { %2235 = vmatpush3.bf16.msra.mxu1 %v2234_v11  ;;  %v2252_v31 = vpack.c.bf16 %v167_v30, %v166_v29  ;;  %v260_v34 = vld [vmem:[%s3565_s5 + $0x10] sm:$0xff]  ;;  %v2255_v35 = vpack.c.bf16 %v259_v33, %v258_v32  ;;  %v261_v36 = vld [vmem:[%s3565_s5 + $0x18] sm:$0xff]  ;;  %v262_v38 = vld [vmem:[%s3565_s5 + $0x20] sm:$0xff] }
   0xa   :  { %2236 = vmatprep.subr.bf16.mxu1 %v2492_v0  ;;  %v2258_v37 = vpack.c.bf16 %v261_v36, %v260_v34  ;;  %v263_v39 = vld [vmem:[%s3565_s5 + $0x28] sm:$0xff]  ;;  %v264_v41 = vld [vmem:[%s3565_s5 + $0x30] sm:$0xff]  ;;  %v265_v42 = vld [vmem:[%s3565_s5 + $0x38] sm:$0xff] }
   0xb   :  { %1934 = vmatmul.mubr.msk.f32.gmra.mrb[2].mxu0 %vm55_vm4, %v44_v14  ;;  %v2261_v40 = vpack.c.bf16 %v263_v39, %v262_v38  ;;  %v2264_v43 = vpack.c.bf16 %v265_v42, %v264_v41  ;;  %v266_v44 = vld [vmem:[%s3565_s5 + $0x40] sm:$0xff]  ;;  %v267_v45 = vld [vmem:[%s3565_s5 + $0x48] sm:$0xff]  ;;  %v268_v47 = vld [vmem:[%s3565_s5 + $0x50] sm:$0xff] }
   0xc   :  { %1936 = vmatprep.mubr.msk.f32.mxu0 %vm2494_vm3, %v2495_v4  ;;  %2256 = vmatpush3.bf16.msra.mxu0 %v2255_v35  ;;  %v2267_v46 = vpack.c.bf16 %v267_v45, %v266_v44  ;;  %v269_v48 = vld [vmem:[%s3565_s5 + $0x58] sm:$0xff]  ;;  %v270_v50 = vld [vmem:[%s3565_s5 + $0x60] sm:$0xff]  ;;  %v271_v51 = vld [vmem:[%s3565_s5 + $0x68] sm:$0xff] }
   0xd   :  { %2238 = vmatpush3.bf16.msra.mxu1 %v2237_v15  ;;  %2257 = vmatprep.subr.bf16.mxu0 %v2492_v0  ;;  %v2270_v49 = vpack.c.bf16 %v269_v48, %v268_v47  ;;  %v2273_v52 = vpack.c.bf16 %v271_v51, %v270_v50  ;;  %v1706_v53 = vld [vmem:[%s3566_s2] ss:$0 sm:$0xff]  ;;  %v272_v3 = vld [vmem:[%s3565_s5 + $0x70] sm:$0xff]  ;;  %v273_v5 = vld [vmem:[%s3565_s5 + $0x78] sm:$0xff] }
   0xe   :  { %2239 = vmatprep.subr.bf16.mxu1 %v2492_v0  ;;  %v2276_v6 = vpack.c.bf16 %v273_v5, %v272_v3  ;;  %v1713_v7 = vld [vmem:[%s3563_s3 + $0x80] sm:$0xff]  ;;  %v1714_v8 = vld [vmem:[%s3563_s3 + $0x88] sm:$0xff]  ;;  %v1715_v9 = vld [vmem:[%s3563_s3 + $0x90] sm:$0xff] }
   0xf   :  { %1937 = vmatmul.mubr.msk.f32.gmra.mrb[4].mxu0 %vm55_vm4, %v45_v18  ;;  %v2279_v10 = vpack.c.bf16 %v1714_v8, %v1713_v7  ;;  %v1716_v11 = vld [vmem:[%s3563_s3 + $0x98] sm:$0xff]  ;;  %v1717_v13 = vld [vmem:[%s3563_s3 + $0xa0] sm:$0xff]  ;;  %v1718_v14 = vld [vmem:[%s3563_s3 + $0xa8] sm:$0xff] }
  0x10   :  { %2012 = vmatprep.mubr.msk.f32.mxu0 %vm2494_vm3, %v2495_v4  ;;  %2259 = vmatpush3.bf16.msra.mxu0 %v2258_v37  ;;  %v2282_v12 = vpack.c.bf16 %v1716_v11, %v1715_v9  ;;  %v2285_v15 = vpack.c.bf16 %v1718_v14, %v1717_v13  ;;  %v1719_v16 = vld [vmem:[%s3563_s3 + $0xb0] sm:$0xff]  ;;  %v1720_v17 = vld [vmem:[%s3563_s3 + $0xb8] sm:$0xff]  ;;  %v1722_v20 = vld [vmem:[%s3563_s3 + $0xc8] sm:$0xff] }
  0x11   :  { %2241 = vmatpush3.bf16.msra.mxu1 %v2240_v19  ;;  %2260 = vmatprep.subr.bf16.mxu0 %v2492_v0  ;;  %v2288_v18 = vpack.c.bf16 %v1720_v17, %v1719_v16  ;;  %v1721_v19 = vld [vmem:[%s3563_s3 + $0xc0] sm:$0xff]  ;;  %v1724_v23 = vld [vmem:[%s3563_s3 + $0xd8] sm:$0xff]  ;;  %v1726_v39 = vld [vmem:[%s3563_s3 + $0xe8] sm:$0xff] }
  0x12   :  { %2242 = vmatprep.subr.bf16.mxu1 %v2492_v0  ;;  %v2291_v21 = vpack.c.bf16 %v1722_v20, %v1721_v19  ;;  %v1725_v38 = vld [vmem:[%s3563_s3 + $0xe0] sm:$0xff]  ;;  %v1727_v41 = vld [vmem:[%s3563_s3 + $0xf0] sm:$0xff]  ;;  %v1728_v42 = vld [vmem:[%s3563_s3 + $0xf8] sm:$0xff] }
  0x13   :  { %v1731_v44 = vld [vmem:[%s3565_s5 + $0x80] sm:$0xff]  ;;  %v1732_v45 = vld [vmem:[%s3565_s5 + $0x88] sm:$0xff]  ;;  %v1734_v48 = vld [vmem:[%s3565_s5 + $0x98] sm:$0xff] }
  0x14   :  { %2262 = vmatpush3.bf16.msra.mxu0 %v2261_v40  ;;  %v2297_v40 = vpack.c.bf16 %v1726_v39, %v1725_v38  ;;  %v2303_v47 = vpack.c.bf16 %v1732_v45, %v1731_v44  ;;  %v1735_v50 = vld [vmem:[%s3565_s5 + $0xa0] sm:$0xff]  ;;  %v1736_v51 = vld [vmem:[%s3565_s5 + $0xa8] sm:$0xff]  ;;  %v1742_v3 = vld [vmem:[%s3565_s5 + $0xd8] sm:$0xff] }
  0x15   :  { %2244 = vmatpush3.bf16.msra.mxu1 %v2243_v22  ;;  %2263 = vmatprep.subr.bf16.mxu0 %v2492_v0  ;;  %v1723_v22 = vld [vmem:[%s3563_s3 + $0xd0] sm:$0xff]  ;;  %v1744_v7 = vld [vmem:[%s3565_s5 + $0xe8] sm:$0xff]  ;;  %v1712_v9 = vld [vmem:[%s3568_s6] ss:$0 sm:$0xff] }
  0x16   :  { %2245 = vmatprep.subr.bf16.mxu1 %v2492_v0  ;;  %v2294_v24 = vpack.c.bf16 %v1724_v23, %v1723_v22  ;;  %v1749_v22 = vld [vmem:[%s3563_s3 + $0x100] sm:$0xff]  ;;  %v1750_v23 = vld [vmem:[%s3563_s3 + $0x108] sm:$0xff]  ;;  %v1760_v38 = vld [vmem:[%s3563_s3 + $0x158] sm:$0xff] }
  0x18   :  { %2265 = vmatpush3.bf16.msra.mxu0 %v2264_v43  ;;  %v2300_v43 = vpack.c.bf16 %v1728_v42, %v1727_v41 }
  0x19   :  { %2247 = vmatpush3.bf16.msra.mxu1 %v2246_v25  ;;  %2266 = vmatprep.subr.bf16.mxu0 %v2492_v0  ;;  %v1711_v25 = vld [vmem:[%s3567_s4] ss:$0 sm:$0xff] }
  0x1a   :  { %2248 = vmatprep.subr.bf16.mxu1 %v2492_v0 }
  0x1c   :  { %2268 = vmatpush3.bf16.msra.mxu0 %v2267_v46  ;;  %v1733_v46 = vld [vmem:[%s3565_s5 + $0x90] sm:$0xff] }
  0x1d   :  { %2250 = vmatpush3.bf16.msra.mxu1 %v2249_v28  ;;  %2269 = vmatprep.subr.bf16.mxu0 %v2492_v0 }
  0x1e   :  { %2251 = vmatprep.subr.bf16.mxu1 %v2492_v0 }
  0x20   :  { %2271 = vmatpush3.bf16.msra.mxu0 %v2270_v49  ;;  %v2306_v49 = vpack.c.bf16 %v1734_v48, %v1733_v46 }
  0x21   :  { %2253 = vmatpush3.bf16.msra.mxu1 %v2252_v31  ;;  %2272 = vmatprep.subr.bf16.mxu0 %v2492_v0 }
  0x22   :  { %2278 = vmatprep.subr.bf16.mxu1 %v2492_v0 }
  0x24   :  { %2274 = vmatpush3.bf16.msra.mxu0 %v2273_v52  ;;  %v2309_v52 = vpack.c.bf16 %v1736_v51, %v1735_v50 }
  0x25   :  { %2275 = vmatprep.subr.bf16.mxu0 %v2492_v0 }
  0x28   :  { %2277 = vmatpush3.bf16.msra.mxu0 %v2276_v6  ;;  %v1743_v6 = vld [vmem:[%s3565_s5 + $0xe0] sm:$0xff] }
  0x29   :  { %2302 = vmatprep.subr.bf16.mxu0 %v2492_v0  ;;  %v2321_v8 = vpack.c.bf16 %v1744_v7, %v1743_v6  ;;  %v1770_v7 = vld [vmem:[%s3565_s5 + $0x118] sm:$0xff] }
  0xda   :  { %v135_v54 = vpop.f32.mrb[0].mxu0 }
  0xdb   :  { %v2714_v55 = vadd.f32 %v1706_v53, %v135_v54  ;;  %v1932_v56 = vpop.f32.mrb[1].mxu0  ;;  %v1738_v54 = vld [vmem:[%s3565_s5 + $0xb8] sm:$0xff] }
  0xdd   :  { %v149_v57 = vmax.f32 %v2714_v55, 0.0 }
  0xde   :  { %v140_v58 = vpop.f32.mrb[2].mxu0 }
  0xdf   :  { %v2717_v59 = vadd.f32 %v1706_v53, %v140_v58  ;;  %1972 = vmatmul.mubr.f32.vlgmr.msra.gmra.mrb[0].mxu1 %v149_v57  ;;  %v1935_v60 = vpop.f32.mrb[3].mxu0  ;;  %v1739_v58 = vld [vmem:[%s3565_s5 + $0xc0] sm:$0xff] }
  0xe0   :  { %1974 = vmatprep.mubr.msk.f32.mxu1 %vm2494_vm3, %v2495_v4  ;;  %2280 = vmatpush3.bf16.msra.mxu1 %v2279_v10  ;;  %v1740_v60 = vld [vmem:[%s3565_s5 + $0xc8] sm:$0xff] }
  0xe1   :  { %v150_v61 = vmax.f32 %v2717_v59, 0.0  ;;  %2281 = vmatprep.subr.bf16.mxu1 %v2492_v0 }
  0xe2   :  { %v145_v62 = vpop.f32.mrb[4].mxu0 }
  0xe3   :  { %v2724_v63 = vadd.f32 %v1706_v53, %v145_v62  ;;  %1975 = vmatmul.mubr.f32.gmra.mrb[2].mxu1 %v150_v61  ;;  %v1938_v1 = vpop.f32.mrb[5].mxu0  ;;  %v1737_v53 = vld [vmem:[%s3565_s5 + $0xb0] sm:$0xff]  ;;  %v2315_v62 = vpack.c.bf16 %v1740_v60, %v1739_v58  ;;  %v1764_v60 = vld [vmem:[%s3563_s3 + $0x178] sm:$0xff] }
  0xe4   :  { %1977 = vmatprep.mubr.msk.f32.mxu1 %vm2494_vm3, %v2495_v4  ;;  %2283 = vmatpush3.bf16.msra.mxu1 %v2282_v12  ;;  %v2312_v56 = vpack.c.bf16 %v1738_v54, %v1737_v53  ;;  %v1741_v1 = vld [vmem:[%s3565_s5 + $0xd0] sm:$0xff]  ;;  %v1761_v53 = vld [vmem:[%s3563_s3 + $0x160] sm:$0xff]  ;;  %v1762_v54 = vld [vmem:[%s3563_s3 + $0x168] sm:$0xff] }
  0xe5   :  { %v151_v2 = vmax.f32 %v2724_v63, 0.0  ;;  %2284 = vmatprep.subr.bf16.mxu1 %v2492_v0  ;;  %v2318_v5 = vpack.c.bf16 %v1742_v3, %v1741_v1  ;;  %v1746_v63 = vld [vmem:[%s3565_s5 + $0xf8] sm:$0xff]  ;;  %v1763_v58 = vld [vmem:[%s3563_s3 + $0x170] sm:$0xff]  ;;  %v1767_v1 = vld [vmem:[%s3565_s5 + $0x100] sm:$0xff] }
  0xe6   :  { %v1768_v3 = vld [vmem:[%s3565_s5 + $0x108] sm:$0xff] }
  0xe7   :  { %1978 = vmatmul.mubr.f32.gmra.mrb[4].mxu1 %v151_v2  ;;  %v2351_v6 = vpack.c.bf16 %v1768_v3, %v1767_v1 }
  0xe8   :  { %2053 = vmatprep.mubr.msk.f32.mxu1 %vm2494_vm3, %v2495_v4  ;;  %2286 = vmatpush3.bf16.msra.mxu1 %v2285_v15 }
  0xe9   :  { %2287 = vmatprep.subr.bf16.mxu1 %v2492_v0 }
  0xec   :  { %2289 = vmatpush3.bf16.msra.mxu1 %v2288_v18 }
  0xed   :  { %2290 = vmatprep.subr.bf16.mxu1 %v2492_v0 }
  0xf0   :  { %2292 = vmatpush3.bf16.msra.mxu1 %v2291_v21 }
  0xf1   :  { %2293 = vmatprep.subr.bf16.mxu1 %v2492_v0 }
  0xf4   :  { %2295 = vmatpush3.bf16.msra.mxu1 %v2294_v24  ;;  %v1751_v24 = vld [vmem:[%s3563_s3 + $0x110] sm:$0xff] }
  0xf5   :  { %2296 = vmatprep.subr.bf16.mxu1 %v2492_v0 }
  0xf8   :  { %2298 = vmatpush3.bf16.msra.mxu1 %v2297_v40  ;;  %v1730_v40 = vld [vmem:[%s3567_s4 + $0x1] ss:$0 sm:$0xff] }
  0xf9   :  { %2299 = vmatprep.subr.bf16.mxu1 %v2492_v0 }
  0xfc   :  { %2301 = vmatpush3.bf16.msra.mxu1 %v2300_v43 }
  0xfd   :  { %2326 = vmatprep.subr.bf16.mxu1 %v2492_v0 }
 0x1b2   :  { %v241_v26 = vpop.f32.mrb[0].mxu1 }
 0x1b3   :  { %v242_v27 = vadd.f32 %v1711_v25, %v241_v26  ;;  %v1973_v28 = vpop.f32.mrb[1].mxu1  ;;  %v1752_v26 = vld [vmem:[%s3563_s3 + $0x118] sm:$0xff] }
 0x1b4   :  { %v1753_v28 = vld [vmem:[%s3563_s3 + $0x120] sm:$0xff] }
 0x1b5   :  { %v255_v29 = vmax.f32 %v242_v27, 0.0  ;;  %v2330_v27 = vpack.c.bf16 %v1752_v26, %v1751_v24  ;;  %v1748_v24 = vld [vmem:[%s3568_s6 + $0x1] ss:$0 sm:$0xff] }
 0x1b6   :  { %v246_v30 = vpop.f32.mrb[2].mxu1 }
 0x1b7   :  { %v247_v31 = vadd.f32 %v1711_v25, %v246_v30  ;;  %2013 = vmatmul.mubr.f32.vlgmr.msra.gmra.mrb[6].mxu0 %v255_v29  ;;  %v1976_v32 = vpop.f32.mrb[3].mxu1  ;;  %v1754_v29 = vld [vmem:[%s3563_s3 + $0x128] sm:$0xff] }
 0x1b8   :  { %2015 = vmatprep.mubr.msk.f32.mxu0 %vm2494_vm3, %v2495_v4  ;;  %2304 = vmatpush3.bf16.msra.mxu0 %v2303_v47  ;;  %v2333_v30 = vpack.c.bf16 %v1754_v29, %v1753_v28  ;;  %v1756_v32 = vld [vmem:[%s3563_s3 + $0x138] sm:$0xff] }
 0x1b9   :  { %v256_v33 = vmax.f32 %v247_v31, 0.0  ;;  %2305 = vmatprep.subr.bf16.mxu0 %v2492_v0  ;;  %v1755_v31 = vld [vmem:[%s3563_s3 + $0x130] sm:$0xff] }
 0x1ba   :  { %v251_v34 = vpop.f32.mrb[4].mxu1 }
 0x1bb   :  { %v252_v35 = vadd.f32 %v1711_v25, %v251_v34  ;;  %2016 = vmatmul.mubr.f32.gmra.mrb[8].mxu0 %v256_v33  ;;  %v1979_v36 = vpop.f32.mrb[5].mxu1  ;;  %v2327_v25 = vpack.c.bf16 %v1750_v23, %v1749_v22  ;;  %v2336_v33 = vpack.c.bf16 %v1756_v32, %v1755_v31  ;;  %v1757_v34 = vld [vmem:[%s3563_s3 + $0x140] sm:$0xff]  ;;  %v1780_v22 = vld [vmem:[%s3565_s5 + $0x168] sm:$0xff] }
 0x1bc   :  { %2018 = vmatprep.mubr.msk.f32.mxu0 %vm2494_vm3, %v2495_v4  ;;  %2307 = vmatpush3.bf16.msra.mxu0 %v2306_v49 }
 0x1bd   :  { %v257_v37 = vmax.f32 %v252_v35, 0.0  ;;  %2308 = vmatprep.subr.bf16.mxu0 %v2492_v0  ;;  %v1758_v35 = vld [vmem:[%s3563_s3 + $0x148] sm:$0xff] }
 0x1be   :  { %v2339_v36 = vpack.c.bf16 %v1758_v35, %v1757_v34 }
 0x1bf   :  { %2019 = vmatmul.mubr.f32.gmra.mrb[10].mxu0 %v257_v37  ;;  %v1759_v37 = vld [vmem:[%s3563_s3 + $0x150] sm:$0xff] }
 0x1c0   :  { %2094 = vmatprep.mubr.msk.f32.mxu0 %vm2494_vm3, %v2495_v4  ;;  %2310 = vmatpush3.bf16.msra.mxu0 %v2309_v52  ;;  %v2342_v39 = vpack.c.bf16 %v1760_v38, %v1759_v37  ;;  %v805_v37 = vld [vmem:[%s3569_s7] sm:$0xff]  ;;  %v806_v38 = vld [vmem:[%s3569_s7 + $0x8] sm:$0xff] }
 0x1c1   :  { %2311 = vmatprep.subr.bf16.mxu0 %v2492_v0 }
 0x1c4   :  { %2313 = vmatpush3.bf16.msra.mxu0 %v2312_v56  ;;  %v2345_v56 = vpack.c.bf16 %v1762_v54, %v1761_v53  ;;  %v816_v53 = vld [vmem:[%s3569_s7 + $0x58] sm:$0xff] }
 0x1c5   :  { %2314 = vmatprep.subr.bf16.mxu0 %v2492_v0 }
 0x1c8   :  { %2316 = vmatpush3.bf16.msra.mxu0 %v2315_v62  ;;  %v2348_v62 = vpack.c.bf16 %v1764_v60, %v1763_v58 }
 0x1c9   :  { %2317 = vmatprep.subr.bf16.mxu0 %v2492_v0 }
 0x1cc   :  { %2319 = vmatpush3.bf16.msra.mxu0 %v2318_v5  ;;  %v1769_v5 = vld [vmem:[%s3565_s5 + $0x110] sm:$0xff] }
 0x1cd   :  { %2320 = vmatprep.subr.bf16.mxu0 %v2492_v0 }
 0x1d0   :  { %2322 = vmatpush3.bf16.msra.mxu0 %v2321_v8  ;;  %v2354_v8 = vpack.c.bf16 %v1770_v7, %v1769_v5 }
 0x1d1   :  { %2323 = vmatprep.subr.bf16.mxu0 %v2492_v0 }
 0x28a   :  { %v347_v10 = vpop.f32.mrb[6].mxu0 }
 0x28b   :  { %v348_v11 = vadd.f32 %v1712_v9, %v347_v10  ;;  %v2014_v12 = vpop.f32.mrb[7].mxu0  ;;  %v1772_v10 = vld [vmem:[%s3565_s5 + $0x128] sm:$0xff] }
 0x28c   :  { %v1773_v12 = vld [vmem:[%s3565_s5 + $0x130] sm:$0xff] }
 0x28d   :  { %v2861_v13 = vadd.f32 %v348_v11, %v149_v57 }
 0x28e   :  { %v352_v14 = vpop.f32.mrb[8].mxu0 }
 0x28f   :  { %v364_v15 = vmax.f32 %v2861_v13, 0.0  ;;  %v353_v16 = vadd.f32 %v1712_v9, %v352_v14  ;;  %v2017_v17 = vpop.f32.mrb[9].mxu0  ;;  %v1774_v14 = vld [vmem:[%s3565_s5 + $0x138] sm:$0xff] }
 0x290   :  { %v1775_v17 = vld [vmem:[%s3565_s5 + $0x140] sm:$0xff] }
 0x291   :  { %v2866_v18 = vadd.f32 %v353_v16, %v150_v61  ;;  %2054 = vmatmul.mubr.f32.vlgmr.msra.gmra.mrb[6].mxu1 %v364_v15  ;;  %v1745_v61 = vld [vmem:[%s3565_s5 + $0xf0] sm:$0xff]  ;;  %v2360_v16 = vpack.c.bf16 %v1774_v14, %v1773_v12  ;;  %v817_v12 = vld [vmem:[%s3569_s7 + $0x60] sm:$0xff]  ;;  %v818_v14 = vld [vmem:[%s3569_s7 + $0x68] sm:$0xff] }
 0x292   :  { %v357_v19 = vpop.f32.mrb[10].mxu0  ;;  %2056 = vmatprep.mubr.msk.f32.mxu1 %vm2494_vm3, %v2495_v4  ;;  %2328 = vmatpush3.bf16.msra.mxu1 %v2327_v25 }
 0x293   :  { %v365_v55 = vmax.f32 %v2866_v18, 0.0  ;;  %v358_v57 = vadd.f32 %v1712_v9, %v357_v19  ;;  %v2020_v20 = vpop.f32.mrb[11].mxu0  ;;  %2329 = vmatprep.subr.bf16.mxu1 %v2492_v0  ;;  %v1771_v9 = vld [vmem:[%s3565_s5 + $0x120] sm:$0xff]  ;;  %v1776_v19 = vld [vmem:[%s3565_s5 + $0x148] sm:$0xff] }
 0x294   :  { %v2357_v11 = vpack.c.bf16 %v1772_v10, %v1771_v9  ;;  %v1777_v20 = vld [vmem:[%s3565_s5 + $0x150] sm:$0xff] }
 0x295   :  { %v2875_v21 = vadd.f32 %v358_v57, %v151_v2  ;;  %2057 = vmatmul.mubr.f32.gmra.mrb[8].mxu1 %v365_v55  ;;  %v2324_v2 = vpack.c.bf16 %v1746_v63, %v1745_v61  ;;  %v2363_v57 = vpack.c.bf16 %v1776_v19, %v1775_v17  ;;  %v1778_v61 = vld [vmem:[%s3565_s5 + $0x158] sm:$0xff]  ;;  %v819_v17 = vld [vmem:[%s3569_s7 + $0x70] sm:$0xff] }
 0x296   :  { %2059 = vmatprep.mubr.msk.f32.mxu1 %vm2494_vm3, %v2495_v4  ;;  %2331 = vmatpush3.bf16.msra.mxu1 %v2330_v27  ;;  %v2366_v63 = vpack.c.bf16 %v1778_v61, %v1777_v20  ;;  %v820_v19 = vld [vmem:[%s3569_s7 + $0x78] sm:$0xff]  ;;  %v1784_v20 = vld [vmem:[%s3568_s6 + $0x2] ss:$0 sm:$0xff] }
 0x297   :  { %v366_v59 = vmax.f32 %v2875_v21, 0.0  ;;  %2325 = vmatpush3.bf16.msra.mxu0 %v2324_v2  ;;  %2332 = vmatprep.subr.bf16.mxu1 %v2492_v0  ;;  %v1779_v2 = vld [vmem:[%s3565_s5 + $0x160] sm:$0xff]  ;;  %v1782_v21 = vld [vmem:[%s3565_s5 + $0x178] sm:$0xff] }
 0x298   :  { %2350 = vmatprep.subr.bf16.mxu0 %v2492_v0  ;;  %v2369_v23 = vpack.c.bf16 %v1780_v22, %v1779_v2 }
 0x299   :  { %2060 = vmatmul.mubr.f32.gmra.mrb[10].mxu1 %v366_v59 }
 0x29a   :  { %2135 = vmatprep.mubr.msk.f32.mxu1 %vm2494_vm3, %v2495_v4  ;;  %2334 = vmatpush3.bf16.msra.mxu1 %v2333_v30 }
 0x29b   :  { %2335 = vmatprep.subr.bf16.mxu1 %v2492_v0 }
 0x29e   :  { %2337 = vmatpush3.bf16.msra.mxu1 %v2336_v33 }
 0x29f   :  { %2338 = vmatprep.subr.bf16.mxu1 %v2492_v0 }
 0x2a2   :  { %2340 = vmatpush3.bf16.msra.mxu1 %v2339_v36 }
 0x2a3   :  { %2341 = vmatprep.subr.bf16.mxu1 %v2492_v0 }
 0x2a6   :  { %2343 = vmatpush3.bf16.msra.mxu1 %v2342_v39  ;;  %v2375_v39 = vpack.c.bf16 %v806_v38, %v805_v37  ;;  %v2498_v38 = vmov 4  }
 0x2a7   :  { %2344 = vmatprep.subr.bf16.mxu1 %v2492_v0 }
 0x2aa   :  { %2346 = vmatpush3.bf16.msra.mxu1 %v2345_v56  ;;  %v1766_v56 = vld [vmem:[%s3567_s4 + $0x2] ss:$0 sm:$0xff] }
 0x2ab   :  { %2347 = vmatprep.subr.bf16.mxu1 %v2492_v0 }
 0x2ae   :  { %2349 = vmatpush3.bf16.msra.mxu1 %v2348_v62 }
 0x2af   :  { %2398 = vmatprep.subr.bf16.mxu1 %v2492_v0 }
 0x364   :  { %v458_v41 = vpop.f32.mrb[6].mxu1 }
 0x365   :  { %v459_v42 = vadd.f32 %v1730_v40, %v458_v41  ;;  %v2055_v43 = vpop.f32.mrb[7].mxu1  ;;  %v808_v41 = vld [vmem:[%s3569_s7 + $0x18] sm:$0xff] }
 0x366   :  { %v809_v43 = vld [vmem:[%s3569_s7 + $0x20] sm:$0xff] }
 0x367   :  { %v472_v44 = vmax.f32 %v459_v42, 0.0 }
 0x368   :  { %v463_v45 = vpop.f32.mrb[8].mxu1 }
 0x369   :  { %v464_v46 = vadd.f32 %v1730_v40, %v463_v45  ;;  %v2058_v47 = vpop.f32.mrb[9].mxu1  ;;  %2095 = vmatmul.mubr.f32.vlgmr.msra.gmra.mrb[12].mxu0 %v472_v44  ;;  %v810_v44 = vld [vmem:[%s3569_s7 + $0x28] sm:$0xff] }
 0x36a   :  { %2097 = vmatprep.mubr.msk.f32.mxu0 %vm2494_vm3, %v2495_v4  ;;  %2352 = vmatpush3.bf16.msra.mxu0 %v2351_v6  ;;  %v2381_v45 = vpack.c.bf16 %v810_v44, %v809_v43  ;;  %v812_v47 = vld [vmem:[%s3569_s7 + $0x38] sm:$0xff]  ;;  %v2503_v43 = vmov 7  }
 0x36b   :  { %v473_v48 = vmax.f32 %v464_v46, 0.0  ;;  %2353 = vmatprep.subr.bf16.mxu0 %v2492_v0  ;;  %v811_v46 = vld [vmem:[%s3569_s7 + $0x30] sm:$0xff] }
 0x36c   :  { %v468_v49 = vpop.f32.mrb[10].mxu1 }
 0x36d   :  { %v469_v50 = vadd.f32 %v1730_v40, %v468_v49  ;;  %v2061_v51 = vpop.f32.mrb[11].mxu1  ;;  %2098 = vmatmul.mubr.f32.gmra.mrb[14].mxu0 %v473_v48  ;;  %v807_v40 = vld [vmem:[%s3569_s7 + $0x10] sm:$0xff]  ;;  %v2384_v48 = vpack.c.bf16 %v812_v47, %v811_v46  ;;  %v813_v49 = vld [vmem:[%s3569_s7 + $0x40] sm:$0xff]  ;;  %v2505_v46 = vmov 5  }
 0x36e   :  { %2100 = vmatprep.mubr.msk.f32.mxu0 %vm2494_vm3, %v2495_v4  ;;  %2355 = vmatpush3.bf16.msra.mxu0 %v2354_v8  ;;  %v2378_v42 = vpack.c.bf16 %v808_v41, %v807_v40  ;;  %v2500_v40 = vmov 6   ;;  %v2501_v41 = vmov 3  }
 0x36f   :  { %v474_v52 = vmax.f32 %v469_v50, 0.0  ;;  %2356 = vmatprep.subr.bf16.mxu0 %v2492_v0  ;;  %v814_v50 = vld [vmem:[%s3569_s7 + $0x48] sm:$0xff] }
 0x370   :  { %v2387_v51 = vpack.c.bf16 %v814_v50, %v813_v49  ;;  %v2507_v49 = vmov 11  }
 0x371   :  { %2101 = vmatmul.mubr.f32.gmra.mrb[16].mxu0 %v474_v52  ;;  %v815_v52 = vld [vmem:[%s3569_s7 + $0x50] sm:$0xff] }
 0x372   :  { %2176 = vmatprep.mubr.msk.f32.mxu0 %vm2494_vm3, %v2495_v4  ;;  %2358 = vmatpush3.bf16.msra.mxu0 %v2357_v11  ;;  %v2390_v54 = vpack.c.bf16 %v816_v53, %v815_v52  ;;  %v17_v52 = vstv %s3571_s10  ;;  %v1787_v53 = vld [vmem:[%s3572_s11] ss:$0 sm:$0xff] }
 0x373   :  { %2359 = vmatprep.subr.bf16.mxu0 %v2492_v0  ;;  %18 = vst [vmem:[#allocation2] sm:$0x1] %v17_v52 }
 0x376   :  { %2361 = vmatpush3.bf16.msra.mxu0 %v2360_v16  ;;  %v2393_v16 = vpack.c.bf16 %v818_v14, %v817_v12 }
 0x377   :  { %2362 = vmatprep.subr.bf16.mxu0 %v2492_v0 }
 0x37a   :  { %2364 = vmatpush3.bf16.msra.mxu0 %v2363_v57  ;;  %v2396_v57 = vpack.c.bf16 %v820_v19, %v819_v17 }
 0x37b   :  { %2365 = vmatprep.subr.bf16.mxu0 %v2492_v0 }
 0x37e   :  { %2367 = vmatpush3.bf16.msra.mxu0 %v2366_v63 }
 0x37f   :  { %2368 = vmatprep.subr.bf16.mxu0 %v2492_v0 }
 0x382   :  { %2370 = vmatpush3.bf16.msra.mxu0 %v2369_v23 }
 0x383   :  { %2371 = vmatprep.subr.bf16.mxu0 %v2492_v0 }
 0x43c   :  { %v566_v25 = vpop.f32.mrb[12].mxu0 }
 0x43d   :  { %v567_v26 = vadd.f32 %v1748_v24, %v566_v25  ;;  %v2096_v27 = vpop.f32.mrb[13].mxu0 }
 0x43f   :  { %v3012_v28 = vadd.f32 %v567_v26, %v364_v15 }
 0x440   :  { %v571_v29 = vpop.f32.mrb[14].mxu0 }
 0x441   :  { %v583_v30 = vmax.f32 %v3012_v28, 0.0  ;;  %v572_v31 = vadd.f32 %v1748_v24, %v571_v29  ;;  %v2099_v32 = vpop.f32.mrb[15].mxu0 }
 0x443   :  { %v3017_v33 = vadd.f32 %v572_v31, %v365_v55  ;;  %2136 = vmatmul.mubr.f32.vlgmr.msra.gmra.mrb[12].mxu1 %v583_v30  ;;  %v1781_v55 = vld [vmem:[%s3565_s5 + $0x170] sm:$0xff] }
 0x444   :  { %v576_v34 = vpop.f32.mrb[16].mxu0  ;;  %2138 = vmatprep.mubr.msk.f32.mxu1 %vm2494_vm3, %v2495_v4  ;;  %2406 = vmatpush3.bf16.msra.mxu1 %v2375_v39 }
 0x445   :  { %v584_v13 = vmax.f32 %v3017_v33, 0.0  ;;  %v577_v15 = vadd.f32 %v1748_v24, %v576_v34  ;;  %v2102_v35 = vpop.f32.mrb[17].mxu0  ;;  %2399 = vmatprep.subr.bf16.mxu1 %v2492_v0  ;;  %v1785_v33 = vld [vmem:[%s3570_s8] ss:$0 sm:$0xff] }
 0x447   :  { %v3026_v36 = vadd.f32 %v577_v15, %v366_v59  ;;  %2139 = vmatmul.mubr.f32.gmra.mrb[14].mxu1 %v584_v13  ;;  %v2372_v59 = vpack.c.bf16 %v1782_v21, %v1781_v55  ;;  %v2497_v15 = vmov 0  }
 0x448   :  { %2141 = vmatprep.mubr.msk.f32.mxu1 %vm2494_vm3, %v2495_v4  ;;  %2407 = vmatpush3.bf16.msra.mxu1 %v2378_v42 }
 0x449   :  { %v585_v18 = vmax.f32 %v3026_v36, 0.0  ;;  %2373 = vmatpush3.bf16.msra.mxu0 %v2372_v59  ;;  %2400 = vmatprep.subr.bf16.mxu1 %v2492_v0 }
 0x44a   :  { %2374 = vmatprep.subr.bf16.mxu0 %v2492_v0  ;;  %2432 = vset.pattern.permute.xlu0 %v2497_v15 }
 0x44b   :  { %2142 = vmatmul.mubr.f32.gmra.mrb[16].mxu1 %v585_v18 }
 0x44c   :  { %2220 = vmatprep.mubr.msk.f32.mxu1 %vm2494_vm3, %v2495_v4  ;;  %2408 = vmatpush3.bf16.msra.mxu1 %v2381_v45 }
 0x44d   :  { %2401 = vmatprep.subr.bf16.mxu1 %v2492_v0 }
 0x450   :  { %2409 = vmatpush3.bf16.msra.mxu1 %v2384_v48 }
 0x451   :  { %2402 = vmatprep.subr.bf16.mxu1 %v2492_v0 }
 0x454   :  { %2410 = vmatpush3.bf16.msra.mxu1 %v2387_v51 }
 0x455   :  { %2403 = vmatprep.subr.bf16.mxu1 %v2492_v0 }
 0x458   :  { %2411 = vmatpush3.bf16.msra.mxu1 %v2390_v54 }
 0x459   :  { %2404 = vmatprep.subr.bf16.mxu1 %v2492_v0 }
 0x45c   :  { %2412 = vmatpush3.bf16.msra.mxu1 %v2393_v16 }
 0x45d   :  { %2405 = vmatprep.subr.bf16.mxu1 %v2492_v0 }
 0x460   :  { %2413 = vmatpush3.bf16.msra.mxu1 %v2396_v57 }
 0x516   :  { %v677_v58 = vpop.f32.mrb[12].mxu1 }
 0x517   :  { %v678_v60 = vadd.f32 %v1766_v56, %v677_v58  ;;  %v2137_v62 = vpop.f32.mrb[13].mxu1 }
 0x518   :  { %v911_v62 = vld [vmem:[%s3574_s9] sm:$0xff] }
 0x519   :  { %v691_v1 = vmax.f32 %v678_v60, 0.0 }
 0x51a   :  { %v682_v3 = vpop.f32.mrb[14].mxu1 }
 0x51b   :  { %v683_v5 = vadd.f32 %v1766_v56, %v682_v3  ;;  %v2140_v6 = vpop.f32.mrb[15].mxu1  ;;  %2177 = vmatmul.mubr.f32.vlgmr.msra.gmra.mrb[18].mxu0 %v691_v1 }
 0x51c   :  { %2179 = vmatprep.mubr.msk.f32.mxu0 %vm2494_vm3, %v2495_v4  ;;  %2376 = vmatpush3.bf16.msra.mxu0 %v2375_v39  ;;  %v2499_v39 = vmov 1  }
 0x51d   :  { %v692_v7 = vmax.f32 %v683_v5, 0.0  ;;  %2377 = vmatprep.subr.bf16.mxu0 %v2492_v0 }
 0x51e   :  { %v687_v8 = vpop.f32.mrb[16].mxu1 }
 0x51f   :  { %v688_v9 = vadd.f32 %v1766_v56, %v687_v8  ;;  %v2143_v10 = vpop.f32.mrb[17].mxu1  ;;  %2180 = vmatmul.mubr.f32.gmra.mrb[20].mxu0 %v692_v7 }
 0x520   :  { %2182 = vmatprep.mubr.msk.f32.mxu0 %vm2494_vm3, %v2495_v4  ;;  %2379 = vmatpush3.bf16.msra.mxu0 %v2378_v42  ;;  %v2502_v42 = vmov 9  }
 0x521   :  { %v693_v11 = vmax.f32 %v688_v9, 0.0  ;;  %2380 = vmatprep.subr.bf16.mxu0 %v2492_v0 }
 0x523   :  { %2183 = vmatmul.mubr.f32.gmra.mrb[22].mxu0 %v693_v11 }
 0x524   :  { %2382 = vmatpush3.bf16.msra.mxu0 %v2381_v45  ;;  %2217 = vmatprep.mubr.msk.f32.mxu0 %vm2494_vm3, %v2495_v4  ;;  %v2504_v45 = vmov 10  }
 0x525   :  { %2383 = vmatprep.subr.bf16.mxu0 %v2492_v0 }
 0x528   :  { %2385 = vmatpush3.bf16.msra.mxu0 %v2384_v48  ;;  %v2506_v48 = vmov 8  }
 0x529   :  { %2386 = vmatprep.subr.bf16.mxu0 %v2492_v0 }
 0x52c   :  { %2388 = vmatpush3.bf16.msra.mxu0 %v2387_v51 }
 0x52d   :  { %2389 = vmatprep.subr.bf16.mxu0 %v2492_v0 }
 0x530   :  { %2391 = vmatpush3.bf16.msra.mxu0 %v2390_v54  ;;  %v923_v54 = vlaneseq }
 0x531   :  { %2392 = vmatprep.subr.bf16.mxu0 %v2492_v0 }
 0x532   :  { %v924_v56 = vshrl.u32 %v923_v54, 7 }
 0x534   :  { %2394 = vmatpush3.bf16.msra.mxu0 %v2393_v16  ;;  %v3148_v58 = vsub.s32 0, %v924_v56  ;;  %v3150_v60 = vsub.s32 3, %v924_v56  ;;  %v3159_v5 = vsub.s32 2, %v924_v56  ;;  %v3161_v6 = vsub.s32 1, %v924_v56 }
 0x535   :  { %2395 = vmatprep.subr.bf16.mxu0 %v2492_v0  ;;  %v3170_v9 = vsub.s32 4, %v924_v56  ;;  %v3179_v14 = vsub.s32 5, %v924_v56 }
 0x536   :  { %v3167_v7 = vrot.slane %v911_v62, %v3150_v60  ;;  %v936_v8 = vrot.slane %v911_v62, %v3161_v6  ;;  %v3173_v10 = vrot.slane %v911_v62, %v3159_v5 }
 0x537   :  { %v3186_v19 = vrot.slane %v911_v62, %v3170_v9 }
 0x538   :  { %2397 = vmatpush3.bf16.msra.mxu0 %v2396_v57 }
 0x5ee   :  { %v785_v61 = vpop.f32.mrb[18].mxu0 }
 0x5ef   :  { %v786_v63 = vadd.f32 %v1784_v20, %v785_v61  ;;  %v2178_v2 = vpop.f32.mrb[19].mxu0 }
 0x5f1   :  { %v799_v22 = vadd.f32 %v786_v63, %v583_v30  ;;  %v2496_v30 = vmov 2   ;;  %v3192_v63 = vrot.slane %v911_v62, %v3179_v14 }
 0x5f2   :  { %v790_v23 = vpop.f32.mrb[20].mxu0  ;;  %2434 = vset.pattern.permute.xlu1 %v2496_v30 }
 0x5f3   :  { %v802_v24 = vmax.f32 %v799_v22, 0.0  ;;  %v791_v25 = vadd.f32 %v1784_v20, %v790_v23  ;;  %v2181_v26 = vpop.f32.mrb[21].mxu0  ;;  %v3198_v23 = vsub.s32 6, %v924_v56 }
 0x5f5   :  { %v800_v0 = vadd.f32 %v791_v25, %v584_v13  ;;  %2218 = vmatmul.mubr.f32.vlgmr.msra.gmra.mrb[24].mxu0 %v802_v24 }
 0x5f6   :  { %v795_v27 = vpop.f32.mrb[22].mxu0 }
 0x5f7   :  { %v803_v29 = vmax.f32 %v800_v0, 0.0  ;;  %v796_v31 = vadd.f32 %v1784_v20, %v795_v27  ;;  %v2184_v32 = vpop.f32.mrb[23].mxu0 }
 0x5f9   :  { %v801_v34 = vadd.f32 %v796_v31, %v585_v18  ;;  %2221 = vmatmul.mubr.f32.vlgmr.msra.gmra.mrb[18].mxu1 %v803_v29  ;;  %v3205_v29 = vrot.slane %v911_v62, %v3198_v23  ;;  %v3207_v31 = vsub.s32 7, %v924_v56 }
 0x5fa   :  { %2223 = vmatprep.mubr.msk.f32.mxu1 %vm2494_vm3, %v2495_v4  ;;  %v3164_v4 = vrot.slane %v911_v62, %v3148_v58 }
 0x5fb   :  { %v804_v28 = vmax.f32 %v801_v34, 0.0 }
 0x5fd   :  { %2224 = vmatmul.mubr.f32.gmra.mrb[20].mxu1 %v804_v28 }
 0x6c8   :  { %v894_v13 = vpop.f32.mrb[24].mxu0 }
 0x6c9   :  { %v895_v35 = vadd.f32 %v1785_v33, %v894_v13  ;;  %v2219_v36 = vpop.f32.mrb[25].mxu0 }
 0x6ca   :  { %v3223_v36 = vld [vmem:[%s3574_s9 + $0x8] sm:$0xff] }
 0x6cb   :  { %v908_v18 = vmax.f32 %v895_v35, 0.0  ;;  %v3218_v35 = vrot.slane %v911_v62, %v3207_v31 }
 0x6cc   :  { %v899_v55 = vpop.f32.mrb[18].mxu1 }
 0x6cd   :  { %v2222_v21 = vpop.f32.mrb[19].mxu1  ;;  %940 = vperm.xlu1 %2434, %v908_v18   ;;  %920 = vperm.xlu0 %2432, %v908_v18   ;;  %v900_v44 = vadd.f32 %v1785_v33, %v899_v55 }
 0x6cf   :  { %v909_v47 = vmax.f32 %v900_v44, 0.0 }
 0x6d0   :  { %v904_v59 = vpop.f32.mrb[20].mxu1 }
 0x6d1   :  { %v2225_v37 = vpop.f32.mrb[21].mxu1  ;;  %2436 = vset.pattern.permute.xlu1 %v2498_v38  ;;  %2433 = vset.pattern.permute.xlu0 %v2499_v39  ;;  %v905_v50 = vadd.f32 %v1785_v33, %v904_v59 }
 0x6d2   :  { %1217 = vperm.xlu1 %2436, %v908_v18   ;;  %930 = vperm.xlu0 %2433, %v908_v18  }
 0x6d3   :  { %v910_v51 = vmax.f32 %v905_v50, 0.0 }
 0x6d6   :  { %2437 = vset.pattern.permute.xlu1 %v2500_v40  ;;  %2435 = vset.pattern.permute.xlu0 %v2501_v41 }
 0x6d7   :  { %1375 = vperm.xlu1 %2437, %v908_v18   ;;  %1211 = vperm.xlu0 %2435, %v908_v18  }
 0x6db   :  { %2439 = vset.pattern.permute.xlu1 %v2502_v42  ;;  %2438 = vset.pattern.permute.xlu0 %v2503_v43 }
 0x6dc   :  { %1539 = vperm.xlu1 %2439, %v908_v18   ;;  %1381 = vperm.xlu0 %2438, %v908_v18  }
 0x6e0   :  { %2440 = vset.pattern.permute.xlu1 %v2504_v45  ;;  %2441 = vset.pattern.permute.xlu0 %v2505_v46 }
 0x6e1   :  { %1545 = vperm.xlu1 %2440, %v908_v18   ;;  %1223 = vperm.xlu0 %2441, %v908_v18  }
 0x6e5   :  { %2442 = vset.pattern.permute.xlu1 %v2506_v48  ;;  %2446 = vset.pattern.permute.xlu0 %v2501_v41 }
 0x6e6   :  { %1387 = vperm.xlu1 %2442, %v908_v18   ;;  %1274 = vperm.xlu0 %2446, %v909_v47  }
 0x6ea   :  { %2443 = vset.pattern.permute.xlu1 %v2507_v49  ;;  %2449 = vset.pattern.permute.xlu0 %v2498_v38 }
 0x6eb   :  { %1551 = vperm.xlu1 %2443, %v908_v18   ;;  %1280 = vperm.xlu0 %2449, %v909_v47  }
 0x6ef   :  { %2444 = vset.pattern.permute.xlu1 %v2497_v15  ;;  %2452 = vset.pattern.permute.xlu0 %v2496_v30 }
 0x6f0   :  { %1032 = vperm.xlu1 %2444, %v909_v47   ;;  %1052 = vperm.xlu0 %2452, %v909_v47  }
 0x6f4   :  { %2445 = vset.pattern.permute.xlu1 %v2499_v39  ;;  %2455 = vset.pattern.permute.xlu0 %v2507_v49 }
 0x6f5   :  { %1042 = vperm.xlu1 %2445, %v909_v47   ;;  %1614 = vperm.xlu0 %2455, %v909_v47  }
 0x6f9   :  { %2447 = vset.pattern.permute.xlu1 %v2500_v40  ;;  %2458 = vset.pattern.permute.xlu0 %v2500_v40 }
 0x6fa   :  { %1438 = vperm.xlu1 %2447, %v909_v47   ;;  %1501 = vperm.xlu0 %2458, %v910_v51  }
 0x6fe   :  { %2448 = vset.pattern.permute.xlu1 %v2502_v42  ;;  %2461 = vset.pattern.permute.xlu0 %v2498_v38 }
 0x6ff   :  { %1602 = vperm.xlu1 %2448, %v909_v47   ;;  %1343 = vperm.xlu0 %2461, %v910_v51  }
 0x703   :  { %2450 = vset.pattern.permute.xlu1 %v2503_v43  ;;  %2464 = vset.pattern.permute.xlu0 %v2496_v30 }
 0x704   :  { %1444 = vperm.xlu1 %2450, %v909_v47   ;;  %1164 = vperm.xlu0 %2464, %v910_v51  }
 0x708   :  { %2451 = vset.pattern.permute.xlu1 %v2504_v45  ;;  %2467 = vset.pattern.permute.xlu0 %v2507_v49 }
 0x709   :  { %1608 = vperm.xlu1 %2451, %v909_v47   ;;  %1677 = vperm.xlu0 %2467, %v910_v51  }
 0x70d   :  { %2453 = vset.pattern.permute.xlu1 %v2505_v46 }
 0x70e   :  { %1286 = vperm.xlu1 %2453, %v909_v47  }
 0x712   :  { %2454 = vset.pattern.permute.xlu1 %v2506_v48 }
 0x713   :  { %1450 = vperm.xlu1 %2454, %v909_v47  }
 0x717   :  { %2456 = vset.pattern.permute.xlu1 %v2497_v15 }
 0x718   :  { %1144 = vperm.xlu1 %2456, %v910_v51  }
 0x71c   :  { %2457 = vset.pattern.permute.xlu1 %v2501_v41  ;;  %v3237_v41 = vrot.slane %v3223_v36, %v3148_v58 }
 0x71d   :  { %1337 = vperm.xlu1 %2457, %v910_v51  }
 0x721   :  { %2459 = vset.pattern.permute.xlu1 %v2502_v42 }
 0x722   :  { %1665 = vperm.xlu1 %2459, %v910_v51  }
 0x726   :  { %2460 = vset.pattern.permute.xlu1 %v2499_v39 }
 0x727   :  { %1154 = vperm.xlu1 %2460, %v910_v51  }
 0x72b   :  { %2462 = vset.pattern.permute.xlu1 %v2503_v43 }
 0x72c   :  { %1507 = vperm.xlu1 %2462, %v910_v51  }
 0x730   :  { %2463 = vset.pattern.permute.xlu1 %v2504_v45 }
 0x731   :  { %1671 = vperm.xlu1 %2463, %v910_v51  }
 0x735   :  { %2465 = vset.pattern.permute.xlu1 %v2505_v46 }
 0x736   :  { %1349 = vperm.xlu1 %2465, %v910_v51  }
 0x73a   :  { %2466 = vset.pattern.permute.xlu1 %v2506_v48  ;;  %v3247_v48 = vrot.slane %v3223_v36, %v3161_v6 }
 0x73b   :  { %1513 = vperm.xlu1 %2466, %v910_v51  }
 0x73f   :  { %1186 = vrot.lane.b32.xlu1 %v1787_v53, %s2508_s18 }
 0x74c   :  { %v3155_v1 = vpop.permute.xlu1 %940  ;;  %v3157_v3 = vpop.permute.xlu0 %920 }
 0x74d   :  { %v927_v16 = vmul.f32 %v3164_v4, %v3157_v3  ;;  %v953_v17 = vmul.f32 %v3167_v7, %v3157_v3  ;;  %v947_v20 = vmul.f32 %v3173_v10, %v3155_v1  ;;  %v971_v27 = vmul.f32 %v3192_v63, %v3155_v1 }
 0x74e   :  { %v980_v13 = vmul.f32 %v3205_v29, %v3157_v3  ;;  %v998_v56 = vmul.f32 %v3237_v41, %v3155_v1 }
 0x74f   :  { %v955_v24 = vrot.slane %v953_v17, 2  ;;  %v973_v33 = vrot.slane %v971_v27, 2 }
 0x750   :  { %v982_v42 = vrot.slane %v980_v13, 4 }
 0x751   :  { %v3175_v11 = vpop.permute.xlu1 %1217  ;;  %v3177_v12 = vpop.permute.xlu0 %930 }
 0x752   :  { %v937_v57 = vmul.f32 %v936_v8, %v3177_v12  ;;  %v962_v26 = vmul.f32 %v3186_v19, %v3177_v12  ;;  %v1220_v18 = vmul.f32 %v3175_v11, %v936_v8  ;;  %v989_v43 = vmul.f32 %v3218_v35, %v3177_v12 }
 0x753   :  { %v1233_v44 = vmul.f32 %v3175_v11, %v3186_v19 }
 0x754   :  { %v938_v61 = vadd.f32 %v937_v57, %v927_v16  ;;  %v964_v32 = vrot.slane %v962_v26, 2  ;;  %v991_v62 = vrot.slane %v989_v43, 4 }
 0x755   :  { %v1235_v17 = vrot.slane %v1233_v44, 2 }
 0x756   :  { %v3194_v2 = vpop.permute.xlu1 %1375  ;;  %v3196_v22 = vpop.permute.xlu0 %1211  ;;  %v948_v25 = vadd.f32 %v947_v20, %v938_v61  ;;  %v3262_v61 = vrot.slane %v3223_v36, %v3159_v5 }
 0x757   :  { %v1214_v15 = vmul.f32 %v3196_v22, %v3164_v4  ;;  %v1228_v55 = vmul.f32 %v3196_v22, %v3167_v7  ;;  %v1378_v45 = vmul.f32 %v3194_v2, %v3164_v4  ;;  %v1392_v51 = vmul.f32 %v3194_v2, %v3167_v7 }
 0x758   :  { %v957_v0 = vadd.f32 %v955_v24, %v948_v25  ;;  %v1016_v44 = vmul.f32 %v3262_v61, %v3177_v12 }
 0x759   :  { %v1221_v38 = vadd.f32 %v1220_v18, %v1214_v15  ;;  %v1230_v46 = vrot.slane %v1228_v55, 2  ;;  %v1000_v15 = vrot.slane %v998_v56, 4 }
 0x75a   :  { %v966_v30 = vadd.f32 %v964_v32, %v957_v0  ;;  %v1007_v0 = vmul.f32 %v3247_v48, %v3157_v3  ;;  %v1243_v3 = vmul.f32 %v3196_v22, %v3205_v29 }
 0x75b   :  { %v3209_v34 = vpop.permute.xlu1 %1539  ;;  %v3211_v28 = vpop.permute.xlu0 %1381 }
 0x75c   :  { %v975_v37 = vadd.f32 %v973_v33, %v966_v30  ;;  %v1384_v39 = vmul.f32 %v3211_v28, %v936_v8  ;;  %v1542_v25 = vmul.f32 %v3209_v34, %v3164_v4  ;;  %v1556_v26 = vmul.f32 %v3209_v34, %v3167_v7 }
 0x75d   :  { %v1397_v27 = vmul.f32 %v3211_v28, %v3186_v19  ;;  %v3280_v7 = vrot.slane %v3223_v36, %v3150_v60 }
 0x75e   :  { %v984_v49 = vadd.f32 %v982_v42, %v975_v37  ;;  %v1385_v52 = vadd.f32 %v1384_v39, %v1378_v45  ;;  %v1009_v42 = vrot.slane %v1007_v0, 6  ;;  %v1571_v45 = vmul.f32 %v3209_v34, %v3205_v29 }
 0x760   :  { %v3228_v21 = vpop.permute.xlu1 %1545  ;;  %v3230_v59 = vpop.permute.xlu0 %1223  ;;  %v993_v24 = vadd.f32 %v991_v62, %v984_v49 }
 0x761   :  { %v1226_v40 = vmul.f32 %v3230_v59, %v3173_v10  ;;  %v1548_v16 = vmul.f32 %v3228_v21, %v936_v8  ;;  %v1238_v57 = vmul.f32 %v3230_v59, %v3192_v63  ;;  %v1394_v8 = vrot.slane %v1392_v51, 2 }
 0x762   :  { %v1561_v13 = vmul.f32 %v3228_v21, %v3186_v19  ;;  %v1002_v37 = vadd.f32 %v1000_v15, %v993_v24  ;;  %v1399_v19 = vrot.slane %v1397_v27, 2  ;;  %v1248_v51 = vmul.f32 %v3175_v11, %v3218_v35 }
 0x763   :  { %v1227_v47 = vadd.f32 %v1226_v40, %v1221_v38  ;;  %v1549_v33 = vadd.f32 %v1548_v16, %v1542_v25  ;;  %v1240_v18 = vrot.slane %v1238_v57, 2  ;;  %v1558_v38 = vrot.slane %v1556_v26, 2 }
 0x764   :  { %v1011_v56 = vadd.f32 %v1009_v42, %v1002_v37  ;;  %v1025_v16 = vmul.f32 %v3280_v7, %v3155_v1  ;;  %v1018_v24 = vrot.slane %v1016_v44, 6  ;;  %v1573_v25 = vrot.slane %v1571_v45, 4 }
 0x765   :  { %v3249_v50 = vpop.permute.xlu1 %1387  ;;  %v1232_v53 = vadd.f32 %v1230_v46, %v1227_v47  ;;  %v1563_v46 = vrot.slane %v1561_v13, 2  ;;  %v1253_v27 = vmul.f32 %v3230_v59, %v3237_v41  ;;  %v3310_v15 = vrot.slane %v3223_v36, %v3170_v9 }
 0x766   :  { %v1390_v54 = vmul.f32 %v3249_v50, %v3173_v10 }
 0x767   :  { %v1237_v32 = vadd.f32 %v1235_v17, %v1232_v53  ;;  %v1407_v17 = vmul.f32 %v3194_v2, %v3205_v29  ;;  %v1020_v29 = vadd.f32 %v1018_v24, %v1011_v56  ;;  %v1591_v56 = vmul.f32 %v3228_v21, %v3262_v61 }
 0x768   :  { %v1391_v20 = vadd.f32 %v1390_v54, %v1385_v52  ;;  %v1245_v52 = vrot.slane %v1243_v3, 4  ;;  %v3296_v54 = vpop.permute.xlu0 %1274  ;;  %v1027_v3 = vrot.slane %v1025_v16, 6 }
 0x769   :  { %v1242_v43 = vadd.f32 %v1240_v18, %v1237_v32  ;;  %v1409_v18 = vrot.slane %v1407_v17, 4 }
 0x76a   :  { %v3272_v30 = vpop.permute.xlu1 %1551  ;;  %v1396_v55 = vadd.f32 %v1394_v8, %v1391_v20  ;;  %v1250_v8 = vrot.slane %v1248_v51, 4 }
 0x76b   :  { %v1554_v4 = vmul.f32 %v3272_v30, %v3173_v10  ;;  %v1566_v40 = vmul.f32 %v3272_v30, %v3192_v63  ;;  %v1402_v10 = vmul.f32 %v3249_v50, %v3192_v63  ;;  %v1576_v63 = vmul.f32 %v3228_v21, %v3218_v35 }
 0x76c   :  { %v1401_v53 = vadd.f32 %v1399_v19, %v1396_v55  ;;  %v1247_v57 = vadd.f32 %v1245_v52, %v1242_v43  ;;  %v1581_v0 = vmul.f32 %v3272_v30, %v3237_v41  ;;  %v1412_v55 = vmul.f32 %v3211_v28, %v3218_v35 }
 0x76d   :  { %v1555_v39 = vadd.f32 %v1554_v4, %v1549_v33  ;;  %v1568_v12 = vrot.slane %v1566_v40, 2  ;;  %v1404_v20 = vrot.slane %v1402_v10, 2  ;;  %v1578_v33 = vrot.slane %v1576_v63, 4 }
 0x76e   :  { %v3316_v4 = vrot.slane %v3223_v36, %v3179_v14  ;;  %v1252_v37 = vadd.f32 %v1250_v8, %v1247_v57  ;;  %v1583_v42 = vrot.slane %v1581_v0, 4  ;;  %v1258_v43 = vmul.f32 %v3196_v22, %v3247_v48 }
 0x76f   :  { %v1560_v47 = vadd.f32 %v1558_v38, %v1555_v39  ;;  %v3292_v49 = vpop.permute.xlu1 %1032  ;;  %v1406_v32 = vadd.f32 %v1404_v20, %v1401_v53  ;;  %v3320_v38 = vpop.permute.xlu0 %1280  ;;  %v1586_v39 = vmul.f32 %v3209_v34, %v3247_v48  ;;  %v1255_v10 = vrot.slane %v1253_v27, 4 }
 0x770   :  { %v1039_v19 = vmul.f32 %v3310_v15, %v3292_v49  ;;  %v1414_v51 = vrot.slane %v1412_v55, 4  ;;  %v1417_v34 = vmul.f32 %v3249_v50, %v3237_v41  ;;  %v3338_v22 = vrot.slane %v3223_v36, %v3198_v23 }
 0x771   :  { %v1565_v62 = vadd.f32 %v1563_v46, %v1560_v47  ;;  %v1411_v44 = vadd.f32 %v1409_v18, %v1406_v32  ;;  %v1029_v46 = vadd.f32 %v1027_v3, %v1020_v29  ;;  %v1257_v52 = vadd.f32 %v1255_v10, %v1252_v37 }
 0x772   :  { %v1588_v53 = vrot.slane %v1586_v39, 6  ;;  %v3346_v57 = vrot.slane %v3223_v36, %v3207_v31  ;;  %v1422_v21 = vmul.f32 %v3194_v2, %v3247_v48  ;;  %v1593_v0 = vrot.slane %v1591_v56, 6  ;;  %v3363_v2 = vld [vmem:[%s3574_s9 + $0x10] sm:$0xff] }
 0x773   :  { %v1570_v26 = vadd.f32 %v1568_v12, %v1565_v62  ;;  %v1040_v63 = vadd.f32 %v1039_v19, %v1029_v46  ;;  %v1263_v62 = vmul.f32 %v3175_v11, %v3262_v61  ;;  %v1260_v12 = vrot.slane %v1258_v43, 6  ;;  %v3342_v17 = vpop.permute.xlu0 %1052 }
 0x774   :  { %v3312_v1 = vpop.permute.xlu1 %1042  ;;  %v1416_v16 = vadd.f32 %v1414_v51, %v1411_v44  ;;  %v1596_v11 = vmul.f32 %v3272_v30, %v3280_v7  ;;  %v1065_v8 = vmul.f32 %v3346_v57, %v3292_v49  ;;  %v1059_v36 = vmul.f32 %v3338_v22, %v3342_v17 }
 0x775   :  { %v1575_v13 = vadd.f32 %v1573_v25, %v1570_v26  ;;  %v1049_v35 = vmul.f32 %v3316_v4, %v3312_v1  ;;  %v1262_v24 = vadd.f32 %v1260_v12, %v1257_v52  ;;  %v1419_v25 = vrot.slane %v1417_v34, 4 }
 0x776   :  { %v1265_v27 = vrot.slane %v1263_v62, 6  ;;  %v1268_v32 = vmul.f32 %v3230_v59, %v3280_v7  ;;  %v3367_v30 = vrot.slane %v3363_v2, %v3148_v58  ;;  %v1427_v3 = vmul.f32 %v3211_v28, %v3262_v61 }
 0x777   :  { %v1580_v40 = vadd.f32 %v1578_v33, %v1575_v13  ;;  %v1050_v20 = vadd.f32 %v1049_v35, %v1040_v63  ;;  %v1421_v29 = vadd.f32 %v1419_v25, %v1416_v16  ;;  %v1424_v13 = vrot.slane %v1422_v21, 6 }
 0x778   :  { %v1267_v18 = vadd.f32 %v1265_v27, %v1262_v24  ;;  %v1598_v55 = vrot.slane %v1596_v11, 6  ;;  %v1067_v37 = vrot.slane %v1065_v8, 2  ;;  %v3373_v59 = vrot.slane %v3363_v2, %v3161_v6 }
 0x779   :  { %v1585_v45 = vadd.f32 %v1583_v42, %v1580_v40  ;;  %v3330_v47 = vpop.permute.xlu1 %1438  ;;  %v1060_v33 = vadd.f32 %v1059_v36, %v1050_v20  ;;  %v1074_v39 = vmul.f32 %v3367_v30, %v3312_v1  ;;  %v1270_v42 = vrot.slane %v1268_v32, 6 }
 0x77a   :  { %v1426_v19 = vadd.f32 %v1424_v13, %v1421_v29  ;;  %v1429_v28 = vrot.slane %v1427_v3, 6  ;;  %v1083_v46 = vmul.f32 %v3373_v59, %v3342_v17  ;;  %v3387_v52 = vrot.slane %v3363_v2, %v3159_v5 }
 0x77b   :  { %v1590_v41 = vadd.f32 %v1588_v53, %v1585_v45  ;;  %v1069_v10 = vadd.f32 %v1067_v37, %v1060_v33  ;;  %v1272_v61 = vadd.f32 %v1270_v42, %v1267_v18  ;;  %v1432_v45 = vmul.f32 %v3249_v50, %v3280_v7  ;;  %v3391_v53 = vpop.permute.xlu0 %1614 }
 0x77c   :  { %v1076_v35 = vrot.slane %v1074_v39, 2  ;;  %v1431_v51 = vadd.f32 %v1429_v28, %v1426_v19  ;;  %v1277_v34 = vmul.f32 %v3296_v54, %v3310_v15  ;;  %v3405_v20 = vrot.slane %v3363_v2, %v3170_v9 }
 0x77d   :  { %v1595_v48 = vadd.f32 %v1593_v0, %v1590_v41  ;;  %v1434_v12 = vrot.slane %v1432_v45, 6  ;;  %v3401_v41 = vrot.slane %v3363_v2, %v3150_v60  ;;  %v1092_v21 = vmul.f32 %v3387_v52, %v3292_v49 }
 0x77e   :  { %v3350_v26 = vpop.permute.xlu1 %1602  ;;  %v1078_v63 = vadd.f32 %v1076_v35, %v1069_v10  ;;  %v1278_v16 = vadd.f32 %v1277_v34, %v1272_v61  ;;  %v1085_v24 = vrot.slane %v1083_v46, 2  ;;  %v1617_v25 = vmul.f32 %v3391_v53, %v3338_v22 }
 0x77f   :  { %v1600_v43 = vadd.f32 %v1598_v55, %v1595_v48  ;;  %v1605_v44 = vmul.f32 %v3350_v26, %v3310_v15  ;;  %v1619_v50 = vmul.f32 %v3350_v26, %v3346_v57  ;;  %v1436_v11 = vadd.f32 %v1434_v12, %v1431_v51 }
 0x780   :  { %v1291_v8 = vmul.f32 %v3296_v54, %v3346_v57  ;;  %v1283_v60 = vmul.f32 %v3320_v38, %v3316_v4  ;;  %v1441_v36 = vmul.f32 %v3330_v47, %v3310_v15  ;;  %v1087_v9 = vadd.f32 %v1085_v24, %v1078_v63 }
 0x781   :  { %v1606_v62 = vadd.f32 %v1605_v44, %v1600_v43  ;;  %v1621_v27 = vrot.slane %v1619_v50, 2  ;;  %v1296_v13 = vmul.f32 %v3320_v38, %v3367_v30  ;;  %v1101_v3 = vmul.f32 %v3401_v41, %v3312_v1 }
 0x782   :  { %v1284_v33 = vadd.f32 %v1283_v60, %v1278_v16  ;;  %v3429_v15 = vrot.slane %v3363_v2, %v3179_v14  ;;  %v1094_v55 = vrot.slane %v1092_v21, 4  ;;  %v1293_v42 = vrot.slane %v1291_v8, 2 }
 0x783   :  { %v3377_v40 = vpop.permute.xlu1 %1444  ;;  %v1629_v19 = vmul.f32 %v3391_v53, %v3373_v59  ;;  %v1442_v28 = vadd.f32 %v1441_v36, %v1436_v11  ;;  %v1455_v61 = vmul.f32 %v3330_v47, %v3346_v57  ;;  %v1298_v45 = vrot.slane %v1296_v13, 2 }
 0x784   :  { %v1447_v37 = vmul.f32 %v3377_v40, %v3316_v4  ;;  %v1096_v44 = vadd.f32 %v1094_v55, %v1087_v9  ;;  %v1110_v46 = vmul.f32 %v3405_v20, %v3342_v17  ;;  %v1460_v63 = vmul.f32 %v3377_v40, %v3367_v30 }
 0x785   :  { %v1306_v57 = vmul.f32 %v3296_v54, %v3387_v52  ;;  %v1457_v24 = vrot.slane %v1455_v61, 2  ;;  %v1119_v11 = vmul.f32 %v3429_v15, %v3292_v49 }
 0x786   :  { %v1448_v34 = vadd.f32 %v1447_v37, %v1442_v28  ;;  %v1462_v60 = vrot.slane %v1460_v63, 2  ;;  %v3465_v37 = vrot.slane %v3363_v2, %v3207_v31  ;;  %v1644_v31 = vmul.f32 %v3391_v53, %v3405_v20 }
 0x787   :  { %v1121_v55 = vrot.slane %v1119_v11, 6  ;;  %v1321_v63 = vmul.f32 %v3296_v54, %v3429_v15 }
 0x788   :  { %v3393_v56 = vpop.permute.xlu1 %1608 }
 0x789   :  { %v1611_v7 = vmul.f32 %v3393_v56, %v3316_v4  ;;  %v1624_v29 = vmul.f32 %v3393_v56, %v3367_v30  ;;  %v1103_v4 = vrot.slane %v1101_v3, 4  ;;  %v1112_v30 = vrot.slane %v1110_v46, 4 }
 0x78a   :  { %v1639_v49 = vmul.f32 %v3393_v56, %v3401_v41  ;;  %v1323_v11 = vrot.slane %v1321_v63, 6 }
 0x78b   :  { %v1612_v0 = vadd.f32 %v1611_v7, %v1606_v62  ;;  %v1626_v14 = vrot.slane %v1624_v29, 2  ;;  %v1631_v7 = vrot.slane %v1629_v19, 2  ;;  %v1105_v21 = vadd.f32 %v1103_v4, %v1096_v44 }
 0x78c   :  { %v3457_v29 = vrot.slane %v3363_v2, %v3198_v23  ;;  %v914_v2 = vld [vmem:[%s3574_s9 + $0x18] sm:$0x7]  ;;  %v1641_v61 = vrot.slane %v1639_v49, 4 }
 0x78d   :  { %v1618_v32 = vadd.f32 %v1617_v25, %v1612_v0  ;;  %v3419_v48 = vpop.permute.xlu1 %1286  ;;  %v1634_v25 = vmul.f32 %v3350_v26, %v3387_v52  ;;  %v1114_v13 = vadd.f32 %v1112_v30, %v1105_v21 }
 0x78e   :  { %v1289_v18 = vmul.f32 %v3419_v48, %v3338_v22  ;;  %v1301_v10 = vmul.f32 %v3419_v48, %v3373_v59  ;;  %v1128_v23 = vmul.f32 %v3457_v29, %v3312_v1  ;;  %v1316_v44 = vmul.f32 %v3419_v48, %v3405_v20 }
 0x78f   :  { %v1623_v39 = vadd.f32 %v1621_v27, %v1618_v32  ;;  %v1308_v32 = vrot.slane %v1306_v57, 4  ;;  %v1636_v3 = vrot.slane %v1634_v25, 4  ;;  %v1326_v30 = vmul.f32 %v3320_v38, %v3457_v29 }
 0x790   :  { %v1290_v43 = vadd.f32 %v1289_v18, %v1284_v33  ;;  %v1303_v16 = vrot.slane %v1301_v10, 2  ;;  %v1311_v33 = vmul.f32 %v3320_v38, %v3401_v41  ;;  %v1130_v46 = vrot.slane %v1128_v23, 6 }
 0x791   :  { %v1628_v62 = vadd.f32 %v1626_v14, %v1623_v39  ;;  %v1123_v14 = vadd.f32 %v1121_v55, %v1114_v13  ;;  %v1318_v57 = vrot.slane %v1316_v44, 4 }
 0x792   :  { %v1295_v35 = vadd.f32 %v1293_v42, %v1290_v43  ;;  %v3441_v51 = vpop.permute.xlu1 %1450  ;;  %v1470_v42 = vmul.f32 %v3330_v47, %v3387_v52  ;;  %v1313_v10 = vrot.slane %v1311_v33, 4  ;;  %v1137_v52 = vmul.f32 %v3465_v37, %v3342_v17 }
 0x793   :  { %v1453_v50 = vmul.f32 %v3441_v51, %v3338_v22  ;;  %v1633_v36 = vadd.f32 %v1631_v7, %v1628_v62  ;;  %v1465_v9 = vmul.f32 %v3441_v51, %v3373_v59  ;;  %v3467_v59 = vpop.permute.xlu0 %1501  ;;  %v3489_v62 = vrot.slane %v914_v2, %v3148_v58 }
 0x794   :  { %v1300_v12 = vadd.f32 %v1298_v45, %v1295_v35  ;;  %v1472_v4 = vrot.slane %v1470_v42, 4  ;;  %v1475_v35 = vmul.f32 %v3377_v40, %v3401_v41  ;;  %v1646_v7 = vrot.slane %v1644_v31, 4 }
 0x795   :  { %v1454_v0 = vadd.f32 %v1453_v50, %v1448_v34  ;;  %v1638_v19 = vadd.f32 %v1636_v3, %v1633_v36  ;;  %v1467_v43 = vrot.slane %v1465_v9, 2  ;;  %v1649_v17 = vmul.f32 %v3350_v26, %v3429_v15 }
 0x796   :  { %v1305_v8 = vadd.f32 %v1303_v16, %v1300_v12  ;;  %v1132_v16 = vadd.f32 %v1130_v46, %v1123_v14  ;;  %v1477_v41 = vrot.slane %v1475_v35, 4  ;;  %v1480_v54 = vmul.f32 %v3441_v51, %v3405_v20 }
 0x797   :  { %v1459_v22 = vadd.f32 %v1457_v24, %v1454_v0  ;;  %v1145_v27 = vpop.permute.xlu1 %1144  ;;  %v1643_v34 = vadd.f32 %v1641_v61, %v1638_v19  ;;  %v3491_v50 = vpop.permute.xlu0 %1343  ;;  %v1139_v24 = vrot.slane %v1137_v52, 6  ;;  %v3502_v26 = vrot.slane %v914_v2, %v3159_v5 }
 0x798   :  { %v1310_v39 = vadd.f32 %v1308_v32, %v1305_v8  ;;  %v1151_v58 = vmul.f32 %v3489_v62, %v1145_v27  ;;  %v1160_v8 = vrot.slane %v914_v2, %v3161_v6  ;;  %v1654_v36 = vmul.f32 %v3393_v56, %v3457_v29 }
 0x799   :  { %v1464_v18 = vadd.f32 %v1462_v60, %v1459_v22  ;;  %v1648_v0 = vadd.f32 %v1646_v7, %v1643_v34  ;;  %v1651_v60 = vrot.slane %v1649_v17, 6  ;;  %v1141_v9 = vadd.f32 %v1139_v24, %v1132_v16 }
 0x79a   :  { %v1315_v45 = vadd.f32 %v1313_v10, %v1310_v39  ;;  %v1485_v20 = vmul.f32 %v3330_v47, %v3429_v15  ;;  %v1482_v13 = vrot.slane %v1480_v54, 4  ;;  %v1328_v6 = vrot.slane %v1326_v30, 6  ;;  %v1786_v15 = vld [vmem:[#allocation2] ss:$0 sm:$0xff] }
 0x79b   :  { %v1469_v1 = vadd.f32 %v1467_v43, %v1464_v18  ;;  %v1165_v32 = vpop.permute.xlu0 %1164  ;;  %v1152_v3 = vadd.f32 %v1151_v58, %v1141_v9  ;;  %v1653_v38 = vadd.f32 %v1651_v60, %v1648_v0  ;;  %v1659_v5 = vmul.f32 %v3391_v53, %v3465_v37 }
 0x79c   :  { %v3475_v28 = vpop.permute.xlu1 %1337  ;;  %v1320_v25 = vadd.f32 %v1318_v57, %v1315_v45  ;;  %v1331_v18 = vmul.f32 %v3419_v48, %v3465_v37  ;;  %v1171_v56 = vmul.f32 %v3502_v26, %v1165_v32  ;;  %v1656_v55 = vrot.slane %v1654_v36, 6 }
 0x79d   :  { %v1474_v12 = vadd.f32 %v1472_v4, %v1469_v1  ;;  %v1487_v42 = vrot.slane %v1485_v20, 6  ;;  %v1490_v19 = vmul.f32 %v3377_v40, %v3457_v29  ;;  %v1661_v2 = vrot.slane %v1659_v5, 6 }
 0x79e   :  { %v1325_v27 = vadd.f32 %v1323_v11, %v1320_v25  ;;  %v1658_v43 = vadd.f32 %v1656_v55, %v1653_v38  ;;  %v1333_v31 = vrot.slane %v1331_v18, 6  ;;  %v1495_v52 = vmul.f32 %v3441_v51, %v3465_v37 }
 0x79f   :  { %v1479_v22 = vadd.f32 %v1477_v41, %v1474_v12  ;;  %v1492_v14 = vrot.slane %v1490_v19, 6  ;;  %v1678_v46 = vpop.permute.xlu0 %1677  ;;  %v1340_v40 = vmul.f32 %v3475_v28, %v3489_v62  ;;  %v1346_v12 = vmul.f32 %v3491_v50, %v1160_v8 }
 0x7a0   :  { %v1330_v47 = vadd.f32 %v1328_v6, %v1325_v27  ;;  %v1663_v45 = vadd.f32 %v1661_v2, %v1658_v43  ;;  %v1680_v57 = vmul.f32 %v1678_v46, %v3502_v26  ;;  %v1497_v7 = vrot.slane %v1495_v52, 6 }
 0x7a1   :  { %v1666_v21 = vpop.permute.xlu1 %1665  ;;  %v1484_v39 = vadd.f32 %v1482_v13, %v1479_v22  ;;  %v1504_v28 = vmul.f32 %v3467_v59, %v3489_v62 }
 0x7a2   :  { %v1668_v61 = vmul.f32 %v1666_v21, %v3489_v62  ;;  %v1335_v1 = vadd.f32 %v1333_v31, %v1330_v47 }
 0x7a3   :  { %v1489_v53 = vadd.f32 %v1487_v42, %v1484_v39 }
 0x7a4   :  { %v1669_v4 = vadd.f32 %v1668_v61, %v1663_v45  ;;  %v1341_v63 = vadd.f32 %v1340_v40, %v1335_v1 }
 0x7a5   :  { %v1494_v35 = vadd.f32 %v1492_v14, %v1489_v53 }
 0x7a6   :  { %v1155_v33 = vpop.permute.xlu1 %1154  ;;  %v1347_v37 = vadd.f32 %v1346_v12, %v1341_v63 }
 0x7a7   :  { %v1161_v49 = vmul.f32 %v1160_v8, %v1155_v33  ;;  %v1499_v16 = vadd.f32 %v1497_v7, %v1494_v35 }
 0x7a9   :  { %v1162_v23 = vadd.f32 %v1161_v49, %v1152_v3  ;;  %v1505_v58 = vadd.f32 %v1504_v28, %v1499_v16 }
 0x7ab   :  { %v1508_v10 = vpop.permute.xlu1 %1507  ;;  %v1172_v44 = vadd.f32 %v1171_v56, %v1162_v23 }
 0x7ac   :  { %v1510_v25 = vmul.f32 %v1508_v10, %v1160_v8 }
 0x7ad   :  { %v1179_v48 = vadd.f32 %v1786_v15, %v1172_v44 }
 0x7ae   :  { %v1511_v50 = vadd.f32 %v1510_v25, %v1505_v58 }
 0x7af   :  { %2468 = vtanh.f32 %v1179_v48 }
 0x7b0   :  { %v1672_v29 = vpop.permute.xlu1 %1671 }
 0x7b1   :  { %v1674_v34 = vmul.f32 %v1672_v29, %v1160_v8 }
 0x7b3   :  { %v1675_v17 = vadd.f32 %v1674_v34, %v1669_v4 }
 0x7b5   :  { %v1350_v21 = vpop.permute.xlu1 %1349  ;;  %v1681_v51 = vadd.f32 %v1680_v57, %v1675_v17 }
 0x7b6   :  { %v1352_v24 = vmul.f32 %v1350_v21, %v3502_v26 }
 0x7b7   :  { %v1682_v41 = vadd.f32 %v1786_v15, %v1681_v51 }
 0x7b8   :  { %v1353_v0 = vadd.f32 %v1352_v24, %v1347_v37 }
 0x7b9   :  { %v2469_v54 = vpop.eup %2468  ;;  %2470 = vtanh.f32 %v1682_v41 }
 0x7ba   :  { %v1354_v11 = vadd.f32 %v1786_v15, %v1353_v0  ;;  %v1514_v30 = vpop.permute.xlu1 %1513  ;;  %1208 = vst.msk [vmem:[%s3573_s12] sm:$0x3] %vm1207_vm5, %v2469_v54 }
 0x7bb   :  { %v1516_v60 = vmul.f32 %v1514_v30, %v3502_v26 }
 0x7bc   :  { %2472 = vtanh.f32 %v1354_v11 }
 0x7bd   :  { %v1517_v36 = vadd.f32 %v1516_v60, %v1511_v50 }
 0x7be   :  { %v1187_v59 = vpop.permute.xlu1 %1186 }
 0x7bf   :  { %v1518_v62 = vadd.f32 %v1786_v15, %v1517_v36  ;;  %v1356_v8 = vadd.f32 %v1353_v0, %v1187_v59  ;;  %v1189_v22 = vadd.f32 %v1187_v59, %v1172_v44  ;;  %v1520_v9 = vadd.f32 %v1517_v36, %v1187_v59 }
 0x7c0   :  { %v1684_v27 = vadd.f32 %v1681_v51, %v1187_v59 }
 0x7c1   :  { %2474 = vtanh.f32 %v1518_v62  ;;  %v1357_v20 = vsel %vm1190_vm6, %v1356_v8, -inf  ;;  %v1191_v32 = vsel %vm1190_vm6, %v1189_v22, -inf  ;;  %v1521_v26 = vsel %vm1190_vm6, %v1520_v9, -inf }
 0x7c2   :  { %1358 = vmax.xlane.f32.xlu0 %v1357_v20  ;;  %1192 = vmax.xlane.f32.xlu1 %v1191_v32  ;;  %v1685_v13 = vsel %vm1190_vm6, %v1684_v27, -inf }
 0x7c3   :  { %v2471_v33 = vpop.eup %2470 }
 0x7c4   :  { %1700 = vst.msk [vmem:[%s3573_s12 + $0x6] sm:$0x3] %vm1207_vm5, %v2471_v33 }
 0x7c6   :  { %v2473_v3 = vpop.eup %2472  ;;  %1522 = vmax.xlane.f32.xlu0 %v1521_v26  ;;  %1686 = vmax.xlane.f32.xlu1 %v1685_v13 }
 0x7c7   :  { %1372 = vst.msk [vmem:[%s3573_s12 + $0x2] sm:$0x3] %vm1207_vm5, %v2473_v3 }
 0x7cb   :  { %v2475_v38 = vpop.eup %2474 }
 0x7cc   :  { %1536 = vst.msk [vmem:[%s3573_s12 + $0x4] sm:$0x3] %vm1207_vm5, %v2475_v38 }
 0x84f   :  { %v1193_v49 = vpop.xlane.xlu1 %1192  ;;  %v1359_v6 = vpop.xlane.xlu0 %1358 }
 0x850   :  { %v1194_v5 = vsub.f32 %v1189_v22, %v1193_v49  ;;  %v1360_v18 = vsub.f32 %v1356_v8, %v1359_v6 }
 0x852   :  { %v1195_v56 = vmul.f32 1.442695, %v1194_v5  ;;  %v1361_v55 = vmul.f32 1.442695, %v1360_v18 }
 0x853   :  { %v1687_v39 = vpop.xlane.xlu1 %1686  ;;  %v1523_v23 = vpop.xlane.xlu0 %1522 }
 0x854   :  { %2476 = vpow2.f32 %v1195_v56  ;;  %v1524_v47 = vsub.f32 %v1520_v9, %v1523_v23  ;;  %v1688_v15 = vsub.f32 %v1684_v27, %v1687_v39 }
 0x855   :  { %2478 = vpow2.f32 %v1361_v55 }
 0x856   :  { %v1525_v42 = vmul.f32 1.442695, %v1524_v47  ;;  %v1689_v19 = vmul.f32 1.442695, %v1688_v15 }
 0x858   :  { %2480 = vpow2.f32 %v1525_v42 }
 0x859   :  { %2482 = vpow2.f32 %v1689_v19 }
 0x85e   :  { %v2477_v43 = vpop.eup %2476 }
 0x85f   :  { %v2479_v10 = vpop.eup %2478  ;;  %1198 = vrot.lane.b32.xlu0 %v2477_v43, %s2509_s0 }
 0x860   :  { %1364 = vrot.lane.b32.xlu1 %v2479_v10, %s2509_s0 }
 0x862   :  { %v2481_v44 = vpop.eup %2480 }
 0x863   :  { %v2483_v31 = vpop.eup %2482 }
 0x864   :  { %1528 = vrot.lane.b32.xlu1 %v2481_v44, %s2509_s0 }
 0x868   :  { %1692 = vrot.lane.b32.xlu1 %v2483_v31, %s2509_s0 }
 0x8d1   :  { %v1199_v2 = vpop.permute.xlu0 %1198 }
 0x8d2   :  { %v1365_v53 = vpop.permute.xlu1 %1364  ;;  %v1202_v61 = vsel %vm1201_vm7, %v1199_v2, 0.0 }
 0x8d3   :  { %v1367_v48 = vsel %vm1201_vm7, %v1365_v53, 0.0  ;;  %1203 = vadd.xlane.f32.xlu1 %v1202_v61 }
 0x8d4   :  { %1368 = vadd.xlane.f32.xlu0 %v1367_v48 }
 0x8d6   :  { %v1529_v1 = vpop.permute.xlu1 %1528 }
 0x8d7   :  { %v1531_v14 = vsel %vm1201_vm7, %v1529_v1, 0.0 }
 0x8d8   :  { %1532 = vadd.xlane.f32.xlu1 %v1531_v14 }
 0x8da   :  { %v1693_v52 = vpop.permute.xlu1 %1692 }
 0x8db   :  { %v1695_v45 = vsel %vm1201_vm7, %v1693_v52, 0.0 }
 0x8dc   :  { %1696 = vadd.xlane.f32.xlu0 %v1695_v45 }
 0x960   :  { %v1204_v46 = vpop.xlane.xlu1 %1203 }
 0x961   :  { %2484 = vrcp.f32 %v1204_v46  ;;  %v1369_v40 = vpop.xlane.xlu0 %1368 }
 0x962   :  { %2486 = vrcp.f32 %v1369_v40 }
 0x965   :  { %v1533_v29 = vpop.xlane.xlu1 %1532 }
 0x966   :  { %2488 = vrcp.f32 %v1533_v29 }
 0x969   :  { %v1697_v4 = vpop.xlane.xlu0 %1696 }
 0x96a   :  { %2490 = vrcp.f32 %v1697_v4 }
 0x96b   :  { %v2485_v35 = vpop.eup %2484 }
 0x96c   :  { %v2487_v34 = vpop.eup %2486  ;;  %v1206_v63 = vmul.f32 %v2485_v35, %v2477_v43 }
 0x96d   :  { %v1371_v57 = vmul.f32 %v2487_v34, %v2479_v10 }
 0x96e   :  { %1209 = vst.msk [vmem:[%s3573_s12] sm:$0x3] %vm1190_vm6, %v1206_v63 }
 0x96f   :  { %1373 = vst.msk [vmem:[%s3573_s12 + $0x2] sm:$0x3] %vm1190_vm6, %v1371_v57 }
 0x970   :  { %v2489_v7 = vpop.eup %2488 }
 0x971   :  { %v1535_v17 = vmul.f32 %v2489_v7, %v2481_v44 }
 0x973   :  { %1537 = vst.msk [vmem:[%s3573_s12 + $0x4] sm:$0x3] %vm1190_vm6, %v1535_v17 }
 0x974   :  { %v2491_v12 = vpop.eup %2490 }
 0x975   :  { %v1699_v16 = vmul.f32 %v2491_v12, %v2483_v31 }
 0x977   :  { %1701 = vst.msk [vmem:[%s3573_s12 + $0x6] sm:$0x3] %vm1190_vm6, %v1699_v16 }

</bundles_post_ra>
